<compile_context>
chip_gen: v7x
topology: tpu7x:2x2x1
jax: 0.10.0
libtpu: 0.0.40
codegen_flags: <defaults>
</compile_context>

<pallas_src>
import math

import jax
import jax.numpy as jnp
from jax import lax
from jax.experimental import pallas as pl
from jax.experimental.pallas import tpu as pltpu

NUM_HEADS = 4          # Attention_org_cross hard-codes a 4-way split
EPS_LN = 1e-6          # LayerNorm eps in the module
EPS_IN = 1e-5          # InstanceNorm2d default eps
EPS_BN = 1e-5          # BatchNorm2d default eps


# ----------------------------------------------------------------------------
# in-kernel helpers
# ----------------------------------------------------------------------------
def _layernorm(x, g, b):
    mu = jnp.mean(x, axis=-1, keepdims=True)
    var = jnp.mean((x - mu) ** 2, axis=-1, keepdims=True)
    return (x - mu) * lax.rsqrt(var + EPS_LN) * g + b


def _gelu(x):
    # exact (erf) GELU, matching nn.GELU() default
    return 0.5 * x * (1.0 + lax.erf(x * (1.0 / math.sqrt(2.0))))


# ----------------------------------------------------------------------------
# fused kernel: embed -> L x Block_ViT_cross -> encoder_norm -> reconstruct
# rows 0..n-1 of the stacked token block are the S stream, rows n..2n-1 are T.
# ----------------------------------------------------------------------------
def make_fused_kernel(C, n, L):
    d = C // NUM_HEADS
    scale = 1.0 / math.sqrt(C)          # config.KV_sizec == channel_num[4] == C
    inv_d2 = 1.0 / float(d * d)

    def kernel(patch_ref, ew_ref, ebp_ref, mask_ref, ln_ref, wqkv_ref,
               wo_ref, fcw_ref, fcb_ref, encln_ref, rw_ref, rb_ref, out_ref):
        # ---- patch embedding (conv stride==k as matmul) + bias + pos -------
        ST = jnp.dot(patch_ref[0], ew_ref[...],
                     preferred_element_type=jnp.float32) + ebp_ref[...]   # (2n, C)

        maskf = mask_ref[...]                 # (C, C): 1.0 where same head block
        maskb = maskf > 0.5

        def inorm_softmax(sc):
            """InstanceNorm2d + softmax on the d x d diagonal (head) blocks."""
            # per-head block mean / variance via masked reductions (exact)
            colsum = jnp.sum(jnp.where(maskb, sc, 0.0), axis=0, keepdims=True)
            mean = jnp.sum(maskf * colsum, axis=1, keepdims=True) * inv_d2    # (C,1)
            cen = sc - mean
            colsq = jnp.sum(jnp.where(maskb, cen * cen, 0.0), axis=0, keepdims=True)
            var = jnp.sum(maskf * colsq, axis=1, keepdims=True) * inv_d2
            z = cen * lax.rsqrt(var + EPS_IN)
            # per-head softmax over columns: off-block -> -inf -> exp == 0
            z = jnp.where(maskb, z, -jnp.inf)
            z = z - jnp.max(z, axis=-1, keepdims=True)
            e = jnp.exp(z)
            denom = jnp.sum(e, axis=-1, keepdims=True)
            return e * pl.reciprocal(denom, approx=True)    # (C, C), zero off-block

        # ---- Block_ViT_cross layers (unrolled; weights live in VMEM) -------
        for l in range(L):
            ln = ln_ref[l]                                   # (6, C)
            gq, bq = ln[0:1], ln[1:2]                        # attn_normQ
            gkv, bkv = ln[2:3], ln[3:4]                      # attn_normKV
            gf, bf = ln[4:5], ln[5:6]                        # ffn_norm

            STn = _layernorm(ST, gq, bq)                     # shared by S and T
            STkv = _layernorm(STn, gkv, bkv)                 # normKV(normQ(x))

            # block-diagonal head weights -> one (2n, C) @ (C, C) matmul each
            Q = jnp.dot(STn, wqkv_ref[l, 0], preferred_element_type=jnp.float32)
            K = jnp.dot(STkv, wqkv_ref[l, 1], preferred_element_type=jnp.float32)
            V = jnp.dot(STkv, wqkv_ref[l, 2], preferred_element_type=jnp.float32)
            Qs, Qt = Q[:n], Q[n:]
            Ks, Kt = K[:n], K[n:]
            Vs, Vt = V[:n], V[n:]

            # channel-attention scores Q^T @ K_other; heads sit on diag blocks
            sc = lax.dot_general(Qs, Kt, (((0,), (0,)), ((), ())),
                                 preferred_element_type=jnp.float32) * scale
            scd = lax.dot_general(Qt, Ks, (((0,), (0,)), ((), ())),
                                  preferred_element_type=jnp.float32) * scale
            P = inorm_softmax(sc)        # S-query / T-KV path
            Pd = inorm_softmax(scd)      # T-query / S-KV path

            # context^T = V_other @ P^T  (exact: P is zero off the head blocks)
            ctx = lax.dot_general(Vt, P, (((1,), (1,)), ((), ())),
                                  preferred_element_type=jnp.float32)   # (n, C)
            ctxd = lax.dot_general(Vs, Pd, (((1,), (1,)), ((), ())),
                                   preferred_element_type=jnp.float32)
            O = jnp.dot(ctx, wo_ref[l, 0], preferred_element_type=jnp.float32)
            Od = jnp.dot(ctxd, wo_ref[l, 1], preferred_element_type=jnp.float32)

            ST = ST + jnp.concatenate([Od, O], axis=0)       # S += T2S ; T += S2T

            # shared MLP applied to the stacked streams
            fcb = fcb_ref[l]                                 # (2, C)
            Xf = _layernorm(ST, gf, bf)
            H1 = _gelu(jnp.dot(Xf, fcw_ref[l, 0],
                               preferred_element_type=jnp.float32) + fcb[0:1])
            ST = ST + jnp.dot(H1, fcw_ref[l, 1],
                              preferred_element_type=jnp.float32) + fcb[1:2]

        # ---- encoder_norm + Reconstruct (1x1 conv, BN(eval) folded, ReLU) --
        encln = encln_ref[...]
        STe = _layernorm(ST, encln[0:1], encln[1:2])
        Y = jnp.dot(STe, rw_ref[...],
                    preferred_element_type=jnp.float32) + rb_ref[...]
        out_ref[0] = jnp.maximum(Y, 0.0)

    return kernel


def fused_forward(patches, params):
    """patches: (B, 2n, K) with S-rows then T-rows. Returns tokens (B, 2n, C)."""
    B, n2, K = patches.shape
    C = params["embed_w"].shape[1]
    L = params["ln"].shape[0]
    n = n2 // 2
    kernel = make_fused_kernel(C, n, L)

    def full(shape):
        return pl.BlockSpec(shape, lambda b: (0,) * len(shape))

    return pl.pallas_call(
        kernel,
        out_shape=jax.ShapeDtypeStruct((B, n2, C), jnp.float32),
        grid=(B,),
        in_specs=[
            pl.BlockSpec((1, n2, K), lambda b: (b, 0, 0)),   # patches (K lane-dense)
            full((K, C)),                                    # embed weight
            full((n2, C)),                                   # embed bias + pos (S|T)
            full((C, C)),                                    # head block mask
            full((L, 6, C)),                                 # LayerNorm gammas/betas
            full((L, 3, C, C)),                              # block-diag Q/K/V
            full((L, 2, C, C)),                              # out / outd (perm rows)
            full((L, 2, C, C)),                              # MLP fc1 / fc2
            full((L, 2, C)),                                 # MLP biases
            full((2, C)),                                    # encoder_norm
            full((C, C)),                                    # recon 1x1 conv (BN folded)
            full((1, C)),                                    # recon bias (BN folded)
        ],
        out_specs=pl.BlockSpec((1, n2, C), lambda b: (b, 0, 0)),
        compiler_params=pltpu.CompilerParams(dimension_semantics=("parallel",)),
    )(patches, params["embed_w"], params["embed_bp"], params["head_mask"],
      params["ln"], params["wqkv"], params["wo"], params["fcw"], params["fcb"],
      params["enc_ln"], params["rec_w"], params["rec_b"])


# ----------------------------------------------------------------------------
# pure-JAX layout glue
# ----------------------------------------------------------------------------
def extract_patches(x, p):
    """(B, C, H, W) -> (B, n_patches, C*p*p), matching Conv2d(k=p, stride=p)."""
    B, C, H, W = x.shape
    h, w = H // p, W // p
    x = x.reshape(B, C, h, p, w, p)
    x = jnp.transpose(x, (0, 2, 4, 1, 3, 5))        # (B, h, w, C, p, p)
    return x.reshape(B, h * w, C * p * p)


def upsample_tokens(tok, h, w, p):
    """(B, n, C) -> (B, C, h*p, w*p) nearest-neighbor upsample."""
    B, n, C = tok.shape
    img = tok.reshape(B, h, w, C)
    img = jnp.repeat(jnp.repeat(img, p, axis=1), p, axis=2)
    return jnp.transpose(img, (0, 3, 1, 2))


# ----------------------------------------------------------------------------
# parameters (deterministic, synthetic), pre-packed for the fused kernel
# ----------------------------------------------------------------------------
def init_params(key, C, n, patch, num_layers):
    d = C // NUM_HEADS
    K = C * patch * patch
    keys = jax.random.split(key, 4 + num_layers)

    def rnd(k, shape, s=0.05):
        return jax.random.normal(k, shape, jnp.float32) * s

    # Channel_Embeddings: Conv2d(C, C, k=patch, stride=patch) + zero pos-embed
    embed_w = rnd(keys[0], (C, C, patch, patch))          # torch conv weight
    embed_w_t = embed_w.reshape(C, K).T                   # (K, C) for x @ W^T
    embed_b = rnd(keys[1], (1, C))
    pos = jnp.zeros((n, C), jnp.float32)                  # nn.Parameter(zeros)
    bp = pos + embed_b                                    # fold bias + position
    embed_bp = jnp.concatenate([bp, bp], axis=0)          # (2n, C): S rows | T rows

    # row permutation implementing torch's permute(0,3,2,1).view flatten order
    perm = jnp.array([c4 * NUM_HEADS + hh
                      for hh in range(NUM_HEADS) for c4 in range(d)], jnp.int32)

    def block_diag(heads):                                # (H, d, d) -> (C, C)
        m = jnp.zeros((C, C), jnp.float32)
        for h in range(NUM_HEADS):
            m = m.at[h * d:(h + 1) * d, h * d:(h + 1) * d].set(heads[h])
        return m

    ones = jnp.ones((1, C), jnp.float32)
    zeros = jnp.zeros((1, C), jnp.float32)

    ln_l, wqkv_l, wo_l, fcw_l, fcb_l = [], [], [], [], []
    for l in range(num_layers):
        lk = jax.random.split(keys[2 + l], 7)
        ln_l.append(jnp.concatenate([ones, zeros, ones, zeros, ones, zeros], 0))
        qkv_h = rnd(lk[0], (3, NUM_HEADS, d, d))          # per-head Linears, (in,out)
        wqkv_l.append(jnp.stack([block_diag(qkv_h[i]) for i in range(3)], axis=0))
        wo_t = rnd(lk[1], (C, C))                         # out.weight^T  (in, out)
        wod_t = rnd(lk[2], (C, C))                        # outd.weight^T
        wo_l.append(jnp.stack([wo_t[perm, :], wod_t[perm, :]], axis=0))
        fcw_l.append(jnp.stack([rnd(lk[3], (C, C)), rnd(lk[4], (C, C))], axis=0))
        fcb_l.append(jnp.stack([rnd(lk[5], (C,), 1e-6), rnd(lk[6], (C,), 1e-6)], axis=0))

    # encoder_norm + Reconstruct (1x1 conv, eval-mode BatchNorm folded in)
    enc_ln = jnp.concatenate([ones, zeros], axis=0)                     # (2, C)
    rec_w = rnd(keys[2 + num_layers], (C, C)).T                         # (in, out)
    rec_b = rnd(keys[3 + num_layers], (1, C))
    bn_scale = 1.0 / math.sqrt(1.0 + EPS_BN)      # BN eval: mean 0, var 1, w 1, b 0
    rec_w_f = rec_w * bn_scale
    rec_b_f = rec_b * bn_scale

    # block-diagonal head mask used by the in-kernel InstanceNorm / softmax
    hid = jnp.arange(C) // d
    head_mask = (hid[:, None] == hid[None, :]).astype(jnp.float32)      # (C, C)

    return dict(embed_w=embed_w_t, embed_bp=embed_bp, head_mask=head_mask,
                ln=jnp.stack(ln_l), wqkv=jnp.stack(wqkv_l), wo=jnp.stack(wo_l),
                fcw=jnp.stack(fcw_l), fcb=jnp.stack(fcb_l),
                enc_ln=enc_ln, rec_w=rec_w_f, rec_b=rec_b_f)


# ----------------------------------------------------------------------------
# full forward
# ----------------------------------------------------------------------------
def channel_transformer_share(S_img, T_img, params, patch):
    B, C, H, W = S_img.shape
    h, w = H // patch, W // patch
    n = h * w
    patches = jnp.concatenate([extract_patches(S_img, patch),
                               extract_patches(T_img, patch)], axis=1)  # (B, 2n, K)
    tok = fused_forward(patches, params)                                # (B, 2n, C)
    S_out = upsample_tokens(tok[:, :n], h, w, patch) + S_img
    T_out = upsample_tokens(tok[:, n:], h, w, patch) + T_img
    return S_out, T_out


if __name__ == "__main__":
    B, C, H = 2, 32, 8          # channel_num[4] -> 32 (scaled down), img_size -> 8
    patch = 4                   # patchSize[3]
    num_layers = 2              # config.transformer['num_layers']
    n = (H // patch) ** 2

    key = jax.random.PRNGKey(0)
    kS, kT, kP = jax.random.split(key, 3)
    S_img = jax.random.normal(kS, (B, C, H, H), jnp.float32)
    T_img = jax.random.normal(kT, (B, C, H, H), jnp.float32)

    params = init_params(kP, C, n, patch, num_layers)

    fwd = jax.jit(lambda s, t, p: channel_transformer_share(s, t, p, patch))
    S_out, T_out = fwd(S_img, T_img, params)
    jax.block_until_ready((S_out, T_out))
    assert S_out.shape == S_img.shape and T_out.shape == T_img.shape
    assert bool(jnp.all(jnp.isfinite(S_out))) and bool(jnp.all(jnp.isfinite(T_out)))
    print("KERNEL_OK")
</pallas_src>

<mosaic_0001>
module attributes {stable_mosaic.version = 11 : i64} {
  func.func @kernel(%arg0: i32, %arg1: memref<1x8x512xf32, #tpu.memory_space<vmem>>, %arg2: memref<512x32xf32, #tpu.memory_space<vmem>>, %arg3: memref<8x32xf32, #tpu.memory_space<vmem>>, %arg4: memref<32x32xf32, #tpu.memory_space<vmem>>, %arg5: memref<2x6x32xf32, #tpu.memory_space<vmem>>, %arg6: memref<2x3x32x32xf32, #tpu.memory_space<vmem>>, %arg7: memref<2x2x32x32xf32, #tpu.memory_space<vmem>>, %arg8: memref<2x2x32x32xf32, #tpu.memory_space<vmem>>, %arg9: memref<2x2x32xf32, #tpu.memory_space<vmem>>, %arg10: memref<2x32xf32, #tpu.memory_space<vmem>>, %arg11: memref<32x32xf32, #tpu.memory_space<vmem>>, %arg12: memref<1x32xf32, #tpu.memory_space<vmem>>, %arg13: memref<1x8x32xf32, #tpu.memory_space<vmem>>) attributes {dimension_semantics = [#tpu.dimension_semantics<parallel>], iteration_bounds = array<i64: 2>, scalar_prefetch = 0 : i64, scratch_operands = 0 : i64, tpu.core_type = #tpu.core_type<tc>, window_params = [{transform_indices = @transform_0, window_bounds = array<i64: 1, 8, 512>}, {pipeline_mode = #tpu.pipeline_mode<synchronous>, transform_indices = @transform_1, window_bounds = array<i64: 512, 32>}, {pipeline_mode = #tpu.pipeline_mode<synchronous>, transform_indices = @transform_2, window_bounds = array<i64: 8, 32>}, {pipeline_mode = #tpu.pipeline_mode<synchronous>, transform_indices = @transform_3, window_bounds = array<i64: 32, 32>}, {pipeline_mode = #tpu.pipeline_mode<synchronous>, transform_indices = @transform_4, window_bounds = array<i64: 2, 6, 32>}, {pipeline_mode = #tpu.pipeline_mode<synchronous>, transform_indices = @transform_5, window_bounds = array<i64: 2, 3, 32, 32>}, {pipeline_mode = #tpu.pipeline_mode<synchronous>, transform_indices = @transform_6, window_bounds = array<i64: 2, 2, 32, 32>}, {pipeline_mode = #tpu.pipeline_mode<synchronous>, transform_indices = @transform_7, window_bounds = array<i64: 2, 2, 32, 32>}, {pipeline_mode = #tpu.pipeline_mode<synchronous>, transform_indices = @transform_8, window_bounds = array<i64: 2, 2, 32>}, {pipeline_mode = #tpu.pipeline_mode<synchronous>, transform_indices = @transform_9, window_bounds = array<i64: 2, 32>}, {pipeline_mode = #tpu.pipeline_mode<synchronous>, transform_indices = @transform_10, window_bounds = array<i64: 32, 32>}, {pipeline_mode = #tpu.pipeline_mode<synchronous>, transform_indices = @transform_11, window_bounds = array<i64: 1, 32>}, {transform_indices = @transform_12, window_bounds = array<i64: 1, 8, 32>}]} {
    %c0 = arith.constant 0 : index
    %c0_0 = arith.constant 0 : index
    %c0_1 = arith.constant 0 : index
    %0 = vector.load %arg1[%c0, %c0_0, %c0_1] : memref<1x8x512xf32, #tpu.memory_space<vmem>>, vector<1x8x512xf32>
    %1 = vector.shape_cast %0 : vector<1x8x512xf32> to vector<8x512xf32>
    %c0_2 = arith.constant 0 : index
    %c0_3 = arith.constant 0 : index
    %2 = vector.load %arg2[%c0_2, %c0_3] : memref<512x32xf32, #tpu.memory_space<vmem>>, vector<512x32xf32>
    %cst = arith.constant dense<0.000000e+00> : vector<8x32xf32>
    %3 = tpu.matmul %1, %2, %cst {dimension_numbers = #tpu.dot_dimension_numbers<[1], [0], [0], [1], [0, 0, 1, 1], [], []>} : vector<8x512xf32>, vector<512x32xf32>, vector<8x32xf32> -> vector<8x32xf32>
    %c0_4 = arith.constant 0 : index
    %c0_5 = arith.constant 0 : index
    %4 = vector.load %arg3[%c0_4, %c0_5] : memref<8x32xf32, #tpu.memory_space<vmem>>, vector<8x32xf32>
    %5 = arith.addf %3, %4 : vector<8x32xf32>
    %c0_6 = arith.constant 0 : index
    %c0_7 = arith.constant 0 : index
    %6 = vector.load %arg4[%c0_6, %c0_7] : memref<32x32xf32, #tpu.memory_space<vmem>>, vector<32x32xf32>
    %cst_8 = arith.constant 5.000000e-01 : f32
    %7 = vector.broadcast %cst_8 : f32 to vector<32x32xf32>
    %8 = arith.cmpf ogt, %6, %7 : vector<32x32xf32>
    %c0_9 = arith.constant 0 : index
    %c0_10 = arith.constant 0 : index
    %c0_11 = arith.constant 0 : index
    %9 = vector.load %arg5[%c0_9, %c0_10, %c0_11] : memref<2x6x32xf32, #tpu.memory_space<vmem>>, vector<1x6x32xf32>
    %10 = vector.shape_cast %9 : vector<1x6x32xf32> to vector<6x32xf32>
    %11 = vector.extract_strided_slice %10 {offsets = [0, 0], sizes = [1, 32], strides = [1, 1]} : vector<6x32xf32> to vector<1x32xf32>
    %12 = vector.extract_strided_slice %10 {offsets = [1, 0], sizes = [1, 32], strides = [1, 1]} : vector<6x32xf32> to vector<1x32xf32>
    %13 = vector.extract_strided_slice %10 {offsets = [2, 0], sizes = [1, 32], strides = [1, 1]} : vector<6x32xf32> to vector<1x32xf32>
    %14 = vector.extract_strided_slice %10 {offsets = [3, 0], sizes = [1, 32], strides = [1, 1]} : vector<6x32xf32> to vector<1x32xf32>
    %15 = vector.extract_strided_slice %10 {offsets = [4, 0], sizes = [1, 32], strides = [1, 1]} : vector<6x32xf32> to vector<1x32xf32>
    %16 = vector.extract_strided_slice %10 {offsets = [5, 0], sizes = [1, 32], strides = [1, 1]} : vector<6x32xf32> to vector<1x32xf32>
    %cst_12 = arith.constant dense<0.000000e+00> : vector<8xf32>
    %17 = vector.multi_reduction <add>, %5, %cst_12 [1] : vector<8x32xf32> to vector<8xf32>
    %18 = vector.shape_cast %17 : vector<8xf32> to vector<8x1xf32>
    %cst_13 = arith.constant 3.200000e+01 : f32
    %19 = vector.broadcast %cst_13 : f32 to vector<8x1xf32>
    %20 = arith.divf %18, %19 : vector<8x1xf32>
    %21 = vector.broadcast %20 : vector<8x1xf32> to vector<8x32xf32>
    %22 = arith.subf %5, %21 : vector<8x32xf32>
    %23 = arith.mulf %22, %22 : vector<8x32xf32>
    %cst_14 = arith.constant dense<0.000000e+00> : vector<8xf32>
    %24 = vector.multi_reduction <add>, %23, %cst_14 [1] : vector<8x32xf32> to vector<8xf32>
    %25 = vector.shape_cast %24 : vector<8xf32> to vector<8x1xf32>
    %cst_15 = arith.constant 3.200000e+01 : f32
    %26 = vector.broadcast %cst_15 : f32 to vector<8x1xf32>
    %27 = arith.divf %25, %26 : vector<8x1xf32>
    %28 = vector.broadcast %20 : vector<8x1xf32> to vector<8x32xf32>
    %29 = arith.subf %5, %28 : vector<8x32xf32>
    %cst_16 = arith.constant 9.99999997E-7 : f32
    %30 = vector.broadcast %cst_16 : f32 to vector<8x1xf32>
    %31 = arith.addf %27, %30 : vector<8x1xf32>
    %32 = math.rsqrt %31 : vector<8x1xf32>
    %33 = vector.broadcast %32 : vector<8x1xf32> to vector<8x32xf32>
    %34 = arith.mulf %29, %33 : vector<8x32xf32>
    %35 = vector.broadcast %11 : vector<1x32xf32> to vector<8x32xf32>
    %36 = arith.mulf %34, %35 : vector<8x32xf32>
    %37 = vector.broadcast %12 : vector<1x32xf32> to vector<8x32xf32>
    %38 = arith.addf %36, %37 : vector<8x32xf32>
    %cst_17 = arith.constant dense<0.000000e+00> : vector<8xf32>
    %39 = vector.multi_reduction <add>, %38, %cst_17 [1] : vector<8x32xf32> to vector<8xf32>
    %40 = vector.shape_cast %39 : vector<8xf32> to vector<8x1xf32>
    %cst_18 = arith.constant 3.200000e+01 : f32
    %41 = vector.broadcast %cst_18 : f32 to vector<8x1xf32>
    %42 = arith.divf %40, %41 : vector<8x1xf32>
    %43 = vector.broadcast %42 : vector<8x1xf32> to vector<8x32xf32>
    %44 = arith.subf %38, %43 : vector<8x32xf32>
    %45 = arith.mulf %44, %44 : vector<8x32xf32>
    %cst_19 = arith.constant dense<0.000000e+00> : vector<8xf32>
    %46 = vector.multi_reduction <add>, %45, %cst_19 [1] : vector<8x32xf32> to vector<8xf32>
    %47 = vector.shape_cast %46 : vector<8xf32> to vector<8x1xf32>
    %cst_20 = arith.constant 3.200000e+01 : f32
    %48 = vector.broadcast %cst_20 : f32 to vector<8x1xf32>
    %49 = arith.divf %47, %48 : vector<8x1xf32>
    %50 = vector.broadcast %42 : vector<8x1xf32> to vector<8x32xf32>
    %51 = arith.subf %38, %50 : vector<8x32xf32>
    %cst_21 = arith.constant 9.99999997E-7 : f32
    %52 = vector.broadcast %cst_21 : f32 to vector<8x1xf32>
    %53 = arith.addf %49, %52 : vector<8x1xf32>
    %54 = math.rsqrt %53 : vector<8x1xf32>
    %55 = vector.broadcast %54 : vector<8x1xf32> to vector<8x32xf32>
    %56 = arith.mulf %51, %55 : vector<8x32xf32>
    %57 = vector.broadcast %13 : vector<1x32xf32> to vector<8x32xf32>
    %58 = arith.mulf %56, %57 : vector<8x32xf32>
    %59 = vector.broadcast %14 : vector<1x32xf32> to vector<8x32xf32>
    %60 = arith.addf %58, %59 : vector<8x32xf32>
    %c0_22 = arith.constant 0 : index
    %c0_23 = arith.constant 0 : index
    %c0_24 = arith.constant 0 : index
    %c0_25 = arith.constant 0 : index
    %61 = vector.load %arg6[%c0_22, %c0_23, %c0_24, %c0_25] : memref<2x3x32x32xf32, #tpu.memory_space<vmem>>, vector<1x1x32x32xf32>
    %62 = vector.shape_cast %61 : vector<1x1x32x32xf32> to vector<32x32xf32>
    %cst_26 = arith.constant dense<0.000000e+00> : vector<8x32xf32>
    %63 = tpu.matmul %38, %62, %cst_26 {dimension_numbers = #tpu.dot_dimension_numbers<[1], [0], [0], [1], [0, 0, 1, 1], [], []>} : vector<8x32xf32>, vector<32x32xf32>, vector<8x32xf32> -> vector<8x32xf32>
    %c0_27 = arith.constant 0 : index
    %c1 = arith.constant 1 : index
    %c0_28 = arith.constant 0 : index
    %c0_29 = arith.constant 0 : index
    %64 = vector.load %arg6[%c0_27, %c1, %c0_28, %c0_29] : memref<2x3x32x32xf32, #tpu.memory_space<vmem>>, vector<1x1x32x32xf32>
    %65 = vector.shape_cast %64 : vector<1x1x32x32xf32> to vector<32x32xf32>
    %cst_30 = arith.constant dense<0.000000e+00> : vector<8x32xf32>
    %66 = tpu.matmul %60, %65, %cst_30 {dimension_numbers = #tpu.dot_dimension_numbers<[1], [0], [0], [1], [0, 0, 1, 1], [], []>} : vector<8x32xf32>, vector<32x32xf32>, vector<8x32xf32> -> vector<8x32xf32>
    %c0_31 = arith.constant 0 : index
    %c2 = arith.constant 2 : index
    %c0_32 = arith.constant 0 : index
    %c0_33 = arith.constant 0 : index
    %67 = vector.load %arg6[%c0_31, %c2, %c0_32, %c0_33] : memref<2x3x32x32xf32, #tpu.memory_space<vmem>>, vector<1x1x32x32xf32>
    %68 = vector.shape_cast %67 : vector<1x1x32x32xf32> to vector<32x32xf32>
    %cst_34 = arith.constant dense<0.000000e+00> : vector<8x32xf32>
    %69 = tpu.matmul %60, %68, %cst_34 {dimension_numbers = #tpu.dot_dimension_numbers<[1], [0], [0], [1], [0, 0, 1, 1], [], []>} : vector<8x32xf32>, vector<32x32xf32>, vector<8x32xf32> -> vector<8x32xf32>
    %70 = vector.extract_strided_slice %63 {offsets = [0, 0], sizes = [4, 32], strides = [1, 1]} : vector<8x32xf32> to vector<4x32xf32>
    %71 = vector.extract_strided_slice %63 {offsets = [4, 0], sizes = [4, 32], strides = [1, 1]} : vector<8x32xf32> to vector<4x32xf32>
    %72 = vector.extract_strided_slice %66 {offsets = [0, 0], sizes = [4, 32], strides = [1, 1]} : vector<8x32xf32> to vector<4x32xf32>
    %73 = vector.extract_strided_slice %66 {offsets = [4, 0], sizes = [4, 32], strides = [1, 1]} : vector<8x32xf32> to vector<4x32xf32>
    %74 = vector.extract_strided_slice %69 {offsets = [0, 0], sizes = [4, 32], strides = [1, 1]} : vector<8x32xf32> to vector<4x32xf32>
    %75 = vector.extract_strided_slice %69 {offsets = [4, 0], sizes = [4, 32], strides = [1, 1]} : vector<8x32xf32> to vector<4x32xf32>
    %cst_35 = arith.constant dense<0.000000e+00> : vector<32x32xf32>
    %76 = tpu.matmul %70, %73, %cst_35 {dimension_numbers = #tpu.dot_dimension_numbers<[0], [0], [1], [1], [0, 1, 1, 1], [], []>} : vector<4x32xf32>, vector<4x32xf32>, vector<32x32xf32> -> vector<32x32xf32>
    %cst_36 = arith.constant 0.176776692 : f32
    %77 = vector.broadcast %cst_36 : f32 to vector<32x32xf32>
    %78 = arith.mulf %76, %77 : vector<32x32xf32>
    %cst_37 = arith.constant dense<0.000000e+00> : vector<32x32xf32>
    %79 = tpu.matmul %71, %72, %cst_37 {dimension_numbers = #tpu.dot_dimension_numbers<[0], [0], [1], [1], [0, 1, 1, 1], [], []>} : vector<4x32xf32>, vector<4x32xf32>, vector<32x32xf32> -> vector<32x32xf32>
    %cst_38 = arith.constant 0.176776692 : f32
    %80 = vector.broadcast %cst_38 : f32 to vector<32x32xf32>
    %81 = arith.mulf %79, %80 : vector<32x32xf32>
    %cst_39 = arith.constant 0.000000e+00 : f32
    %82 = vector.broadcast %cst_39 : f32 to vector<32x32xf32>
    %83 = arith.select %8, %78, %82 : vector<32x32xi1>, vector<32x32xf32>
    %cst_40 = arith.constant dense<0.000000e+00> : vector<32xf32>
    %84 = vector.multi_reduction <add>, %83, %cst_40 [0] : vector<32x32xf32> to vector<32xf32>
    %85 = vector.shape_cast %84 : vector<32xf32> to vector<1x32xf32>
    %86 = vector.broadcast %85 : vector<1x32xf32> to vector<32x32xf32>
    %87 = arith.mulf %6, %86 : vector<32x32xf32>
    %cst_41 = arith.constant dense<0.000000e+00> : vector<32xf32>
    %88 = vector.multi_reduction <add>, %87, %cst_41 [1] : vector<32x32xf32> to vector<32xf32>
    %89 = vector.shape_cast %88 : vector<32xf32> to vector<32x1xf32>
    %cst_42 = arith.constant 1.562500e-02 : f32
    %90 = vector.broadcast %cst_42 : f32 to vector<32x1xf32>
    %91 = arith.mulf %89, %90 : vector<32x1xf32>
    %92 = vector.broadcast %91 : vector<32x1xf32> to vector<32x32xf32>
    %93 = arith.subf %78, %92 : vector<32x32xf32>
    %94 = arith.mulf %93, %93 : vector<32x32xf32>
    %cst_43 = arith.constant 0.000000e+00 : f32
    %95 = vector.broadcast %cst_43 : f32 to vector<32x32xf32>
    %96 = arith.select %8, %94, %95 : vector<32x32xi1>, vector<32x32xf32>
    %cst_44 = arith.constant dense<0.000000e+00> : vector<32xf32>
    %97 = vector.multi_reduction <add>, %96, %cst_44 [0] : vector<32x32xf32> to vector<32xf32>
    %98 = vector.shape_cast %97 : vector<32xf32> to vector<1x32xf32>
    %99 = vector.broadcast %98 : vector<1x32xf32> to vector<32x32xf32>
    %100 = arith.mulf %6, %99 : vector<32x32xf32>
    %cst_45 = arith.constant dense<0.000000e+00> : vector<32xf32>
    %101 = vector.multi_reduction <add>, %100, %cst_45 [1] : vector<32x32xf32> to vector<32xf32>
    %102 = vector.shape_cast %101 : vector<32xf32> to vector<32x1xf32>
    %cst_46 = arith.constant 1.562500e-02 : f32
    %103 = vector.broadcast %cst_46 : f32 to vector<32x1xf32>
    %104 = arith.mulf %102, %103 : vector<32x1xf32>
    %cst_47 = arith.constant 9.99999974E-6 : f32
    %105 = vector.broadcast %cst_47 : f32 to vector<32x1xf32>
    %106 = arith.addf %104, %105 : vector<32x1xf32>
    %107 = math.rsqrt %106 : vector<32x1xf32>
    %108 = vector.broadcast %107 : vector<32x1xf32> to vector<32x32xf32>
    %109 = arith.mulf %93, %108 : vector<32x32xf32>
    %cst_48 = arith.constant 0xFF800000 : f32
    %110 = vector.broadcast %cst_48 : f32 to vector<32x32xf32>
    %111 = arith.select %8, %109, %110 : vector<32x32xi1>, vector<32x32xf32>
    %cst_49 = arith.constant dense<0xFF800000> : vector<32xf32>
    %112 = vector.multi_reduction <maximumf>, %111, %cst_49 [1] : vector<32x32xf32> to vector<32xf32>
    %113 = vector.shape_cast %112 : vector<32xf32> to vector<32x1xf32>
    %114 = vector.broadcast %113 : vector<32x1xf32> to vector<32x32xf32>
    %115 = arith.subf %111, %114 : vector<32x32xf32>
    %116 = math.exp %115 : vector<32x32xf32>
    %cst_50 = arith.constant dense<0.000000e+00> : vector<32xf32>
    %117 = vector.multi_reduction <add>, %116, %cst_50 [1] : vector<32x32xf32> to vector<32xf32>
    %118 = vector.shape_cast %117 : vector<32xf32> to vector<32x1xf32>
    %119 = tpu.reciprocal %118 {approx = true} : vector<32x1xf32> -> vector<32x1xf32>
    %120 = vector.broadcast %119 : vector<32x1xf32> to vector<32x32xf32>
    %121 = arith.mulf %116, %120 : vector<32x32xf32>
    %cst_51 = arith.constant 0.000000e+00 : f32
    %122 = vector.broadcast %cst_51 : f32 to vector<32x32xf32>
    %123 = arith.select %8, %81, %122 : vector<32x32xi1>, vector<32x32xf32>
    %cst_52 = arith.constant dense<0.000000e+00> : vector<32xf32>
    %124 = vector.multi_reduction <add>, %123, %cst_52 [0] : vector<32x32xf32> to vector<32xf32>
    %125 = vector.shape_cast %124 : vector<32xf32> to vector<1x32xf32>
    %126 = vector.broadcast %125 : vector<1x32xf32> to vector<32x32xf32>
    %127 = arith.mulf %6, %126 : vector<32x32xf32>
    %cst_53 = arith.constant dense<0.000000e+00> : vector<32xf32>
    %128 = vector.multi_reduction <add>, %127, %cst_53 [1] : vector<32x32xf32> to vector<32xf32>
    %129 = vector.shape_cast %128 : vector<32xf32> to vector<32x1xf32>
    %cst_54 = arith.constant 1.562500e-02 : f32
    %130 = vector.broadcast %cst_54 : f32 to vector<32x1xf32>
    %131 = arith.mulf %129, %130 : vector<32x1xf32>
    %132 = vector.broadcast %131 : vector<32x1xf32> to vector<32x32xf32>
    %133 = arith.subf %81, %132 : vector<32x32xf32>
    %134 = arith.mulf %133, %133 : vector<32x32xf32>
    %cst_55 = arith.constant 0.000000e+00 : f32
    %135 = vector.broadcast %cst_55 : f32 to vector<32x32xf32>
    %136 = arith.select %8, %134, %135 : vector<32x32xi1>, vector<32x32xf32>
    %cst_56 = arith.constant dense<0.000000e+00> : vector<32xf32>
    %137 = vector.multi_reduction <add>, %136, %cst_56 [0] : vector<32x32xf32> to vector<32xf32>
    %138 = vector.shape_cast %137 : vector<32xf32> to vector<1x32xf32>
    %139 = vector.broadcast %138 : vector<1x32xf32> to vector<32x32xf32>
    %140 = arith.mulf %6, %139 : vector<32x32xf32>
    %cst_57 = arith.constant dense<0.000000e+00> : vector<32xf32>
    %141 = vector.multi_reduction <add>, %140, %cst_57 [1] : vector<32x32xf32> to vector<32xf32>
    %142 = vector.shape_cast %141 : vector<32xf32> to vector<32x1xf32>
    %cst_58 = arith.constant 1.562500e-02 : f32
    %143 = vector.broadcast %cst_58 : f32 to vector<32x1xf32>
    %144 = arith.mulf %142, %143 : vector<32x1xf32>
    %cst_59 = arith.constant 9.99999974E-6 : f32
    %145 = vector.broadcast %cst_59 : f32 to vector<32x1xf32>
    %146 = arith.addf %144, %145 : vector<32x1xf32>
    %147 = math.rsqrt %146 : vector<32x1xf32>
    %148 = vector.broadcast %147 : vector<32x1xf32> to vector<32x32xf32>
    %149 = arith.mulf %133, %148 : vector<32x32xf32>
    %cst_60 = arith.constant 0xFF800000 : f32
    %150 = vector.broadcast %cst_60 : f32 to vector<32x32xf32>
    %151 = arith.select %8, %149, %150 : vector<32x32xi1>, vector<32x32xf32>
    %cst_61 = arith.constant dense<0xFF800000> : vector<32xf32>
    %152 = vector.multi_reduction <maximumf>, %151, %cst_61 [1] : vector<32x32xf32> to vector<32xf32>
    %153 = vector.shape_cast %152 : vector<32xf32> to vector<32x1xf32>
    %154 = vector.broadcast %153 : vector<32x1xf32> to vector<32x32xf32>
    %155 = arith.subf %151, %154 : vector<32x32xf32>
    %156 = math.exp %155 : vector<32x32xf32>
    %cst_62 = arith.constant dense<0.000000e+00> : vector<32xf32>
    %157 = vector.multi_reduction <add>, %156, %cst_62 [1] : vector<32x32xf32> to vector<32xf32>
    %158 = vector.shape_cast %157 : vector<32xf32> to vector<32x1xf32>
    %159 = tpu.reciprocal %158 {approx = true} : vector<32x1xf32> -> vector<32x1xf32>
    %160 = vector.broadcast %159 : vector<32x1xf32> to vector<32x32xf32>
    %161 = arith.mulf %156, %160 : vector<32x32xf32>
    %cst_63 = arith.constant dense<0.000000e+00> : vector<4x32xf32>
    %162 = tpu.matmul %75, %121, %cst_63 {dimension_numbers = #tpu.dot_dimension_numbers<[1], [1], [0], [0], [0, 0, 1, 0], [], []>} : vector<4x32xf32>, vector<32x32xf32>, vector<4x32xf32> -> vector<4x32xf32>
    %cst_64 = arith.constant dense<0.000000e+00> : vector<4x32xf32>
    %163 = tpu.matmul %74, %161, %cst_64 {dimension_numbers = #tpu.dot_dimension_numbers<[1], [1], [0], [0], [0, 0, 1, 0], [], []>} : vector<4x32xf32>, vector<32x32xf32>, vector<4x32xf32> -> vector<4x32xf32>
    %c0_65 = arith.constant 0 : index
    %c0_66 = arith.constant 0 : index
    %c0_67 = arith.constant 0 : index
    %c0_68 = arith.constant 0 : index
    %164 = vector.load %arg7[%c0_65, %c0_66, %c0_67, %c0_68] : memref<2x2x32x32xf32, #tpu.memory_space<vmem>>, vector<1x1x32x32xf32>
    %165 = vector.shape_cast %164 : vector<1x1x32x32xf32> to vector<32x32xf32>
    %cst_69 = arith.constant dense<0.000000e+00> : vector<4x32xf32>
    %166 = tpu.matmul %162, %165, %cst_69 {dimension_numbers = #tpu.dot_dimension_numbers<[1], [0], [0], [1], [0, 0, 1, 1], [], []>} : vector<4x32xf32>, vector<32x32xf32>, vector<4x32xf32> -> vector<4x32xf32>
    %c0_70 = arith.constant 0 : index
    %c1_71 = arith.constant 1 : index
    %c0_72 = arith.constant 0 : index
    %c0_73 = arith.constant 0 : index
    %167 = vector.load %arg7[%c0_70, %c1_71, %c0_72, %c0_73] : memref<2x2x32x32xf32, #tpu.memory_space<vmem>>, vector<1x1x32x32xf32>
    %168 = vector.shape_cast %167 : vector<1x1x32x32xf32> to vector<32x32xf32>
    %cst_74 = arith.constant dense<0.000000e+00> : vector<4x32xf32>
    %169 = tpu.matmul %163, %168, %cst_74 {dimension_numbers = #tpu.dot_dimension_numbers<[1], [0], [0], [1], [0, 0, 1, 1], [], []>} : vector<4x32xf32>, vector<32x32xf32>, vector<4x32xf32> -> vector<4x32xf32>
    %170 = tpu.concatenate %169, %166 in 0 : vector<4x32xf32>, vector<4x32xf32> -> vector<8x32xf32>
    %171 = arith.addf %5, %170 : vector<8x32xf32>
    %c0_75 = arith.constant 0 : index
    %c0_76 = arith.constant 0 : index
    %c0_77 = arith.constant 0 : index
    %172 = vector.load %arg9[%c0_75, %c0_76, %c0_77] : memref<2x2x32xf32, #tpu.memory_space<vmem>>, vector<1x2x32xf32>
    %173 = vector.shape_cast %172 : vector<1x2x32xf32> to vector<2x32xf32>
    %cst_78 = arith.constant dense<0.000000e+00> : vector<8xf32>
    %174 = vector.multi_reduction <add>, %171, %cst_78 [1] : vector<8x32xf32> to vector<8xf32>
    %175 = vector.shape_cast %174 : vector<8xf32> to vector<8x1xf32>
    %cst_79 = arith.constant 3.200000e+01 : f32
    %176 = vector.broadcast %cst_79 : f32 to vector<8x1xf32>
    %177 = arith.divf %175, %176 : vector<8x1xf32>
    %178 = vector.broadcast %177 : vector<8x1xf32> to vector<8x32xf32>
    %179 = arith.subf %171, %178 : vector<8x32xf32>
    %180 = arith.mulf %179, %179 : vector<8x32xf32>
    %cst_80 = arith.constant dense<0.000000e+00> : vector<8xf32>
    %181 = vector.multi_reduction <add>, %180, %cst_80 [1] : vector<8x32xf32> to vector<8xf32>
    %182 = vector.shape_cast %181 : vector<8xf32> to vector<8x1xf32>
    %cst_81 = arith.constant 3.200000e+01 : f32
    %183 = vector.broadcast %cst_81 : f32 to vector<8x1xf32>
    %184 = arith.divf %182, %183 : vector<8x1xf32>
    %185 = vector.broadcast %177 : vector<8x1xf32> to vector<8x32xf32>
    %186 = arith.subf %171, %185 : vector<8x32xf32>
    %cst_82 = arith.constant 9.99999997E-7 : f32
    %187 = vector.broadcast %cst_82 : f32 to vector<8x1xf32>
    %188 = arith.addf %184, %187 : vector<8x1xf32>
    %189 = math.rsqrt %188 : vector<8x1xf32>
    %190 = vector.broadcast %189 : vector<8x1xf32> to vector<8x32xf32>
    %191 = arith.mulf %186, %190 : vector<8x32xf32>
    %192 = vector.broadcast %15 : vector<1x32xf32> to vector<8x32xf32>
    %193 = arith.mulf %191, %192 : vector<8x32xf32>
    %194 = vector.broadcast %16 : vector<1x32xf32> to vector<8x32xf32>
    %195 = arith.addf %193, %194 : vector<8x32xf32>
    %c0_83 = arith.constant 0 : index
    %c0_84 = arith.constant 0 : index
    %c0_85 = arith.constant 0 : index
    %c0_86 = arith.constant 0 : index
    %196 = vector.load %arg8[%c0_83, %c0_84, %c0_85, %c0_86] : memref<2x2x32x32xf32, #tpu.memory_space<vmem>>, vector<1x1x32x32xf32>
    %197 = vector.shape_cast %196 : vector<1x1x32x32xf32> to vector<32x32xf32>
    %cst_87 = arith.constant dense<0.000000e+00> : vector<8x32xf32>
    %198 = tpu.matmul %195, %197, %cst_87 {dimension_numbers = #tpu.dot_dimension_numbers<[1], [0], [0], [1], [0, 0, 1, 1], [], []>} : vector<8x32xf32>, vector<32x32xf32>, vector<8x32xf32> -> vector<8x32xf32>
    %199 = vector.extract_strided_slice %173 {offsets = [0, 0], sizes = [1, 32], strides = [1, 1]} : vector<2x32xf32> to vector<1x32xf32>
    %200 = vector.broadcast %199 : vector<1x32xf32> to vector<8x32xf32>
    %201 = arith.addf %198, %200 : vector<8x32xf32>
    %cst_88 = arith.constant 5.000000e-01 : f32
    %202 = vector.broadcast %cst_88 : f32 to vector<8x32xf32>
    %203 = arith.mulf %202, %201 : vector<8x32xf32>
    %cst_89 = arith.constant 0.707106769 : f32
    %204 = vector.broadcast %cst_89 : f32 to vector<8x32xf32>
    %205 = arith.mulf %201, %204 : vector<8x32xf32>
    %206 = math.erf %205 : vector<8x32xf32>
    %cst_90 = arith.constant 1.000000e+00 : f32
    %207 = vector.broadcast %cst_90 : f32 to vector<8x32xf32>
    %208 = arith.addf %207, %206 : vector<8x32xf32>
    %209 = arith.mulf %203, %208 : vector<8x32xf32>
    %c0_91 = arith.constant 0 : index
    %c1_92 = arith.constant 1 : index
    %c0_93 = arith.constant 0 : index
    %c0_94 = arith.constant 0 : index
    %210 = vector.load %arg8[%c0_91, %c1_92, %c0_93, %c0_94] : memref<2x2x32x32xf32, #tpu.memory_space<vmem>>, vector<1x1x32x32xf32>
    %211 = vector.shape_cast %210 : vector<1x1x32x32xf32> to vector<32x32xf32>
    %cst_95 = arith.constant dense<0.000000e+00> : vector<8x32xf32>
    %212 = tpu.matmul %209, %211, %cst_95 {dimension_numbers = #tpu.dot_dimension_numbers<[1], [0], [0], [1], [0, 0, 1, 1], [], []>} : vector<8x32xf32>, vector<32x32xf32>, vector<8x32xf32> -> vector<8x32xf32>
    %213 = arith.addf %171, %212 : vector<8x32xf32>
    %214 = vector.extract_strided_slice %173 {offsets = [1, 0], sizes = [1, 32], strides = [1, 1]} : vector<2x32xf32> to vector<1x32xf32>
    %215 = vector.broadcast %214 : vector<1x32xf32> to vector<8x32xf32>
    %216 = arith.addf %213, %215 : vector<8x32xf32>
    %c1_96 = arith.constant 1 : index
    %c0_97 = arith.constant 0 : index
    %c0_98 = arith.constant 0 : index
    %217 = vector.load %arg5[%c1_96, %c0_97, %c0_98] : memref<2x6x32xf32, #tpu.memory_space<vmem>>, vector<1x6x32xf32>
    %218 = vector.shape_cast %217 : vector<1x6x32xf32> to vector<6x32xf32>
    %219 = vector.extract_strided_slice %218 {offsets = [0, 0], sizes = [1, 32], strides = [1, 1]} : vector<6x32xf32> to vector<1x32xf32>
    %220 = vector.extract_strided_slice %218 {offsets = [1, 0], sizes = [1, 32], strides = [1, 1]} : vector<6x32xf32> to vector<1x32xf32>
    %221 = vector.extract_strided_slice %218 {offsets = [2, 0], sizes = [1, 32], strides = [1, 1]} : vector<6x32xf32> to vector<1x32xf32>
    %222 = vector.extract_strided_slice %218 {offsets = [3, 0], sizes = [1, 32], strides = [1, 1]} : vector<6x32xf32> to vector<1x32xf32>
    %223 = vector.extract_strided_slice %218 {offsets = [4, 0], sizes = [1, 32], strides = [1, 1]} : vector<6x32xf32> to vector<1x32xf32>
    %224 = vector.extract_strided_slice %218 {offsets = [5, 0], sizes = [1, 32], strides = [1, 1]} : vector<6x32xf32> to vector<1x32xf32>
    %cst_99 = arith.constant dense<0.000000e+00> : vector<8xf32>
    %225 = vector.multi_reduction <add>, %216, %cst_99 [1] : vector<8x32xf32> to vector<8xf32>
    %226 = vector.shape_cast %225 : vector<8xf32> to vector<8x1xf32>
    %cst_100 = arith.constant 3.200000e+01 : f32
    %227 = vector.broadcast %cst_100 : f32 to vector<8x1xf32>
    %228 = arith.divf %226, %227 : vector<8x1xf32>
    %229 = vector.broadcast %228 : vector<8x1xf32> to vector<8x32xf32>
    %230 = arith.subf %216, %229 : vector<8x32xf32>
    %231 = arith.mulf %230, %230 : vector<8x32xf32>
    %cst_101 = arith.constant dense<0.000000e+00> : vector<8xf32>
    %232 = vector.multi_reduction <add>, %231, %cst_101 [1] : vector<8x32xf32> to vector<8xf32>
    %233 = vector.shape_cast %232 : vector<8xf32> to vector<8x1xf32>
    %cst_102 = arith.constant 3.200000e+01 : f32
    %234 = vector.broadcast %cst_102 : f32 to vector<8x1xf32>
    %235 = arith.divf %233, %234 : vector<8x1xf32>
    %236 = vector.broadcast %228 : vector<8x1xf32> to vector<8x32xf32>
    %237 = arith.subf %216, %236 : vector<8x32xf32>
    %cst_103 = arith.constant 9.99999997E-7 : f32
    %238 = vector.broadcast %cst_103 : f32 to vector<8x1xf32>
    %239 = arith.addf %235, %238 : vector<8x1xf32>
    %240 = math.rsqrt %239 : vector<8x1xf32>
    %241 = vector.broadcast %240 : vector<8x1xf32> to vector<8x32xf32>
    %242 = arith.mulf %237, %241 : vector<8x32xf32>
    %243 = vector.broadcast %219 : vector<1x32xf32> to vector<8x32xf32>
    %244 = arith.mulf %242, %243 : vector<8x32xf32>
    %245 = vector.broadcast %220 : vector<1x32xf32> to vector<8x32xf32>
    %246 = arith.addf %244, %245 : vector<8x32xf32>
    %cst_104 = arith.constant dense<0.000000e+00> : vector<8xf32>
    %247 = vector.multi_reduction <add>, %246, %cst_104 [1] : vector<8x32xf32> to vector<8xf32>
    %248 = vector.shape_cast %247 : vector<8xf32> to vector<8x1xf32>
    %cst_105 = arith.constant 3.200000e+01 : f32
    %249 = vector.broadcast %cst_105 : f32 to vector<8x1xf32>
    %250 = arith.divf %248, %249 : vector<8x1xf32>
    %251 = vector.broadcast %250 : vector<8x1xf32> to vector<8x32xf32>
    %252 = arith.subf %246, %251 : vector<8x32xf32>
    %253 = arith.mulf %252, %252 : vector<8x32xf32>
    %cst_106 = arith.constant dense<0.000000e+00> : vector<8xf32>
    %254 = vector.multi_reduction <add>, %253, %cst_106 [1] : vector<8x32xf32> to vector<8xf32>
    %255 = vector.shape_cast %254 : vector<8xf32> to vector<8x1xf32>
    %cst_107 = arith.constant 3.200000e+01 : f32
    %256 = vector.broadcast %cst_107 : f32 to vector<8x1xf32>
    %257 = arith.divf %255, %256 : vector<8x1xf32>
    %258 = vector.broadcast %250 : vector<8x1xf32> to vector<8x32xf32>
    %259 = arith.subf %246, %258 : vector<8x32xf32>
    %cst_108 = arith.constant 9.99999997E-7 : f32
    %260 = vector.broadcast %cst_108 : f32 to vector<8x1xf32>
    %261 = arith.addf %257, %260 : vector<8x1xf32>
    %262 = math.rsqrt %261 : vector<8x1xf32>
    %263 = vector.broadcast %262 : vector<8x1xf32> to vector<8x32xf32>
    %264 = arith.mulf %259, %263 : vector<8x32xf32>
    %265 = vector.broadcast %221 : vector<1x32xf32> to vector<8x32xf32>
    %266 = arith.mulf %264, %265 : vector<8x32xf32>
    %267 = vector.broadcast %222 : vector<1x32xf32> to vector<8x32xf32>
    %268 = arith.addf %266, %267 : vector<8x32xf32>
    %c1_109 = arith.constant 1 : index
    %c0_110 = arith.constant 0 : index
    %c0_111 = arith.constant 0 : index
    %c0_112 = arith.constant 0 : index
    %269 = vector.load %arg6[%c1_109, %c0_110, %c0_111, %c0_112] : memref<2x3x32x32xf32, #tpu.memory_space<vmem>>, vector<1x1x32x32xf32>
    %270 = vector.shape_cast %269 : vector<1x1x32x32xf32> to vector<32x32xf32>
    %cst_113 = arith.constant dense<0.000000e+00> : vector<8x32xf32>
    %271 = tpu.matmul %246, %270, %cst_113 {dimension_numbers = #tpu.dot_dimension_numbers<[1], [0], [0], [1], [0, 0, 1, 1], [], []>} : vector<8x32xf32>, vector<32x32xf32>, vector<8x32xf32> -> vector<8x32xf32>
    %c1_114 = arith.constant 1 : index
    %c1_115 = arith.constant 1 : index
    %c0_116 = arith.constant 0 : index
    %c0_117 = arith.constant 0 : index
    %272 = vector.load %arg6[%c1_114, %c1_115, %c0_116, %c0_117] : memref<2x3x32x32xf32, #tpu.memory_space<vmem>>, vector<1x1x32x32xf32>
    %273 = vector.shape_cast %272 : vector<1x1x32x32xf32> to vector<32x32xf32>
    %cst_118 = arith.constant dense<0.000000e+00> : vector<8x32xf32>
    %274 = tpu.matmul %268, %273, %cst_118 {dimension_numbers = #tpu.dot_dimension_numbers<[1], [0], [0], [1], [0, 0, 1, 1], [], []>} : vector<8x32xf32>, vector<32x32xf32>, vector<8x32xf32> -> vector<8x32xf32>
    %c1_119 = arith.constant 1 : index
    %c2_120 = arith.constant 2 : index
    %c0_121 = arith.constant 0 : index
    %c0_122 = arith.constant 0 : index
    %275 = vector.load %arg6[%c1_119, %c2_120, %c0_121, %c0_122] : memref<2x3x32x32xf32, #tpu.memory_space<vmem>>, vector<1x1x32x32xf32>
    %276 = vector.shape_cast %275 : vector<1x1x32x32xf32> to vector<32x32xf32>
    %cst_123 = arith.constant dense<0.000000e+00> : vector<8x32xf32>
    %277 = tpu.matmul %268, %276, %cst_123 {dimension_numbers = #tpu.dot_dimension_numbers<[1], [0], [0], [1], [0, 0, 1, 1], [], []>} : vector<8x32xf32>, vector<32x32xf32>, vector<8x32xf32> -> vector<8x32xf32>
    %278 = vector.extract_strided_slice %271 {offsets = [0, 0], sizes = [4, 32], strides = [1, 1]} : vector<8x32xf32> to vector<4x32xf32>
    %279 = vector.extract_strided_slice %271 {offsets = [4, 0], sizes = [4, 32], strides = [1, 1]} : vector<8x32xf32> to vector<4x32xf32>
    %280 = vector.extract_strided_slice %274 {offsets = [0, 0], sizes = [4, 32], strides = [1, 1]} : vector<8x32xf32> to vector<4x32xf32>
    %281 = vector.extract_strided_slice %274 {offsets = [4, 0], sizes = [4, 32], strides = [1, 1]} : vector<8x32xf32> to vector<4x32xf32>
    %282 = vector.extract_strided_slice %277 {offsets = [0, 0], sizes = [4, 32], strides = [1, 1]} : vector<8x32xf32> to vector<4x32xf32>
    %283 = vector.extract_strided_slice %277 {offsets = [4, 0], sizes = [4, 32], strides = [1, 1]} : vector<8x32xf32> to vector<4x32xf32>
    %cst_124 = arith.constant dense<0.000000e+00> : vector<32x32xf32>
    %284 = tpu.matmul %278, %281, %cst_124 {dimension_numbers = #tpu.dot_dimension_numbers<[0], [0], [1], [1], [0, 1, 1, 1], [], []>} : vector<4x32xf32>, vector<4x32xf32>, vector<32x32xf32> -> vector<32x32xf32>
    %cst_125 = arith.constant 0.176776692 : f32
    %285 = vector.broadcast %cst_125 : f32 to vector<32x32xf32>
    %286 = arith.mulf %284, %285 : vector<32x32xf32>
    %cst_126 = arith.constant dense<0.000000e+00> : vector<32x32xf32>
    %287 = tpu.matmul %279, %280, %cst_126 {dimension_numbers = #tpu.dot_dimension_numbers<[0], [0], [1], [1], [0, 1, 1, 1], [], []>} : vector<4x32xf32>, vector<4x32xf32>, vector<32x32xf32> -> vector<32x32xf32>
    %cst_127 = arith.constant 0.176776692 : f32
    %288 = vector.broadcast %cst_127 : f32 to vector<32x32xf32>
    %289 = arith.mulf %287, %288 : vector<32x32xf32>
    %cst_128 = arith.constant 0.000000e+00 : f32
    %290 = vector.broadcast %cst_128 : f32 to vector<32x32xf32>
    %291 = arith.select %8, %286, %290 : vector<32x32xi1>, vector<32x32xf32>
    %cst_129 = arith.constant dense<0.000000e+00> : vector<32xf32>
    %292 = vector.multi_reduction <add>, %291, %cst_129 [0] : vector<32x32xf32> to vector<32xf32>
    %293 = vector.shape_cast %292 : vector<32xf32> to vector<1x32xf32>
    %294 = vector.broadcast %293 : vector<1x32xf32> to vector<32x32xf32>
    %295 = arith.mulf %6, %294 : vector<32x32xf32>
    %cst_130 = arith.constant dense<0.000000e+00> : vector<32xf32>
    %296 = vector.multi_reduction <add>, %295, %cst_130 [1] : vector<32x32xf32> to vector<32xf32>
    %297 = vector.shape_cast %296 : vector<32xf32> to vector<32x1xf32>
    %cst_131 = arith.constant 1.562500e-02 : f32
    %298 = vector.broadcast %cst_131 : f32 to vector<32x1xf32>
    %299 = arith.mulf %297, %298 : vector<32x1xf32>
    %300 = vector.broadcast %299 : vector<32x1xf32> to vector<32x32xf32>
    %301 = arith.subf %286, %300 : vector<32x32xf32>
    %302 = arith.mulf %301, %301 : vector<32x32xf32>
    %cst_132 = arith.constant 0.000000e+00 : f32
    %303 = vector.broadcast %cst_132 : f32 to vector<32x32xf32>
    %304 = arith.select %8, %302, %303 : vector<32x32xi1>, vector<32x32xf32>
    %cst_133 = arith.constant dense<0.000000e+00> : vector<32xf32>
    %305 = vector.multi_reduction <add>, %304, %cst_133 [0] : vector<32x32xf32> to vector<32xf32>
    %306 = vector.shape_cast %305 : vector<32xf32> to vector<1x32xf32>
    %307 = vector.broadcast %306 : vector<1x32xf32> to vector<32x32xf32>
    %308 = arith.mulf %6, %307 : vector<32x32xf32>
    %cst_134 = arith.constant dense<0.000000e+00> : vector<32xf32>
    %309 = vector.multi_reduction <add>, %308, %cst_134 [1] : vector<32x32xf32> to vector<32xf32>
    %310 = vector.shape_cast %309 : vector<32xf32> to vector<32x1xf32>
    %cst_135 = arith.constant 1.562500e-02 : f32
    %311 = vector.broadcast %cst_135 : f32 to vector<32x1xf32>
    %312 = arith.mulf %310, %311 : vector<32x1xf32>
    %cst_136 = arith.constant 9.99999974E-6 : f32
    %313 = vector.broadcast %cst_136 : f32 to vector<32x1xf32>
    %314 = arith.addf %312, %313 : vector<32x1xf32>
    %315 = math.rsqrt %314 : vector<32x1xf32>
    %316 = vector.broadcast %315 : vector<32x1xf32> to vector<32x32xf32>
    %317 = arith.mulf %301, %316 : vector<32x32xf32>
    %cst_137 = arith.constant 0xFF800000 : f32
    %318 = vector.broadcast %cst_137 : f32 to vector<32x32xf32>
    %319 = arith.select %8, %317, %318 : vector<32x32xi1>, vector<32x32xf32>
    %cst_138 = arith.constant dense<0xFF800000> : vector<32xf32>
    %320 = vector.multi_reduction <maximumf>, %319, %cst_138 [1] : vector<32x32xf32> to vector<32xf32>
    %321 = vector.shape_cast %320 : vector<32xf32> to vector<32x1xf32>
    %322 = vector.broadcast %321 : vector<32x1xf32> to vector<32x32xf32>
    %323 = arith.subf %319, %322 : vector<32x32xf32>
    %324 = math.exp %323 : vector<32x32xf32>
    %cst_139 = arith.constant dense<0.000000e+00> : vector<32xf32>
    %325 = vector.multi_reduction <add>, %324, %cst_139 [1] : vector<32x32xf32> to vector<32xf32>
    %326 = vector.shape_cast %325 : vector<32xf32> to vector<32x1xf32>
    %327 = tpu.reciprocal %326 {approx = true} : vector<32x1xf32> -> vector<32x1xf32>
    %328 = vector.broadcast %327 : vector<32x1xf32> to vector<32x32xf32>
    %329 = arith.mulf %324, %328 : vector<32x32xf32>
    %cst_140 = arith.constant 0.000000e+00 : f32
    %330 = vector.broadcast %cst_140 : f32 to vector<32x32xf32>
    %331 = arith.select %8, %289, %330 : vector<32x32xi1>, vector<32x32xf32>
    %cst_141 = arith.constant dense<0.000000e+00> : vector<32xf32>
    %332 = vector.multi_reduction <add>, %331, %cst_141 [0] : vector<32x32xf32> to vector<32xf32>
    %333 = vector.shape_cast %332 : vector<32xf32> to vector<1x32xf32>
    %334 = vector.broadcast %333 : vector<1x32xf32> to vector<32x32xf32>
    %335 = arith.mulf %6, %334 : vector<32x32xf32>
    %cst_142 = arith.constant dense<0.000000e+00> : vector<32xf32>
    %336 = vector.multi_reduction <add>, %335, %cst_142 [1] : vector<32x32xf32> to vector<32xf32>
    %337 = vector.shape_cast %336 : vector<32xf32> to vector<32x1xf32>
    %cst_143 = arith.constant 1.562500e-02 : f32
    %338 = vector.broadcast %cst_143 : f32 to vector<32x1xf32>
    %339 = arith.mulf %337, %338 : vector<32x1xf32>
    %340 = vector.broadcast %339 : vector<32x1xf32> to vector<32x32xf32>
    %341 = arith.subf %289, %340 : vector<32x32xf32>
    %342 = arith.mulf %341, %341 : vector<32x32xf32>
    %cst_144 = arith.constant 0.000000e+00 : f32
    %343 = vector.broadcast %cst_144 : f32 to vector<32x32xf32>
    %344 = arith.select %8, %342, %343 : vector<32x32xi1>, vector<32x32xf32>
    %cst_145 = arith.constant dense<0.000000e+00> : vector<32xf32>
    %345 = vector.multi_reduction <add>, %344, %cst_145 [0] : vector<32x32xf32> to vector<32xf32>
    %346 = vector.shape_cast %345 : vector<32xf32> to vector<1x32xf32>
    %347 = vector.broadcast %346 : vector<1x32xf32> to vector<32x32xf32>
    %348 = arith.mulf %6, %347 : vector<32x32xf32>
    %cst_146 = arith.constant dense<0.000000e+00> : vector<32xf32>
    %349 = vector.multi_reduction <add>, %348, %cst_146 [1] : vector<32x32xf32> to vector<32xf32>
    %350 = vector.shape_cast %349 : vector<32xf32> to vector<32x1xf32>
    %cst_147 = arith.constant 1.562500e-02 : f32
    %351 = vector.broadcast %cst_147 : f32 to vector<32x1xf32>
    %352 = arith.mulf %350, %351 : vector<32x1xf32>
    %cst_148 = arith.constant 9.99999974E-6 : f32
    %353 = vector.broadcast %cst_148 : f32 to vector<32x1xf32>
    %354 = arith.addf %352, %353 : vector<32x1xf32>
    %355 = math.rsqrt %354 : vector<32x1xf32>
    %356 = vector.broadcast %355 : vector<32x1xf32> to vector<32x32xf32>
    %357 = arith.mulf %341, %356 : vector<32x32xf32>
    %cst_149 = arith.constant 0xFF800000 : f32
    %358 = vector.broadcast %cst_149 : f32 to vector<32x32xf32>
    %359 = arith.select %8, %357, %358 : vector<32x32xi1>, vector<32x32xf32>
    %cst_150 = arith.constant dense<0xFF800000> : vector<32xf32>
    %360 = vector.multi_reduction <maximumf>, %359, %cst_150 [1] : vector<32x32xf32> to vector<32xf32>
    %361 = vector.shape_cast %360 : vector<32xf32> to vector<32x1xf32>
    %362 = vector.broadcast %361 : vector<32x1xf32> to vector<32x32xf32>
    %363 = arith.subf %359, %362 : vector<32x32xf32>
    %364 = math.exp %363 : vector<32x32xf32>
    %cst_151 = arith.constant dense<0.000000e+00> : vector<32xf32>
    %365 = vector.multi_reduction <add>, %364, %cst_151 [1] : vector<32x32xf32> to vector<32xf32>
    %366 = vector.shape_cast %365 : vector<32xf32> to vector<32x1xf32>
    %367 = tpu.reciprocal %366 {approx = true} : vector<32x1xf32> -> vector<32x1xf32>
    %368 = vector.broadcast %367 : vector<32x1xf32> to vector<32x32xf32>
    %369 = arith.mulf %364, %368 : vector<32x32xf32>
    %cst_152 = arith.constant dense<0.000000e+00> : vector<4x32xf32>
    %370 = tpu.matmul %283, %329, %cst_152 {dimension_numbers = #tpu.dot_dimension_numbers<[1], [1], [0], [0], [0, 0, 1, 0], [], []>} : vector<4x32xf32>, vector<32x32xf32>, vector<4x32xf32> -> vector<4x32xf32>
    %cst_153 = arith.constant dense<0.000000e+00> : vector<4x32xf32>
    %371 = tpu.matmul %282, %369, %cst_153 {dimension_numbers = #tpu.dot_dimension_numbers<[1], [1], [0], [0], [0, 0, 1, 0], [], []>} : vector<4x32xf32>, vector<32x32xf32>, vector<4x32xf32> -> vector<4x32xf32>
    %c1_154 = arith.constant 1 : index
    %c0_155 = arith.constant 0 : index
    %c0_156 = arith.constant 0 : index
    %c0_157 = arith.constant 0 : index
    %372 = vector.load %arg7[%c1_154, %c0_155, %c0_156, %c0_157] : memref<2x2x32x32xf32, #tpu.memory_space<vmem>>, vector<1x1x32x32xf32>
    %373 = vector.shape_cast %372 : vector<1x1x32x32xf32> to vector<32x32xf32>
    %cst_158 = arith.constant dense<0.000000e+00> : vector<4x32xf32>
    %374 = tpu.matmul %370, %373, %cst_158 {dimension_numbers = #tpu.dot_dimension_numbers<[1], [0], [0], [1], [0, 0, 1, 1], [], []>} : vector<4x32xf32>, vector<32x32xf32>, vector<4x32xf32> -> vector<4x32xf32>
    %c1_159 = arith.constant 1 : index
    %c1_160 = arith.constant 1 : index
    %c0_161 = arith.constant 0 : index
    %c0_162 = arith.constant 0 : index
    %375 = vector.load %arg7[%c1_159, %c1_160, %c0_161, %c0_162] : memref<2x2x32x32xf32, #tpu.memory_space<vmem>>, vector<1x1x32x32xf32>
    %376 = vector.shape_cast %375 : vector<1x1x32x32xf32> to vector<32x32xf32>
    %cst_163 = arith.constant dense<0.000000e+00> : vector<4x32xf32>
    %377 = tpu.matmul %371, %376, %cst_163 {dimension_numbers = #tpu.dot_dimension_numbers<[1], [0], [0], [1], [0, 0, 1, 1], [], []>} : vector<4x32xf32>, vector<32x32xf32>, vector<4x32xf32> -> vector<4x32xf32>
    %378 = tpu.concatenate %377, %374 in 0 : vector<4x32xf32>, vector<4x32xf32> -> vector<8x32xf32>
    %379 = arith.addf %216, %378 : vector<8x32xf32>
    %c1_164 = arith.constant 1 : index
    %c0_165 = arith.constant 0 : index
    %c0_166 = arith.constant 0 : index
    %380 = vector.load %arg9[%c1_164, %c0_165, %c0_166] : memref<2x2x32xf32, #tpu.memory_space<vmem>>, vector<1x2x32xf32>
    %381 = vector.shape_cast %380 : vector<1x2x32xf32> to vector<2x32xf32>
    %cst_167 = arith.constant dense<0.000000e+00> : vector<8xf32>
    %382 = vector.multi_reduction <add>, %379, %cst_167 [1] : vector<8x32xf32> to vector<8xf32>
    %383 = vector.shape_cast %382 : vector<8xf32> to vector<8x1xf32>
    %cst_168 = arith.constant 3.200000e+01 : f32
    %384 = vector.broadcast %cst_168 : f32 to vector<8x1xf32>
    %385 = arith.divf %383, %384 : vector<8x1xf32>
    %386 = vector.broadcast %385 : vector<8x1xf32> to vector<8x32xf32>
    %387 = arith.subf %379, %386 : vector<8x32xf32>
    %388 = arith.mulf %387, %387 : vector<8x32xf32>
    %cst_169 = arith.constant dense<0.000000e+00> : vector<8xf32>
    %389 = vector.multi_reduction <add>, %388, %cst_169 [1] : vector<8x32xf32> to vector<8xf32>
    %390 = vector.shape_cast %389 : vector<8xf32> to vector<8x1xf32>
    %cst_170 = arith.constant 3.200000e+01 : f32
    %391 = vector.broadcast %cst_170 : f32 to vector<8x1xf32>
    %392 = arith.divf %390, %391 : vector<8x1xf32>
    %393 = vector.broadcast %385 : vector<8x1xf32> to vector<8x32xf32>
    %394 = arith.subf %379, %393 : vector<8x32xf32>
    %cst_171 = arith.constant 9.99999997E-7 : f32
    %395 = vector.broadcast %cst_171 : f32 to vector<8x1xf32>
    %396 = arith.addf %392, %395 : vector<8x1xf32>
    %397 = math.rsqrt %396 : vector<8x1xf32>
    %398 = vector.broadcast %397 : vector<8x1xf32> to vector<8x32xf32>
    %399 = arith.mulf %394, %398 : vector<8x32xf32>
    %400 = vector.broadcast %223 : vector<1x32xf32> to vector<8x32xf32>
    %401 = arith.mulf %399, %400 : vector<8x32xf32>
    %402 = vector.broadcast %224 : vector<1x32xf32> to vector<8x32xf32>
    %403 = arith.addf %401, %402 : vector<8x32xf32>
    %c1_172 = arith.constant 1 : index
    %c0_173 = arith.constant 0 : index
    %c0_174 = arith.constant 0 : index
    %c0_175 = arith.constant 0 : index
    %404 = vector.load %arg8[%c1_172, %c0_173, %c0_174, %c0_175] : memref<2x2x32x32xf32, #tpu.memory_space<vmem>>, vector<1x1x32x32xf32>
    %405 = vector.shape_cast %404 : vector<1x1x32x32xf32> to vector<32x32xf32>
    %cst_176 = arith.constant dense<0.000000e+00> : vector<8x32xf32>
    %406 = tpu.matmul %403, %405, %cst_176 {dimension_numbers = #tpu.dot_dimension_numbers<[1], [0], [0], [1], [0, 0, 1, 1], [], []>} : vector<8x32xf32>, vector<32x32xf32>, vector<8x32xf32> -> vector<8x32xf32>
    %407 = vector.extract_strided_slice %381 {offsets = [0, 0], sizes = [1, 32], strides = [1, 1]} : vector<2x32xf32> to vector<1x32xf32>
    %408 = vector.broadcast %407 : vector<1x32xf32> to vector<8x32xf32>
    %409 = arith.addf %406, %408 : vector<8x32xf32>
    %cst_177 = arith.constant 5.000000e-01 : f32
    %410 = vector.broadcast %cst_177 : f32 to vector<8x32xf32>
    %411 = arith.mulf %410, %409 : vector<8x32xf32>
    %cst_178 = arith.constant 0.707106769 : f32
    %412 = vector.broadcast %cst_178 : f32 to vector<8x32xf32>
    %413 = arith.mulf %409, %412 : vector<8x32xf32>
    %414 = math.erf %413 : vector<8x32xf32>
    %cst_179 = arith.constant 1.000000e+00 : f32
    %415 = vector.broadcast %cst_179 : f32 to vector<8x32xf32>
    %416 = arith.addf %415, %414 : vector<8x32xf32>
    %417 = arith.mulf %411, %416 : vector<8x32xf32>
    %c1_180 = arith.constant 1 : index
    %c1_181 = arith.constant 1 : index
    %c0_182 = arith.constant 0 : index
    %c0_183 = arith.constant 0 : index
    %418 = vector.load %arg8[%c1_180, %c1_181, %c0_182, %c0_183] : memref<2x2x32x32xf32, #tpu.memory_space<vmem>>, vector<1x1x32x32xf32>
    %419 = vector.shape_cast %418 : vector<1x1x32x32xf32> to vector<32x32xf32>
    %cst_184 = arith.constant dense<0.000000e+00> : vector<8x32xf32>
    %420 = tpu.matmul %417, %419, %cst_184 {dimension_numbers = #tpu.dot_dimension_numbers<[1], [0], [0], [1], [0, 0, 1, 1], [], []>} : vector<8x32xf32>, vector<32x32xf32>, vector<8x32xf32> -> vector<8x32xf32>
    %421 = arith.addf %379, %420 : vector<8x32xf32>
    %422 = vector.extract_strided_slice %381 {offsets = [1, 0], sizes = [1, 32], strides = [1, 1]} : vector<2x32xf32> to vector<1x32xf32>
    %423 = vector.broadcast %422 : vector<1x32xf32> to vector<8x32xf32>
    %424 = arith.addf %421, %423 : vector<8x32xf32>
    %c0_185 = arith.constant 0 : index
    %c0_186 = arith.constant 0 : index
    %425 = vector.load %arg10[%c0_185, %c0_186] : memref<2x32xf32, #tpu.memory_space<vmem>>, vector<2x32xf32>
    %426 = vector.extract_strided_slice %425 {offsets = [0, 0], sizes = [1, 32], strides = [1, 1]} : vector<2x32xf32> to vector<1x32xf32>
    %427 = vector.extract_strided_slice %425 {offsets = [1, 0], sizes = [1, 32], strides = [1, 1]} : vector<2x32xf32> to vector<1x32xf32>
    %cst_187 = arith.constant dense<0.000000e+00> : vector<8xf32>
    %428 = vector.multi_reduction <add>, %424, %cst_187 [1] : vector<8x32xf32> to vector<8xf32>
    %429 = vector.shape_cast %428 : vector<8xf32> to vector<8x1xf32>
    %cst_188 = arith.constant 3.200000e+01 : f32
    %430 = vector.broadcast %cst_188 : f32 to vector<8x1xf32>
    %431 = arith.divf %429, %430 : vector<8x1xf32>
    %432 = vector.broadcast %431 : vector<8x1xf32> to vector<8x32xf32>
    %433 = arith.subf %424, %432 : vector<8x32xf32>
    %434 = arith.mulf %433, %433 : vector<8x32xf32>
    %cst_189 = arith.constant dense<0.000000e+00> : vector<8xf32>
    %435 = vector.multi_reduction <add>, %434, %cst_189 [1] : vector<8x32xf32> to vector<8xf32>
    %436 = vector.shape_cast %435 : vector<8xf32> to vector<8x1xf32>
    %cst_190 = arith.constant 3.200000e+01 : f32
    %437 = vector.broadcast %cst_190 : f32 to vector<8x1xf32>
    %438 = arith.divf %436, %437 : vector<8x1xf32>
    %439 = vector.broadcast %431 : vector<8x1xf32> to vector<8x32xf32>
    %440 = arith.subf %424, %439 : vector<8x32xf32>
    %cst_191 = arith.constant 9.99999997E-7 : f32
    %441 = vector.broadcast %cst_191 : f32 to vector<8x1xf32>
    %442 = arith.addf %438, %441 : vector<8x1xf32>
    %443 = math.rsqrt %442 : vector<8x1xf32>
    %444 = vector.broadcast %443 : vector<8x1xf32> to vector<8x32xf32>
    %445 = arith.mulf %440, %444 : vector<8x32xf32>
    %446 = vector.broadcast %426 : vector<1x32xf32> to vector<8x32xf32>
    %447 = arith.mulf %445, %446 : vector<8x32xf32>
    %448 = vector.broadcast %427 : vector<1x32xf32> to vector<8x32xf32>
    %449 = arith.addf %447, %448 : vector<8x32xf32>
    %c0_192 = arith.constant 0 : index
    %c0_193 = arith.constant 0 : index
    %450 = vector.load %arg11[%c0_192, %c0_193] : memref<32x32xf32, #tpu.memory_space<vmem>>, vector<32x32xf32>
    %cst_194 = arith.constant dense<0.000000e+00> : vector<8x32xf32>
    %451 = tpu.matmul %449, %450, %cst_194 {dimension_numbers = #tpu.dot_dimension_numbers<[1], [0], [0], [1], [0, 0, 1, 1], [], []>} : vector<8x32xf32>, vector<32x32xf32>, vector<8x32xf32> -> vector<8x32xf32>
    %c0_195 = arith.constant 0 : index
    %c0_196 = arith.constant 0 : index
    %452 = vector.load %arg12[%c0_195, %c0_196] : memref<1x32xf32, #tpu.memory_space<vmem>>, vector<1x32xf32>
    %453 = vector.broadcast %452 : vector<1x32xf32> to vector<8x32xf32>
    %454 = arith.addf %451, %453 : vector<8x32xf32>
    %cst_197 = arith.constant 0.000000e+00 : f32
    %455 = vector.broadcast %cst_197 : f32 to vector<8x32xf32>
    %456 = arith.maximumf %454, %455 : vector<8x32xf32>
    %c0_198 = arith.constant 0 : index
    %c0_199 = arith.constant 0 : index
    %c0_200 = arith.constant 0 : index
    %457 = vector.load %arg13[%c0_198, %c0_199, %c0_200] : memref<1x8x32xf32, #tpu.memory_space<vmem>>, vector<1x8x32xf32>
    %458 = vector.shape_cast %457 : vector<1x8x32xf32> to vector<8x32xf32>
    %459 = vector.shape_cast %456 : vector<8x32xf32> to vector<1x8x32xf32>
    tpu.vector_store %arg13[%c0_198, %c0_199, %c0_200], %459 {strides = array<i32>} : memref<1x8x32xf32, #tpu.memory_space<vmem>>, vector<1x8x32xf32>,
    return
  }
  func.func @transform_0(%arg0: i32) -> (i32, i32, i32) {
    %c0_i32 = arith.constant 0 : i32
    %c0_i32_0 = arith.constant 0 : i32
    %c0_i32_1 = arith.constant 0 : i32
    return %arg0, %c0_i32, %c0_i32_0 : i32, i32, i32
  }
  func.func @transform_1(%arg0: i32) -> (i32, i32) {
    %c0_i32 = arith.constant 0 : i32
    %c0_i32_0 = arith.constant 0 : i32
    %c0_i32_1 = arith.constant 0 : i32
    return %c0_i32, %c0_i32_0 : i32, i32
  }
  func.func @transform_2(%arg0: i32) -> (i32, i32) {
    %c0_i32 = arith.constant 0 : i32
    %c0_i32_0 = arith.constant 0 : i32
    %c0_i32_1 = arith.constant 0 : i32
    return %c0_i32, %c0_i32_0 : i32, i32
  }
  func.func @transform_3(%arg0: i32) -> (i32, i32) {
    %c0_i32 = arith.constant 0 : i32
    %c0_i32_0 = arith.constant 0 : i32
    %c0_i32_1 = arith.constant 0 : i32
    return %c0_i32, %c0_i32_0 : i32, i32
  }
  func.func @transform_4(%arg0: i32) -> (i32, i32, i32) {
    %c0_i32 = arith.constant 0 : i32
    %c0_i32_0 = arith.constant 0 : i32
    %c0_i32_1 = arith.constant 0 : i32
    %c0_i32_2 = arith.constant 0 : i32
    return %c0_i32, %c0_i32_0, %c0_i32_1 : i32, i32, i32
  }
  func.func @transform_5(%arg0: i32) -> (i32, i32, i32, i32) {
    %c0_i32 = arith.constant 0 : i32
    %c0_i32_0 = arith.constant 0 : i32
    %c0_i32_1 = arith.constant 0 : i32
    %c0_i32_2 = arith.constant 0 : i32
    %c0_i32_3 = arith.constant 0 : i32
    return %c0_i32, %c0_i32_0, %c0_i32_1, %c0_i32_2 : i32, i32, i32, i32
  }
  func.func @transform_6(%arg0: i32) -> (i32, i32, i32, i32) {
    %c0_i32 = arith.constant 0 : i32
    %c0_i32_0 = arith.constant 0 : i32
    %c0_i32_1 = arith.constant 0 : i32
    %c0_i32_2 = arith.constant 0 : i32
    %c0_i32_3 = arith.constant 0 : i32
    return %c0_i32, %c0_i32_0, %c0_i32_1, %c0_i32_2 : i32, i32, i32, i32
  }
  func.func @transform_7(%arg0: i32) -> (i32, i32, i32, i32) {
    %c0_i32 = arith.constant 0 : i32
    %c0_i32_0 = arith.constant 0 : i32
    %c0_i32_1 = arith.constant 0 : i32
    %c0_i32_2 = arith.constant 0 : i32
    %c0_i32_3 = arith.constant 0 : i32
    return %c0_i32, %c0_i32_0, %c0_i32_1, %c0_i32_2 : i32, i32, i32, i32
  }
  func.func @transform_8(%arg0: i32) -> (i32, i32, i32) {
    %c0_i32 = arith.constant 0 : i32
    %c0_i32_0 = arith.constant 0 : i32
    %c0_i32_1 = arith.constant 0 : i32
    %c0_i32_2 = arith.constant 0 : i32
    return %c0_i32, %c0_i32_0, %c0_i32_1 : i32, i32, i32
  }
  func.func @transform_9(%arg0: i32) -> (i32, i32) {
    %c0_i32 = arith.constant 0 : i32
    %c0_i32_0 = arith.constant 0 : i32
    %c0_i32_1 = arith.constant 0 : i32
    return %c0_i32, %c0_i32_0 : i32, i32
  }
  func.func @transform_10(%arg0: i32) -> (i32, i32) {
    %c0_i32 = arith.constant 0 : i32
    %c0_i32_0 = arith.constant 0 : i32
    %c0_i32_1 = arith.constant 0 : i32
    return %c0_i32, %c0_i32_0 : i32, i32
  }
  func.func @transform_11(%arg0: i32) -> (i32, i32) {
    %c0_i32 = arith.constant 0 : i32
    %c0_i32_0 = arith.constant 0 : i32
    %c0_i32_1 = arith.constant 0 : i32
    return %c0_i32, %c0_i32_0 : i32, i32
  }
  func.func @transform_12(%arg0: i32) -> (i32, i32, i32) {
    %c0_i32 = arith.constant 0 : i32
    %c0_i32_0 = arith.constant 0 : i32
    %c0_i32_1 = arith.constant 0 : i32
    return %arg0, %c0_i32, %c0_i32_0 : i32, i32, i32
  }
}

</mosaic_0001>

<bundles_post_ra>
// kernel: _lambda_.1
= control target key start
LH: loop header
LB: loop body
LE: loop exit
PB: predicated region body
PF: predicated region fallthrough
CT: control target
= control target key end

     0   :  { %s4451_s21 = smov 0   ;;  %s5523_s0 = inlined_call_operand.vmem [shape: f32[2,8,512], index: 0, kind: input, shape index: {}]   ;;  %s5524_s1 = inlined_call_operand.vmem [shape: f32[512,32], index: 1, kind: input, shape index: {}]   ;;  %s5525_s2 = inlined_call_operand.vmem [shape: f32[8,32], index: 2, kind: input, shape index: {}]   ;;  %s5526_s3 = inlined_call_operand.vmem [shape: f32[32,32], index: 3, kind: input, shape index: {}]   ;;  %s5527_s4 = inlined_call_operand.vmem [shape: f32[2,6,32], index: 4, kind: input, shape index: {}]   ;;  %s5528_s5 = inlined_call_operand.vmem [shape: f32[2,3,32,32], index: 5, kind: input, shape index: {}]   ;;  %s5529_s6 = inlined_call_operand.vmem [shape: f32[2,2,32,32], index: 6, kind: input, shape index: {}]   ;;  %s5530_s7 = inlined_call_operand.vmem [shape: f32[2,2,32,32], index: 7, kind: input, shape index: {}]   ;;  %s5531_s8 = inlined_call_operand.vmem [shape: f32[2,2,32], index: 8, kind: input, shape index: {}]   ;;  %s5532_s9 = inlined_call_operand.vmem [shape: f32[2,32], index: 9, kind: input, shape index: {}]   ;;  %s5533_s10 = inlined_call_operand.vmem [shape: f32[32,32], index: 10, kind: input, shape index: {}]   ;;  %s5534_s11 = inlined_call_operand.vmem [shape: f32[1,32], index: 11, kind: input, shape index: {}]   ;;  %s5535_s12 = inlined_call_operand.vmem [shape: f32[2,8,32], index: 12, kind: output, shape index: {}]  }
   0x1 LB: > { %s3521_s22 = sadd.s32 4294967295, %s4381_s21   ;;  %p3525_p0 = scmp.ge.s32.totalorder %s4381_s21, 1  ;;  %s4381_s21 = sphi %s4451_s21, %s22_s21  }
   0x2   : > { %p362_p1 = scmp.lt.s32.totalorder %s4381_s21, 3 }
   0x4   : > { %p363_p2 = pnand %p3525_p0, %p362_p1 }
   0x5   : > { %v432_v0 = vld [vmem:[%s5524_s1 + $0x80] sm:$0xff] (!%p363_p2)  ;;  %v433_v1 = vld [vmem:[%s5524_s1 + $0x88] sm:$0xff] (!%p363_p2)  ;;  %v434_v11 = vld [vmem:[%s5524_s1 + $0x90] sm:$0xff] (!%p363_p2)  ;;  %p4533_p3 = scmp.lt.s32.totalorder (!%p363_p2), %s3521_s22, 1  ;;  %vm630_vm0 = vcmask (!%p363_p2), 261120   ;;  %vm4384_vm1 = vmmov (!%p363_p2), 0  }
   0x6   : > { %366 = sbr.rel (%p363_p2) target bundleno = 6669 (0x1a0d), region = 68  ;;  %v416_v2 = vld [vmem:[%s5524_s1] sm:$0xff] (!%p363_p2)  ;;  %v4060_v3 = vpack.c.bf16 (!%p363_p2), %v433_v1, %v432_v0  ;;  %v417_v4 = vld [vmem:[%s5524_s1 + $0x8] sm:$0xff] (!%p363_p2)  ;;  %v435_v13 = vld [vmem:[%s5524_s1 + $0x98] sm:$0xff] (!%p363_p2)  ;;  %vm942_vm2 = vcmask (!%p363_p2), 31744   ;;  %vm955_vm3 = vcmask (!%p363_p2), 1043456  }
   0x7   : > { %v464_v5 = vld [vmem:[%s5524_s1 + $0x180] sm:$0xff] (!%p363_p2)  ;;  %v465_v6 = vld [vmem:[%s5524_s1 + $0x188] sm:$0xff] (!%p363_p2)  ;;  %v4062_v7 = vpack.c.bf16 (!%p363_p2), %v417_v4, %v416_v2  ;;  %v418_v14 = vld [vmem:[%s5524_s1 + $0x10] sm:$0xff] (!%p363_p2)  ;;  %v4064_v16 = vpack.c.bf16 (!%p363_p2), %v435_v13, %v434_v11 }
   0x8   : > { %v4092_v8 = vpack.c.bf16 (!%p363_p2), %v465_v6, %v464_v5  ;;  %v448_v9 = vld [vmem:[%s5524_s1 + $0x100] sm:$0xff] (!%p363_p2)  ;;  %v449_v10 = vld [vmem:[%s5524_s1 + $0x108] sm:$0xff] (!%p363_p2)  ;;  %4061 = vmatprep.subr.bf16.mxu0 (!%p363_p2), %v4060_v3  ;;  %v419_v15 = vld [vmem:[%s5524_s1 + $0x18] sm:$0xff] (!%p363_p2) }
   0x9   : > { %v4094_v12 = vpack.c.bf16 (!%p363_p2), %v449_v10, %v448_v9  ;;  %4063 = vmatpush3.bf16.msra.mxu0 (!%p363_p2), %v4062_v7  ;;  %v4066_v17 = vpack.c.bf16 (!%p363_p2), %v419_v15, %v418_v14  ;;  %v466_v18 = vld [vmem:[%s5524_s1 + $0x190] sm:$0xff] (!%p363_p2)  ;;  %v467_v19 = vld [vmem:[%s5524_s1 + $0x198] sm:$0xff] (!%p363_p2)  ;;  %v436_v23 = vld [vmem:[%s5524_s1 + $0xa0] sm:$0xff] (!%p363_p2) }
   0xa   : > { %4093 = vmatprep.subr.bf16.mxu1 (!%p363_p2), %v4092_v8  ;;  %v450_v20 = vld [vmem:[%s5524_s1 + $0x110] sm:$0xff] (!%p363_p2)  ;;  %v4096_v21 = vpack.c.bf16 (!%p363_p2), %v467_v19, %v466_v18  ;;  %v451_v22 = vld [vmem:[%s5524_s1 + $0x118] sm:$0xff] (!%p363_p2)  ;;  %v437_v24 = vld [vmem:[%s5524_s1 + $0xa8] sm:$0xff] (!%p363_p2)  ;;  %4065 = vmatprep.subr.bf16.mxu0 (!%p363_p2), %v4064_v16 }
   0xb   : > { %4095 = vmatpush3.bf16.msra.mxu1 (!%p363_p2), %v4094_v12  ;;  %v4098_v25 = vpack.c.bf16 (!%p363_p2), %v451_v22, %v450_v20  ;;  %v4068_v26 = vpack.c.bf16 (!%p363_p2), %v437_v24, %v436_v23  ;;  %v420_v27 = vld [vmem:[%s5524_s1 + $0x20] sm:$0xff] (!%p363_p2)  ;;  %v421_v28 = vld [vmem:[%s5524_s1 + $0x28] sm:$0xff] (!%p363_p2)  ;;  %v438_v35 = vld [vmem:[%s5524_s1 + $0xb0] sm:$0xff] (!%p363_p2) }
   0xc   : > { %v468_v29 = vld [vmem:[%s5524_s1 + $0x1a0] sm:$0xff] (!%p363_p2)  ;;  %4097 = vmatprep.subr.bf16.mxu1 (!%p363_p2), %v4096_v21  ;;  %v469_v30 = vld [vmem:[%s5524_s1 + $0x1a8] sm:$0xff] (!%p363_p2)  ;;  %v4070_v33 = vpack.c.bf16 (!%p363_p2), %v421_v28, %v420_v27  ;;  %v439_v36 = vld [vmem:[%s5524_s1 + $0xb8] sm:$0xff] (!%p363_p2) }
   0xd   : > { %v452_v31 = vld [vmem:[%s5524_s1 + $0x120] sm:$0xff]  ;;  %v453_v32 = vld [vmem:[%s5524_s1 + $0x128] sm:$0xff]  ;;  %4067 = vmatpush3.bf16.msra.mxu0 %v4066_v17  ;;  %v4100_v34 = vpack.c.bf16 %v469_v30, %v468_v29  ;;  %v422_v37 = vld [vmem:[%s5524_s1 + $0x30] sm:$0xff]  ;;  %v4072_v39 = vpack.c.bf16 %v439_v36, %v438_v35  ;;  %s5540_s22 = smov (!%p4533_p3, %s3521_s22), 1 }
   0xe   : > { %4069 = vmatprep.subr.bf16.mxu0 %v4068_v26  ;;  %v4102_v38 = vpack.c.bf16 %v453_v32, %v452_v31  ;;  %v423_v40 = vld [vmem:[%s5524_s1 + $0x38] sm:$0xff]  ;;  %v470_v41 = vld [vmem:[%s5524_s1 + $0x1b0] sm:$0xff]  ;;  %v440_v46 = vld [vmem:[%s5524_s1 + $0xc0] sm:$0xff]  ;;  %s3633_s15 = sshll.u32 %s5540_s22, 5  ;;  %s3528_s18 = sshll.u32 %s5540_s22, 3 }
   0xf   : > { %4099 = vmatpush3.bf16.msra.mxu1 %v4098_v25  ;;  %v471_v42 = vld [vmem:[%s5524_s1 + $0x1b8] sm:$0xff]  ;;  %v454_v44 = vld [vmem:[%s5524_s1 + $0x130] sm:$0xff]  ;;  %v441_v47 = vld [vmem:[%s5524_s1 + $0xc8] sm:$0xff]  ;;  %v4074_v48 = vpack.c.bf16 %v423_v40, %v422_v37  ;;  %s4625_s14 = scalar_lea.vmem %s5523_s0, %s3633_s15  ;;  %s411_s24 = scalar_lea.vmem %s5535_s12, %s3528_s18 }
  0x10   : > { %4101 = vmatprep.subr.bf16.mxu1 %v4100_v34  ;;  %v4104_v43 = vpack.c.bf16 %v471_v42, %v470_v41  ;;  %v455_v45 = vld [vmem:[%s5524_s1 + $0x138] sm:$0xff]  ;;  %v472_v49 = vld [vmem:[%s5524_s1 + $0x1c0] sm:$0xff]  ;;  %v473_v50 = vld [vmem:[%s5524_s1 + $0x1c8] sm:$0xff]  ;;  %v4076_v52 = vpack.c.bf16 %v441_v47, %v440_v46 }
  0x11   : > { %4071 = vmatpush3.bf16.msra.mxu0 %v4070_v33  ;;  %v4106_v51 = vpack.c.bf16 %v455_v45, %v454_v44  ;;  %v424_v53 = vld [vmem:[%s5524_s1 + $0x40] sm:$0xff]  ;;  %v425_v54 = vld [vmem:[%s5524_s1 + $0x48] sm:$0xff]  ;;  %v4108_v56 = vpack.c.bf16 %v473_v50, %v472_v49  ;;  %v442_v58 = vld [vmem:[%s5524_s1 + $0xd0] sm:$0xff] }
  0x12   : > { %4073 = vmatprep.subr.bf16.mxu0 %v4072_v39  ;;  %v456_v55 = vld [vmem:[%s5524_s1 + $0x140] sm:$0xff]  ;;  %v457_v57 = vld [vmem:[%s5524_s1 + $0x148] sm:$0xff]  ;;  %v443_v59 = vld [vmem:[%s5524_s1 + $0xd8] sm:$0xff]  ;;  %v4078_v62 = vpack.c.bf16 %v425_v54, %v424_v53  ;;  %v4383_v54 = vmov 0.0|0.0  }
  0x13   : > { %4103 = vmatpush3.bf16.msra.mxu1 %v4102_v38  ;;  %v474_v60 = vld [vmem:[%s5524_s1 + $0x1d0] sm:$0xff]  ;;  %v475_v61 = vld [vmem:[%s5524_s1 + $0x1d8] sm:$0xff]  ;;  %v4110_v63 = vpack.c.bf16 %v457_v57, %v456_v55  ;;  %v4080_v0 = vpack.c.bf16 %v443_v59, %v442_v58  ;;  %v444_v6 = vld [vmem:[%s5524_s1 + $0xe0] sm:$0xff]  ;;  %v4385_v58 = vmov 0.0  }
  0x14   : > { %4105 = vmatprep.subr.bf16.mxu1 %v4104_v43  ;;  %v426_v1 = vld [vmem:[%s5524_s1 + $0x50] sm:$0xff]  ;;  %v427_v2 = vld [vmem:[%s5524_s1 + $0x58] sm:$0xff]  ;;  %v4112_v4 = vpack.c.bf16 %v475_v61, %v474_v60  ;;  %v445_v7 = vld [vmem:[%s5524_s1 + $0xe8] sm:$0xff]  ;;  %v645_v61 = vlaneseq }
  0x15   : > { %4075 = vmatpush3.bf16.msra.mxu0 %v4074_v48  ;;  %v458_v3 = vld [vmem:[%s5524_s1 + $0x150] sm:$0xff]  ;;  %v459_v5 = vld [vmem:[%s5524_s1 + $0x158] sm:$0xff]  ;;  %v476_v8 = vld [vmem:[%s5524_s1 + $0x1e0] sm:$0xff]  ;;  %v4082_v10 = vpack.c.bf16 %v427_v2, %v426_v1  ;;  %v4084_v14 = vpack.c.bf16 %v445_v7, %v444_v6 }
  0x16   : > { %4077 = vmatprep.subr.bf16.mxu0 %v4076_v52  ;;  %v477_v9 = vld [vmem:[%s5524_s1 + $0x1e8] sm:$0xff]  ;;  %v428_v11 = vld [vmem:[%s5524_s1 + $0x60] sm:$0xff]  ;;  %v4114_v13 = vpack.c.bf16 %v459_v5, %v458_v3  ;;  %v446_v19 = vld [vmem:[%s5524_s1 + $0xf0] sm:$0xff] }
  0x17   : > { %4107 = vmatpush3.bf16.msra.mxu1 %v4106_v51  ;;  %v429_v12 = vld [vmem:[%s5524_s1 + $0x68] sm:$0xff]  ;;  %v460_v15 = vld [vmem:[%s5524_s1 + $0x160] sm:$0xff]  ;;  %v4116_v18 = vpack.c.bf16 %v477_v9, %v476_v8  ;;  %v447_v20 = vld [vmem:[%s5524_s1 + $0xf8] sm:$0xff] }
  0x18   : > { %4109 = vmatprep.subr.bf16.mxu1 %v4108_v56  ;;  %v461_v16 = vld [vmem:[%s5524_s1 + $0x168] sm:$0xff]  ;;  %v415_v21 = vld [vmem:[%s4625_s14 + $0x18] sm:$0xff]  ;;  %v478_v22 = vld [vmem:[%s5524_s1 + $0x1f0] sm:$0xff]  ;;  %v4086_v24 = vpack.c.bf16 %v429_v12, %v428_v11  ;;  %v4088_v26 = vpack.c.bf16 %v447_v20, %v446_v19 }
  0x19   : > { %4079 = vmatpush3.bf16.msra.mxu0 %v4078_v62  ;;  %v413_v17 = vld [vmem:[%s4625_s14 + $0x8] sm:$0xff]  ;;  %v479_v23 = vld [vmem:[%s5524_s1 + $0x1f8] sm:$0xff]  ;;  %615 = vmatprep.mubr.f32.mxu1 %v415_v21  ;;  %v4118_v25 = vpack.c.bf16 %v461_v16, %v460_v15  ;;  %v430_v27 = vld [vmem:[%s5524_s1 + $0x70] sm:$0xff] }
  0x1a   : > { %4081 = vmatprep.subr.bf16.mxu0 %v4080_v0  ;;  %545 = vmatprep.mubr.f32.mxu0 %v413_v17  ;;  %v431_v28 = vld [vmem:[%s5524_s1 + $0x78] sm:$0xff]  ;;  %v4120_v29 = vpack.c.bf16 %v479_v23, %v478_v22  ;;  %v462_v30 = vld [vmem:[%s5524_s1 + $0x170] sm:$0xff]  ;;  %v412_v34 = vld [vmem:[%s4625_s14] sm:$0xff] }
  0x1b   : > { %4111 = vmatpush3.bf16.msra.mxu1 %v4110_v63  ;;  %v463_v31 = vld [vmem:[%s5524_s1 + $0x178] sm:$0xff]  ;;  %v4090_v32 = vpack.c.bf16 %v431_v28, %v430_v27  ;;  %v414_v35 = vld [vmem:[%s4625_s14 + $0x10] sm:$0xff]  ;;  %v480_v37 = vld [vmem:[%s5525_s2] sm:$0xff]  ;;  %v4702_v63 = vshrl.u32 %v645_v61, 7 }
  0x1c   : > { %4113 = vmatprep.subr.bf16.mxu1 %v4112_v4  ;;  %v4122_v33 = vpack.c.bf16 %v463_v31, %v462_v30  ;;  %v678_v51 = vld [vmem:[%s5528_s5] sm:$0xff]  ;;  %v679_v52 = vld [vmem:[%s5528_s5 + $0x8] sm:$0xff]  ;;  %v680_v55 = vld [vmem:[%s5528_s5 + $0x10] sm:$0xff] }
  0x1d   : > { %4083 = vmatpush3.bf16.msra.mxu0 %v4082_v10  ;;  %v4125_v53 = vpack.c.bf16 %v679_v52, %v678_v51  ;;  %v681_v56 = vld [vmem:[%s5528_s5 + $0x18] sm:$0xff]  ;;  %v4705_v0 = vsub.s32 0, %v4702_v63  ;;  %v4710_v1 = vld [vmem:[%s5527_s4] sm:$0x3f]  ;;  %v4713_v2 = vsub.s32 1, %v4702_v63  ;;  %v3531_v16 = vld [vmem:[%s5528_s5 + $0x28] sm:$0xff] }
  0x1e   : > { %4085 = vmatprep.subr.bf16.mxu0 %v4084_v14  ;;  %v4128_v57 = vpack.c.bf16 %v681_v56, %v680_v55  ;;  %v3530_v15 = vld [vmem:[%s5528_s5 + $0x20] sm:$0xff]  ;;  %v3536_v19 = vld [vmem:[%s5528_s5 + $0x48] sm:$0xff]  ;;  %v3532_v21 = vld [vmem:[%s5528_s5 + $0x30] sm:$0xff] }
  0x1f   : > { %4115 = vmatpush3.bf16.msra.mxu1 %v4114_v13  ;;  %v648_v3 = vrot.slane %v4710_v1, %v4705_v0  ;;  %v653_v6 = vrot.slane %v4710_v1, %v4713_v2  ;;  %v3535_v17 = vld [vmem:[%s5528_s5 + $0x40] sm:$0xff]  ;;  %v3533_v22 = vld [vmem:[%s5528_s5 + $0x38] sm:$0xff]  ;;  %v3537_v23 = vld [vmem:[%s5528_s5 + $0x50] sm:$0xff] }
  0x20   : > { %4117 = vmatprep.subr.bf16.mxu1 %v4116_v18  ;;  %v4131_v18 = vpack.c.bf16 %v3531_v16, %v3530_v15  ;;  %v4137_v20 = vpack.c.bf16 %v3536_v19, %v3535_v17  ;;  %v4783_v56 = vld [vmem:[%s5526_s3 + $0x8] sm:$0xff]  ;;  %vm4990_vm8 = vmpackc.low %vm630_vm0, %vm630_vm0 }
  0x21   : > { %4087 = vmatpush3.bf16.msra.mxu0 %v4086_v24  ;;  %v4134_v24 = vpack.c.bf16 %v3533_v22, %v3532_v21  ;;  %vm626_vm4 = vcmp.gt.f32.partialorder %v4783_v56, 0.5 }
  0x22   : > { %4089 = vmatprep.subr.bf16.mxu0 %v4088_v26 }
  0x23   : > { %4119 = vmatpush3.bf16.msra.mxu1 %v4118_v25  ;;  %v3538_v25 = vld [vmem:[%s5528_s5 + $0x58] sm:$0xff] }
  0x24   : > { %4121 = vmatprep.subr.bf16.mxu1 %v4120_v29  ;;  %v4140_v26 = vpack.c.bf16 %v3538_v25, %v3537_v23 }
  0x25   : > { %4091 = vmatpush3.bf16.msra.mxu0 %v4090_v32 }
  0x26   : > { %4124 = vmatprep.subr.bf16.mxu0 %v4383_v54 }
  0x27   : > { %4123 = vmatpush3.bf16.msra.mxu1 %v4122_v33  ;;  %v670_v33 = vsub.s32 2, %v4702_v63 }
  0x28   : > { %546 = vmatmul.mubr.f32.vlgmr.msra.gmra.mrb[0].mxu0 %v412_v34  ;;  %4130 = vmatprep.subr.bf16.mxu1 %v4383_v54  ;;  %v675_v34 = vsub.s32 3, %v4702_v63 }
  0x29   : > { %4126 = vmatpush3.bf16.msra.mxu0 %v4125_v53  ;;  %3827 = vmatprep.mubr.msk.f32.mxu0 %vm4384_vm1, %v4385_v58 }
  0x2a   : > { %616 = vmatmul.mubr.f32.vlgmr.msra.gmra.mrb[0].mxu1 %v414_v35  ;;  %4127 = vmatprep.subr.bf16.mxu0 %v4383_v54  ;;  %v671_v35 = vrot.slane %v4710_v1, %v670_v33 }
  0x2b   : > { %3838 = vmatprep.mubr.msk.f32.mxu1 %vm4384_vm1, %v4385_v58  ;;  %4132 = vmatpush3.bf16.msra.mxu1 %v4131_v18 }
  0x2c   : > { %4133 = vmatprep.subr.bf16.mxu1 %v4383_v54 }
  0x2d   : > { %4129 = vmatpush3.bf16.msra.mxu0 %v4128_v57  ;;  %v4788_v57 = vld [vmem:[%s5526_s3] sm:$0xff] }
  0x2e   : > { %4136 = vmatprep.subr.bf16.mxu0 %v4383_v54  ;;  %vm625_vm5 = vcmp.gt.f32.partialorder %v4788_v57, 0.5 }
  0x2f   : > { %4135 = vmatpush3.bf16.msra.mxu1 %v4134_v24 }
  0xfb   : > { %v3666_v36 = vpop.f32.mrb[0].mxu0 }
  0xfc   : > { %v3667_v38 = vpop.f32.mrb[1].mxu0 }
  0xfd   : > { %v3701_v39 = vpop.f32.mrb[0].mxu1  ;;  %v3668_v40 = vadd.f32 %v3667_v38, %v3666_v36  ;;  %v676_v38 = vrot.slane %v4710_v1, %v675_v34 }
  0xfe   : > { %v3702_v41 = vpop.f32.mrb[1].mxu1 }
  0xff   : > { %v3703_v42 = vadd.f32 %v3702_v41, %v3701_v39  ;;  %v548_v43 = vadd.f32 %v3668_v40, %v480_v37 }
 0x101   : > { %v4676_v44 = vadd.f32 %v3703_v42, %v548_v43 }
 0x103   : > { %v631_v45 = vsel %vm630_vm0, %v4676_v44, 0.0 }
 0x104   : > { %632 = vadd.xlane.f32.xlu0 %v631_v45 }
 0x191   : > { %v633_v46 = vpop.xlane.xlu0 %632 }
 0x192   : > { %v635_v47 = vmul.f32 0.03125, %v633_v46 }
 0x194   : > { %v636_v48 = vsub.f32 %v4676_v44, %v635_v47 }
 0x196   : > { %v637_v49 = vmul.f32 %v636_v48, %v636_v48 }
 0x198   : > { %v638_v50 = vsel %vm630_vm0, %v637_v49, 0.0 }
 0x199   : > { %639 = vadd.xlane.f32.xlu0 %v638_v50 }
 0x226   : > { %v640_v59 = vpop.xlane.xlu0 %639 }
 0x227   : > { %v641_v60 = vmul.f32 0.03125, %v640_v59 }
 0x229   : > { %v642_v62 = vadd.f32 1e-06, %v641_v60 }
 0x22b   : > { %4257 = vrsqrt.f32 %v642_v62  ;;  %v4797_v62 = vld [vmem:[%s5526_s3 + $0x18] sm:$0xff] }
 0x22c   : > { %vm628_vm6 = vcmp.gt.f32.partialorder %v4797_v62, 0.5 }
 0x235   : > { %v4258_v4 = vpop.eup %4257 }
 0x236   : > { %v644_v5 = vmul.f32 %v4258_v4, %v636_v48 }
 0x238   : > { %v649_v7 = vmul.f32 %v648_v3, %v644_v5  ;;  %v4802_v3 = vld [vmem:[%s5526_s3 + $0x10] sm:$0xff] }
 0x239   : > { %vm627_vm7 = vcmp.gt.f32.partialorder %v4802_v3, 0.5 }
 0x23a   : > { %v654_v8 = vadd.f32 %v653_v6, %v649_v7 }
 0x23c   : > { %3828 = vmatmul.mubr.msk.f32.vlgmr.msra.gmra.mrb[2].mxu0 %vm630_vm0, %v654_v8  ;;  %v655_v9 = vsel %vm630_vm0, %v654_v8, 0.0 }
 0x23d   : > { %656 = vadd.xlane.f32.xlu1 %v655_v9  ;;  %3849 = vmatprep.mubr.msk.f32.mxu0 %vm4384_vm1, %v4385_v58 }
 0x23e   : > { %4138 = vmatpush3.bf16.msra.mxu0 %v4137_v20 }
 0x23f   : > { %4139 = vmatprep.subr.bf16.mxu0 %v4383_v54 }
 0x242   : > { %4141 = vmatpush3.bf16.msra.mxu0 %v4140_v26 }
 0x2ca   : > { %v657_v10 = vpop.xlane.xlu1 %656 }
 0x2cb   : > { %v658_v11 = vmul.f32 0.03125, %v657_v10 }
 0x2cd   : > { %v659_v12 = vsub.f32 %v654_v8, %v658_v11 }
 0x2cf   : > { %v660_v13 = vmul.f32 %v659_v12, %v659_v12 }
 0x2d1   : > { %v661_v14 = vsel %vm630_vm0, %v660_v13, 0.0 }
 0x2d2   : > { %662 = vadd.xlane.f32.xlu1 %v661_v14 }
 0x30f   : > { %v751_v27 = vpop.f32.mrb[2].mxu0 }
 0x310   : > { %908 = vxpose.xlu0.b32.start.end [1/1] (short) (narrow) %v751_v27, 32  ;;  %v3829_v28 = vpop.f32.mrb[3].mxu0  ;;  %v1048_v29 = vrot.slane %v751_v27, 4 }
 0x312   : > { %1050 = vxpose.xlu1.b32.start.end [1/1] (short) (narrow) %v1048_v29, 32 }
 0x35f   : > { %v663_v30 = vpop.xlane.xlu1 %662 }
 0x360   : > { %v664_v31 = vmul.f32 0.03125, %v663_v30 }
 0x362   : > { %v665_v32 = vadd.f32 1e-06, %v664_v31 }
 0x364   : > { %4259 = vrsqrt.f32 %v665_v32 }
 0x36e   : > { %v4260_v36 = vpop.eup %4259 }
 0x36f   : > { %v667_v37 = vmul.f32 %v4260_v36, %v659_v12 }
 0x371   : > { %v672_v39 = vmul.f32 %v671_v35, %v667_v37 }
 0x373   : > { %v677_v40 = vadd.f32 %v676_v38, %v672_v39 }
 0x375   : > { %3839 = vmatmul.mubr.msk.f32.vlgmr.msra.gmra.mrb[2].mxu1 %vm630_vm0, %v677_v40  ;;  %3850 = vmatmul.mubr.msk.f32.vlgmr.msra.gmra.mrb[4].mxu0 %vm630_vm0, %v677_v40 }
 0x390   : > { %v924_v41 = vpop.trf.xlu0 }
 0x391   : > { %3854 = vmatprep.mubr.msk.f32.mxu1 %vm942_vm2, %v924_v41 }
 0x392   : > { %v1066_v42 = vpop.trf.xlu1 }
 0x393   : > { %3862 = vmatprep.mubr.msk.f32.mxu0 %vm942_vm2, %v1066_v42 }
 0x394   : > { %v925_v45 = vpop.trf.xlu0 }
 0x396   : > { %v1067_v43 = vpop.trf.xlu1 }
 0x398   : > { %v926_v47 = vpop.trf.xlu0 }
 0x39a   : > { %v1068_v46 = vpop.trf.xlu1 }
 0x39c   : > { %v927_v55 = vpop.trf.xlu0 }
 0x39e   : > { %v1069_v53 = vpop.trf.xlu1 }
 0x448   : > { %v829_v48 = vpop.f32.mrb[2].mxu1  ;;  %v4762_v49 = vpop.f32.mrb[4].mxu0 }
 0x449   : > { %v941_v50 = vrot.slane %v829_v48, 4  ;;  %v3840_v51 = vpop.f32.mrb[3].mxu1  ;;  %v3851_v52 = vpop.f32.mrb[5].mxu0  ;;  %3860 = vmatprep.subr.msk.mxu0 %vm955_vm3, %v829_v48 }
 0x44a   : > { %3861 = vmatpush3.msk.msra.mxu0 %vm955_vm3, %v829_v48 }
 0x44b   : > { %3852 = vmatprep.subr.msk.mxu1 %vm955_vm3, %v941_v50  ;;  %3863 = vmatmul.mubr.msk.f32.vlgmr.msra.gmra.mrb[6].mxu0 %vm942_vm2, %v1067_v43 }
 0x44c   : > { %3853 = vmatpush3.msk.msra.mxu1 %vm955_vm3, %v941_v50  ;;  %3865 = vmatprep.mubr.msk.f32.mxu0 %vm942_vm2, %v1068_v46 }
 0x44d   : > { %3855 = vmatmul.mubr.msk.f32.vlgmr.msra.gmra.mrb[4].mxu1 %vm942_vm2, %v925_v45  ;;  %4142 = vmatprep.subr.bf16.mxu1 %v4383_v54 }
 0x44e   : > { %3857 = vmatprep.mubr.msk.f32.mxu1 %vm942_vm2, %v926_v47  ;;  %4150 = vmatprep.subr.bf16.mxu0 %v4383_v54 }
 0x44f   : > { %3866 = vmatmul.mubr.msk.f32.gmra.mrb[8].mxu0 %vm942_vm2, %v1069_v53 }
 0x450   : > { %3887 = vmatprep.mubr.msk.f32.mxu0 %vm4384_vm1, %v4385_v58 }
 0x451   : > { %3858 = vmatmul.mubr.msk.f32.gmra.mrb[6].mxu1 %vm942_vm2, %v927_v55 }
 0x452   : > { %3876 = vmatprep.mubr.msk.f32.mxu1 %vm4384_vm1, %v4385_v58 }
 0x51e   : > { %v3864_v59 = vpop.f32.mrb[6].mxu0 }
 0x51f   : > { %v4791_v60 = vmul.f32 0.17677669, %v3864_v59  ;;  %v1162_v61 = vpop.f32.mrb[7].mxu0 }
 0x520   : > { %v4804_v4 = vmul.f32 0.17677669, %v1162_v61  ;;  %v3856_v5 = vpop.f32.mrb[4].mxu1 }
 0x521   : > { %v1328_v6 = vsel %vm626_vm4, %v4791_v60, 0.0  ;;  %v4809_v7 = vmul.f32 0.17677669, %v3856_v5  ;;  %v1024_v8 = vpop.f32.mrb[5].mxu1 }
 0x522   : > { %v1327_v9 = vsel %vm625_vm5, %v4804_v4, 0.0  ;;  %v4814_v10 = vmul.f32 0.17677669, %v1024_v8  ;;  %v3867_v11 = vpop.f32.mrb[8].mxu0  ;;  %v1332_v12 = vsel %vm630_vm0, %v1328_v6, 0.0 }
 0x523   : > { %v1331_v13 = vsel %vm630_vm0, %v1327_v9, 0.0  ;;  %v1186_v14 = vsel %vm626_vm4, %v4809_v7, 0.0  ;;  %v4823_v15 = vmul.f32 0.17677669, %v3867_v11  ;;  %v1172_v16 = vpop.f32.mrb[9].mxu0 }
 0x524   : > { %v1185_v17 = vsel %vm625_vm5, %v4814_v10, 0.0  ;;  %v4828_v18 = vmul.f32 0.17677669, %v1172_v16  ;;  %v3859_v19 = vpop.f32.mrb[6].mxu1  ;;  %v1190_v20 = vsel %vm630_vm0, %v1186_v14, 0.0  ;;  %v1333_v24 = vadd.f32 %v1332_v12, %v1331_v13 }
 0x525   : > { %v1189_v21 = vsel %vm630_vm0, %v1185_v17, 0.0  ;;  %v4832_v22 = vmul.f32 0.17677669, %v3859_v19  ;;  %v1034_v23 = vpop.f32.mrb[7].mxu1  ;;  %v1330_v25 = vsel %vm628_vm6, %v4823_v15, 0.0 }
 0x526   : > { %v1329_v26 = vsel %vm627_vm7, %v4828_v18, 0.0  ;;  %v4840_v27 = vmul.f32 0.17677669, %v1034_v23  ;;  %v1191_v30 = vadd.f32 %v1190_v20, %v1189_v21  ;;  %v1336_v35 = vsel %vm630_vm0, %v1330_v25, 0.0 }
 0x527   : > { %v1334_v28 = vsel %vm630_vm0, %v1329_v26, 0.0  ;;  %v1188_v29 = vsel %vm628_vm6, %v4832_v22, 0.0 }
 0x528   : > { %v1335_v31 = vadd.f32 %v1334_v28, %v1333_v24  ;;  %v1187_v32 = vsel %vm627_vm7, %v4840_v27, 0.0  ;;  %v1194_v36 = vsel %vm630_vm0, %v1188_v29, 0.0 }
 0x529   : > { %v1192_v37 = vsel %vm630_vm0, %v1187_v32, 0.0 }
 0x52a   : > { %v1337_v38 = vadd.f32 %v1336_v35, %v1335_v31  ;;  %v1193_v39 = vadd.f32 %v1192_v37, %v1191_v30 }
 0x52c   : > { %v1338_v40 = vrot.slane %v1337_v38, 4  ;;  %v1195_v41 = vadd.f32 %v1194_v36, %v1193_v39 }
 0x52e   : > { %v1339_v42 = vadd.f32 %v1338_v40, %v1337_v38  ;;  %v1196_v43 = vrot.slane %v1195_v41, 4 }
 0x530   : > { %v1340_v45 = vrot.slane %v1339_v42, 2  ;;  %v1197_v46 = vadd.f32 %v1196_v43, %v1195_v41 }
 0x532   : > { %v1341_v47 = vadd.f32 %v1340_v45, %v1339_v42  ;;  %v1198_v48 = vrot.slane %v1197_v46, 2 }
 0x534   : > { %v1199_v50 = vadd.f32 %v1198_v48, %v1197_v46  ;;  %v1342_v51 = vrot.slane %v1341_v47, 1 }
 0x536   : > { %v1343_v52 = vadd.f32 %v1342_v51, %v1341_v47  ;;  %v1200_v53 = vrot.slane %v1199_v50, 1 }
 0x538   : > { %v1345_v55 = vmul.f32 %v1343_v52, %v4783_v56  ;;  %v1344_v59 = vmul.f32 %v1343_v52, %v4788_v57  ;;  %v1201_v61 = vadd.f32 %v1200_v53, %v1199_v50  ;;  %v1346_v19 = vmul.f32 %v1343_v52, %v4802_v3 }
 0x539   : > { %v1347_v20 = vmul.f32 %v1343_v52, %v4797_v62 }
 0x53a   : > { %v1351_v5 = vsel %vm630_vm0, %v1345_v55, 0.0  ;;  %v1348_v6 = vsel %vm630_vm0, %v1344_v59, 0.0  ;;  %v1202_v8 = vmul.f32 %v1201_v61, %v4788_v57  ;;  %v1203_v9 = vmul.f32 %v1201_v61, %v4783_v56 }
 0x53b   : > { %1352 = vadd.xlane.f32.xlu0 %v1351_v5  ;;  %1349 = vadd.xlane.f32.xlu1 %v1348_v6  ;;  %v1204_v13 = vmul.f32 %v1201_v61, %v4802_v3  ;;  %v1205_v14 = vmul.f32 %v1201_v61, %v4797_v62  ;;  %v1354_v21 = vsel %vm630_vm0, %v1346_v19, 0.0  ;;  %v1357_v23 = vsel %vm630_vm0, %v1347_v20, 0.0 }
 0x53c   : > { %v1206_v11 = vsel %vm630_vm0, %v1202_v8, 0.0  ;;  %v1209_v12 = vsel %vm630_vm0, %v1203_v9, 0.0 }
 0x53d   : > { %v1212_v16 = vsel %vm630_vm0, %v1204_v13, 0.0  ;;  %v1215_v17 = vsel %vm630_vm0, %v1205_v14, 0.0 }
 0x53f   : > { %1207 = vadd.xlane.f32.xlu0 %v1206_v11  ;;  %1210 = vadd.xlane.f32.xlu1 %v1209_v12 }
 0x543   : > { %1213 = vadd.xlane.f32.xlu0 %v1212_v16  ;;  %1216 = vadd.xlane.f32.xlu1 %v1215_v17 }
 0x547   : > { %1355 = vadd.xlane.f32.xlu0 %v1354_v21  ;;  %1358 = vadd.xlane.f32.xlu1 %v1357_v23 }
 0x5c8   : > { %v1353_v24 = vpop.xlane.xlu0 %1352  ;;  %v1350_v25 = vpop.xlane.xlu1 %1349 }
 0x5c9   : > { %v1361_v26 = vmul.f32 0.015625, %v1353_v24  ;;  %v1360_v28 = vmul.f32 0.015625, %v1350_v25 }
 0x5cb   : > { %v4869_v29 = vsub.f32 %v4791_v60, %v1361_v26  ;;  %v4872_v32 = vsub.f32 %v4804_v4, %v1360_v28 }
 0x5cc   : > { %v1208_v30 = vpop.xlane.xlu0 %1207  ;;  %v1211_v31 = vpop.xlane.xlu1 %1210 }
 0x5cd   : > { %v1218_v35 = vmul.f32 0.015625, %v1208_v30  ;;  %v1219_v36 = vmul.f32 0.015625, %v1211_v31  ;;  %v1369_v39 = vmul.f32 %v4869_v29, %v4869_v29  ;;  %v1368_v60 = vmul.f32 %v4872_v32, %v4872_v32 }
 0x5cf   : > { %v4875_v37 = vsub.f32 %v4814_v10, %v1218_v35  ;;  %v4878_v38 = vsub.f32 %v4809_v7, %v1219_v36  ;;  %v1373_v47 = vsel %vm626_vm4, %v1369_v39, 0.0  ;;  %v1372_v55 = vsel %vm625_vm5, %v1368_v60, 0.0 }
 0x5d0   : > { %v1214_v40 = vpop.xlane.xlu0 %1213  ;;  %v1217_v41 = vpop.xlane.xlu1 %1216  ;;  %v1377_v11 = vsel %vm630_vm0, %v1373_v47, 0.0  ;;  %v1376_v12 = vsel %vm630_vm0, %v1372_v55, 0.0 }
 0x5d1   : > { %v1226_v4 = vmul.f32 %v4875_v37, %v4875_v37  ;;  %v1227_v42 = vmul.f32 %v4878_v38, %v4878_v38  ;;  %v1220_v43 = vmul.f32 0.015625, %v1214_v40  ;;  %v1221_v10 = vmul.f32 0.015625, %v1217_v41 }
 0x5d3   : > { %v1230_v7 = vsel %vm625_vm5, %v1226_v4, 0.0  ;;  %v1231_v45 = vsel %vm626_vm4, %v1227_v42, 0.0  ;;  %v4893_v46 = vsub.f32 %v4840_v27, %v1220_v43  ;;  %v4900_v51 = vsub.f32 %v4832_v22, %v1221_v10 }
 0x5d4   : > { %v1234_v48 = vsel %vm630_vm0, %v1230_v7, 0.0  ;;  %v1235_v50 = vsel %vm630_vm0, %v1231_v45, 0.0  ;;  %v1356_v52 = vpop.xlane.xlu0 %1355  ;;  %v1359_v53 = vpop.xlane.xlu1 %1358 }
 0x5d5   : > { %v1228_v59 = vmul.f32 %v4893_v46, %v4893_v46  ;;  %v1362_v27 = vmul.f32 0.015625, %v1356_v52  ;;  %v1363_v61 = vmul.f32 0.015625, %v1359_v53  ;;  %v1229_v5 = vmul.f32 %v4900_v51, %v4900_v51 }
 0x5d6   : > { %v1236_v6 = vadd.f32 %v1235_v50, %v1234_v48 }
 0x5d7   : > { %v1232_v8 = vsel %vm627_vm7, %v1228_v59, 0.0  ;;  %v4911_v22 = vsub.f32 %v4828_v18, %v1362_v27  ;;  %v4914_v9 = vsub.f32 %v4823_v15, %v1363_v61  ;;  %v1233_v14 = vsel %vm628_vm6, %v1229_v5, 0.0 }
 0x5d8   : > { %v1237_v13 = vsel %vm630_vm0, %v1232_v8, 0.0  ;;  %v1239_v19 = vsel %vm630_vm0, %v1233_v14, 0.0  ;;  %v1378_v15 = vadd.f32 %v1377_v11, %v1376_v12 }
 0x5d9   : > { %v1238_v16 = vadd.f32 %v1237_v13, %v1236_v6  ;;  %v1370_v17 = vmul.f32 %v4911_v22, %v4911_v22  ;;  %v1371_v18 = vmul.f32 %v4914_v9, %v4914_v9 }
 0x5db   : > { %v1240_v20 = vadd.f32 %v1239_v19, %v1238_v16  ;;  %v1374_v21 = vsel %vm627_vm7, %v1370_v17, 0.0  ;;  %v1375_v23 = vsel %vm628_vm6, %v1371_v18, 0.0 }
 0x5dc   : > { %v1379_v24 = vsel %vm630_vm0, %v1374_v21, 0.0  ;;  %v1381_v28 = vsel %vm630_vm0, %v1375_v23, 0.0 }
 0x5dd   : > { %v1241_v25 = vrot.slane %v1240_v20, 4  ;;  %v1380_v26 = vadd.f32 %v1379_v24, %v1378_v15 }
 0x5df   : > { %v1242_v30 = vadd.f32 %v1241_v25, %v1240_v20  ;;  %v1382_v31 = vadd.f32 %v1381_v28, %v1380_v26 }
 0x5e1   : > { %v1243_v35 = vrot.slane %v1242_v30, 2  ;;  %v1383_v36 = vrot.slane %v1382_v31, 4 }
 0x5e3   : > { %v1384_v39 = vadd.f32 %v1383_v36, %v1382_v31  ;;  %v1244_v40 = vadd.f32 %v1243_v35, %v1242_v30 }
 0x5e5   : > { %v1385_v41 = vrot.slane %v1384_v39, 2  ;;  %v1245_v60 = vrot.slane %v1244_v40, 1 }
 0x5e7   : > { %v1246_v4 = vadd.f32 %v1245_v60, %v1244_v40  ;;  %v1386_v42 = vadd.f32 %v1385_v41, %v1384_v39 }
 0x5e9   : > { %v1248_v43 = vmul.f32 %v1246_v4, %v4783_v56  ;;  %v1247_v10 = vmul.f32 %v1246_v4, %v4788_v57  ;;  %v1387_v7 = vrot.slane %v1386_v42, 1  ;;  %v1250_v59 = vmul.f32 %v1246_v4, %v4797_v62 }
 0x5ea   : > { %v1249_v27 = vmul.f32 %v1246_v4, %v4802_v3 }
 0x5eb   : > { %v1254_v45 = vsel %vm630_vm0, %v1248_v43, 0.0  ;;  %v1251_v47 = vsel %vm630_vm0, %v1247_v10, 0.0  ;;  %v1388_v48 = vadd.f32 %v1387_v7, %v1386_v42  ;;  %v1260_v61 = vsel %vm630_vm0, %v1250_v59, 0.0 }
 0x5ec   : > { %1255 = vadd.xlane.f32.xlu1 %v1254_v45  ;;  %1252 = vadd.xlane.f32.xlu0 %v1251_v47  ;;  %v1257_v5 = vsel %vm630_vm0, %v1249_v27, 0.0 }
 0x5ed   : > { %v1390_v50 = vmul.f32 %v1388_v48, %v4783_v56  ;;  %v1389_v52 = vmul.f32 %v1388_v48, %v4788_v57  ;;  %v1392_v6 = vmul.f32 %v1388_v48, %v4797_v62  ;;  %v1391_v8 = vmul.f32 %v1388_v48, %v4802_v3 }
 0x5ef   : > { %v1396_v53 = vsel %vm630_vm0, %v1390_v50, 0.0  ;;  %v1393_v55 = vsel %vm630_vm0, %v1389_v52, 0.0  ;;  %v1402_v11 = vsel %vm630_vm0, %v1392_v6, 0.0  ;;  %v1399_v12 = vsel %vm630_vm0, %v1391_v8, 0.0 }
 0x5f0   : > { %1397 = vadd.xlane.f32.xlu1 %v1396_v53  ;;  %1394 = vadd.xlane.f32.xlu0 %v1393_v55 }
 0x5f4   : > { %1261 = vadd.xlane.f32.xlu1 %v1260_v61  ;;  %1258 = vadd.xlane.f32.xlu0 %v1257_v5 }
 0x5f8   : > { %1403 = vadd.xlane.f32.xlu1 %v1402_v11  ;;  %1400 = vadd.xlane.f32.xlu0 %v1399_v12 }
 0x679   : > { %v1253_v13 = vpop.xlane.xlu0 %1252  ;;  %v1256_v14 = vpop.xlane.xlu1 %1255 }
 0x67a   : > { %v1263_v16 = vmul.f32 0.015625, %v1253_v13  ;;  %v1264_v17 = vmul.f32 0.015625, %v1256_v14 }
 0x67c   : > { %v1267_v18 = vadd.f32 1e-05, %v1263_v16  ;;  %v1268_v19 = vadd.f32 1e-05, %v1264_v17 }
 0x67d   : > { %v1395_v15 = vpop.xlane.xlu0 %1394  ;;  %v1398_v20 = vpop.xlane.xlu1 %1397 }
 0x67e   : > { %4261 = vrsqrt.f32 %v1267_v18  ;;  %v1405_v21 = vmul.f32 0.015625, %v1395_v15  ;;  %v1406_v23 = vmul.f32 0.015625, %v1398_v20 }
 0x67f   : > { %4263 = vrsqrt.f32 %v1268_v19 }
 0x680   : > { %v1409_v24 = vadd.f32 1e-05, %v1405_v21  ;;  %v1410_v25 = vadd.f32 1e-05, %v1406_v23 }
 0x681   : > { %v1259_v26 = vpop.xlane.xlu0 %1258  ;;  %v1262_v28 = vpop.xlane.xlu1 %1261 }
 0x682   : > { %4265 = vrsqrt.f32 %v1409_v24  ;;  %v1265_v30 = vmul.f32 0.015625, %v1259_v26  ;;  %v1266_v31 = vmul.f32 0.015625, %v1262_v28 }
 0x683   : > { %4267 = vrsqrt.f32 %v1410_v25 }
 0x684   : > { %v1269_v35 = vadd.f32 1e-05, %v1265_v30  ;;  %v1270_v36 = vadd.f32 1e-05, %v1266_v31 }
 0x685   : > { %v1401_v39 = vpop.xlane.xlu0 %1400  ;;  %v1404_v40 = vpop.xlane.xlu1 %1403 }
 0x686   : > { %4269 = vrsqrt.f32 %v1269_v35  ;;  %v1407_v41 = vmul.f32 0.015625, %v1401_v39  ;;  %v1408_v60 = vmul.f32 0.015625, %v1404_v40 }
 0x687   : > { %4271 = vrsqrt.f32 %v1270_v36 }
 0x688   : > { %v4262_v4 = vpop.eup %4261  ;;  %v1411_v42 = vadd.f32 1e-05, %v1407_v41  ;;  %v1412_v43 = vadd.f32 1e-05, %v1408_v60 }
 0x689   : > { %v4264_v10 = vpop.eup %4263  ;;  %v1275_v7 = vmul.f32 %v4262_v4, %v4875_v37 }
 0x68a   : > { %4273 = vrsqrt.f32 %v1411_v42  ;;  %v1276_v45 = vmul.f32 %v4264_v10, %v4878_v38 }
 0x68b   : > { %4275 = vrsqrt.f32 %v1412_v43  ;;  %v1279_v47 = vsel %vm625_vm5, %v1275_v7, -inf }
 0x68c   : > { %v4266_v48 = vpop.eup %4265  ;;  %v1283_v50 = vsel %vm630_vm0, %v1279_v47, -inf  ;;  %v1280_v52 = vsel %vm626_vm4, %v1276_v45, -inf }
 0x68d   : > { %v4268_v53 = vpop.eup %4267  ;;  %1284 = vmax.xlane.f32.xlu0 %v1283_v50  ;;  %v1286_v55 = vsel %vm630_vm0, %v1280_v52, -inf  ;;  %v1417_v59 = vmul.f32 %v4266_v48, %v4872_v32 }
 0x68e   : > { %1287 = vmax.xlane.f32.xlu1 %v1286_v55  ;;  %v1418_v37 = vmul.f32 %v4268_v53, %v4869_v29 }
 0x68f   : > { %v1421_v38 = vsel %vm625_vm5, %v1417_v59, -inf }
 0x690   : > { %v4270_v27 = vpop.eup %4269  ;;  %v1425_v61 = vsel %vm630_vm0, %v1421_v38, -inf  ;;  %v1422_v5 = vsel %vm626_vm4, %v1418_v37, -inf }
 0x691   : > { %v4272_v6 = vpop.eup %4271  ;;  %1426 = vmax.xlane.f32.xlu0 %v1425_v61  ;;  %v1428_v8 = vsel %vm630_vm0, %v1422_v5, -inf  ;;  %v1277_v11 = vmul.f32 %v4270_v27, %v4893_v46 }
 0x692   : > { %1429 = vmax.xlane.f32.xlu1 %v1428_v8  ;;  %v1278_v32 = vmul.f32 %v4272_v6, %v4900_v51 }
 0x693   : > { %v1281_v29 = vsel %vm627_vm7, %v1277_v11, -inf }
 0x694   : > { %v4274_v12 = vpop.eup %4273  ;;  %v1289_v13 = vsel %vm630_vm0, %v1281_v29, -inf  ;;  %v1282_v14 = vsel %vm628_vm6, %v1278_v32, -inf }
 0x695   : > { %v4276_v16 = vpop.eup %4275  ;;  %1290 = vmax.xlane.f32.xlu0 %v1289_v13  ;;  %v1292_v17 = vsel %vm630_vm0, %v1282_v14, -inf  ;;  %v1419_v18 = vmul.f32 %v4274_v12, %v4911_v22 }
 0x696   : > { %1293 = vmax.xlane.f32.xlu1 %v1292_v17  ;;  %v1420_v46 = vmul.f32 %v4276_v16, %v4914_v9 }
 0x697   : > { %v1423_v51 = vsel %vm627_vm7, %v1419_v18, -inf }
 0x698   : > { %v1431_v19 = vsel %vm630_vm0, %v1423_v51, -inf  ;;  %v1424_v15 = vsel %vm628_vm6, %v1420_v46, -inf }
 0x699   : > { %1432 = vmax.xlane.f32.xlu0 %v1431_v19  ;;  %v1434_v20 = vsel %vm630_vm0, %v1424_v15, -inf }
 0x69a   : > { %1435 = vmax.xlane.f32.xlu1 %v1434_v20 }
 0x71a   : > { %v1285_v21 = vpop.xlane.xlu0 %1284 }
 0x71b   : > { %v1295_v23 = vsub.f32 %v1279_v47, %v1285_v21  ;;  %v1288_v24 = vpop.xlane.xlu1 %1287 }
 0x71c   : > { %v1296_v25 = vsub.f32 %v1280_v52, %v1288_v24  ;;  %v3614_v24 = vld [vmem:[%s5529_s6 + $0x68] sm:$0xff] }
 0x71d   : > { %v1299_v22 = vmul.f32 1.442695, %v1295_v23 }
 0x71e   : > { %v1301_v26 = vmul.f32 1.442695, %v1296_v25  ;;  %v1427_v28 = vpop.xlane.xlu0 %1426 }
 0x71f   : > { %4277 = vpow2.f32 %v1299_v22  ;;  %v1437_v9 = vsub.f32 %v1421_v38, %v1427_v28  ;;  %v1430_v30 = vpop.xlane.xlu1 %1429 }
 0x720   : > { %4279 = vpow2.f32 %v1301_v26  ;;  %v1438_v31 = vsub.f32 %v1422_v5, %v1430_v30 }
 0x721   : > { %v1441_v35 = vmul.f32 1.442695, %v1437_v9 }
 0x722   : > { %v1443_v36 = vmul.f32 1.442695, %v1438_v31  ;;  %v1291_v39 = vpop.xlane.xlu0 %1290 }
 0x723   : > { %4281 = vpow2.f32 %v1441_v35  ;;  %v1297_v40 = vsub.f32 %v1281_v29, %v1291_v39  ;;  %v1294_v41 = vpop.xlane.xlu1 %1293 }
 0x724   : > { %4283 = vpow2.f32 %v1443_v36  ;;  %v1298_v60 = vsub.f32 %v1282_v14, %v1294_v41 }
 0x725   : > { %v1303_v4 = vmul.f32 1.442695, %v1297_v40 }
 0x726   : > { %v1305_v42 = vmul.f32 1.442695, %v1298_v60  ;;  %v1433_v43 = vpop.xlane.xlu0 %1432 }
 0x727   : > { %4285 = vpow2.f32 %v1303_v4  ;;  %v1439_v10 = vsub.f32 %v1423_v51, %v1433_v43  ;;  %v1436_v7 = vpop.xlane.xlu1 %1435  ;;  %v1639_v43 = vld [vmem:[%s5529_s6] sm:$0xff] }
 0x728   : > { %4287 = vpow2.f32 %v1305_v42  ;;  %v1440_v45 = vsub.f32 %v1424_v15, %v1436_v7 }
 0x729   : > { %v4278_v47 = vpop.eup %4277  ;;  %v1445_v48 = vmul.f32 1.442695, %v1439_v10  ;;  %v1640_v10 = vld [vmem:[%s5529_s6 + $0x8] sm:$0xff] }
 0x72a   : > { %v4280_v50 = vpop.eup %4279  ;;  %v1447_v52 = vmul.f32 1.442695, %v1440_v45  ;;  %v1307_v53 = vsel %vm630_vm0, %v4278_v47, 0.0  ;;  %v4159_v45 = vpack.c.bf16 %v1640_v10, %v1639_v43  ;;  %v3570_v43 = vld [vmem:[%s5530_s7 + $0x38] sm:$0xff] }
 0x72b   : > { %4289 = vpow2.f32 %v1445_v48  ;;  %1308 = vadd.xlane.f32.xlu0 %v1307_v53  ;;  %v1310_v55 = vsel %vm630_vm0, %v4280_v50, 0.0  ;;  %v1470_v48 = vrot.slane %v4762_v49, 4  ;;  %v3562_v53 = vld [vmem:[%s5529_s6 + $0x28] sm:$0xff] }
 0x72c   : > { %4291 = vpow2.f32 %v1447_v52  ;;  %1311 = vadd.xlane.f32.xlu1 %v1310_v55  ;;  %v3561_v52 = vld [vmem:[%s5529_s6 + $0x20] sm:$0xff] }
 0x72d   : > { %v4282_v59 = vpop.eup %4281 }
 0x72e   : > { %v4284_v37 = vpop.eup %4283  ;;  %v1449_v38 = vsel %vm630_vm0, %v4282_v59, 0.0 }
 0x72f   : > { %1450 = vadd.xlane.f32.xlu0 %v1449_v38  ;;  %v1452_v27 = vsel %vm630_vm0, %v4284_v37, 0.0  ;;  %v3564_v38 = vld [vmem:[%s5529_s6 + $0x38] sm:$0xff] }
 0x730   : > { %1453 = vadd.xlane.f32.xlu1 %v1452_v27 }
 0x731   : > { %v4286_v61 = vpop.eup %4285 }
 0x732   : > { %v4288_v5 = vpop.eup %4287  ;;  %v1313_v6 = vsel %vm630_vm0, %v4286_v61, 0.0 }
 0x733   : > { %1314 = vadd.xlane.f32.xlu0 %v1313_v6  ;;  %v1316_v8 = vsel %vm630_vm0, %v4288_v5, 0.0 }
 0x734   : > { %1317 = vadd.xlane.f32.xlu1 %v1316_v8 }
 0x735   : > { %v4290_v11 = vpop.eup %4289 }
 0x736   : > { %v4292_v32 = vpop.eup %4291  ;;  %v1455_v29 = vsel %vm630_vm0, %v4290_v11, 0.0 }
 0x737   : > { %1456 = vadd.xlane.f32.xlu0 %v1455_v29  ;;  %v1458_v12 = vsel %vm630_vm0, %v4292_v32, 0.0 }
 0x738   : > { %1459 = vadd.xlane.f32.xlu1 %v1458_v12 }
 0x7b8   : > { %v1309_v13 = vpop.xlane.xlu0 %1308 }
 0x7b9   : > { %4293 = vrcp.f32 %v1309_v13  ;;  %v1312_v14 = vpop.xlane.xlu1 %1311 }
 0x7ba   : > { %4295 = vrcp.f32 %v1312_v14 }
 0x7bc   : > { %v1451_v16 = vpop.xlane.xlu0 %1450 }
 0x7bd   : > { %4297 = vrcp.f32 %v1451_v16  ;;  %v1454_v17 = vpop.xlane.xlu1 %1453 }
 0x7be   : > { %4299 = vrcp.f32 %v1454_v17 }
 0x7c0   : > { %v1315_v18 = vpop.xlane.xlu0 %1314 }
 0x7c1   : > { %4301 = vrcp.f32 %v1315_v18  ;;  %v1318_v46 = vpop.xlane.xlu1 %1317 }
 0x7c2   : > { %4303 = vrcp.f32 %v1318_v46 }
 0x7c3   : > { %v4294_v51 = vpop.eup %4293 }
 0x7c4   : > { %v4296_v19 = vpop.eup %4295  ;;  %v1323_v15 = vmul.f32 %v4294_v51, %v4278_v47  ;;  %v1457_v20 = vpop.xlane.xlu0 %1456  ;;  %v1641_v47 = vld [vmem:[%s5529_s6 + $0x10] sm:$0xff] }
 0x7c5   : > { %v1324_v21 = vmul.f32 %v4296_v19, %v4280_v50  ;;  %4305 = vrcp.f32 %v1457_v20  ;;  %v1460_v23 = vpop.xlane.xlu1 %1459  ;;  %v1642_v50 = vld [vmem:[%s5529_s6 + $0x18] sm:$0xff]  ;;  %v1824_v20 = vld [vmem:[%s5530_s7 + $0x8] sm:$0xff] }
 0x7c6   : > { %4307 = vrcp.f32 %v1460_v23  ;;  %v4162_v55 = vpack.c.bf16 %v1642_v50, %v1641_v47  ;;  %v1826_v23 = vld [vmem:[%s5530_s7 + $0x18] sm:$0xff] }
 0x7c7   : > { %v4298_v25 = vpop.eup %4297  ;;  %v4143_v22 = vpack.c.bf16 %v1324_v21, %v1323_v15  ;;  %v1823_v15 = vld [vmem:[%s5530_s7] sm:$0xff] }
 0x7c8   : > { %v4300_v26 = vpop.eup %4299  ;;  %v1465_v28 = vmul.f32 %v4298_v25, %v4282_v59  ;;  %v4165_v59 = vpack.c.bf16 %v3562_v53, %v3561_v52  ;;  %v4171_v21 = vpack.c.bf16 %v1824_v20, %v1823_v15  ;;  %v5122_v20 = vld [vmem:[%s5527_s4 + $0x8] sm:$0x3f] }
 0x7c9   : > { %v1466_v9 = vmul.f32 %v4300_v26, %v4284_v37  ;;  %4145 = vmatpush3.bf16.xpose.msk.msra.mxu1 %vm4990_vm8, %v4143_v22  ;;  %v3563_v37 = vld [vmem:[%s5529_s6 + $0x30] sm:$0xff] }
 0x7ca   : > { %4146 = vmatprep.subr.bf16.mxu1 %v4383_v54  ;;  %v4168_v27 = vpack.c.bf16 %v3564_v38, %v3563_v37 }
 0x7cb   : > { %v4302_v30 = vpop.eup %4301  ;;  %v4151_v31 = vpack.c.bf16 %v1466_v9, %v1465_v28  ;;  %v1815_v9 = vsub.s32 4, %v4702_v63 }
 0x7cc   : > { %v4304_v35 = vpop.eup %4303  ;;  %v1325_v36 = vmul.f32 %v4302_v30, %v4286_v61  ;;  %v1820_v30 = vsub.s32 5, %v4702_v63  ;;  %v3626_v63 = vld [vmem:[%s5530_s7 + $0x70] sm:$0xff] }
 0x7cd   : > { %v1326_v39 = vmul.f32 %v4304_v35, %v4288_v5  ;;  %4153 = vmatpush3.bf16.xpose.msk.msra.mxu0 %vm4990_vm8, %v4151_v31  ;;  %v1816_v31 = vrot.slane %v4710_v1, %v1815_v9 }
 0x7ce   : > { %4154 = vmatprep.subr.bf16.mxu0 %v4383_v54 }
 0x7cf   : > { %v4306_v40 = vpop.eup %4305  ;;  %v4147_v41 = vpack.c.bf16 %v1326_v39, %v1325_v36  ;;  %v1821_v39 = vrot.slane %v4710_v1, %v1820_v30  ;;  %v3569_v1 = vld [vmem:[%s5530_s7 + $0x30] sm:$0xff] }
 0x7d0   : > { %v4308_v60 = vpop.eup %4307  ;;  %v1467_v4 = vmul.f32 %v4306_v40, %v4290_v11  ;;  %v4180_v10 = vpack.c.bf16 %v3570_v43, %v3569_v1  ;;  %v3584_v1 = vld [vmem:[%s5528_s5 + $0xa8] sm:$0xff] }
 0x7d1   : > { %v1468_v42 = vmul.f32 %v4308_v60, %v4292_v32  ;;  %4149 = vmatpush3.bf16.xpose.msk.msra.mxu1 %vm4990_vm8, %v4147_v41  ;;  %v3567_v60 = vld [vmem:[%s5530_s7 + $0x20] sm:$0xff] }
 0x7d2   : > { %4158 = vmatprep.subr.bf16.mxu1 %v4383_v54 }
 0x7d3   : > { %v4155_v7 = vpack.c.bf16 %v1468_v42, %v1467_v4  ;;  %v3568_v4 = vld [vmem:[%s5530_s7 + $0x28] sm:$0xff] }
 0x7d4   : > { %v4177_v42 = vpack.c.bf16 %v3568_v4, %v3567_v60  ;;  %v3579_v60 = vld [vmem:[%s5528_s5 + $0x88] sm:$0xff]  ;;  %v3583_v4 = vld [vmem:[%s5528_s5 + $0xa0] sm:$0xff] }
 0x7d5   : > { %4157 = vmatpush3.bf16.xpose.msk.msra.mxu0 %vm4990_vm8, %v4155_v7  ;;  %v1799_v7 = vld [vmem:[%s5531_s8] sm:$0x3]  ;;  %v4195_v43 = vpack.c.bf16 %v3584_v1, %v3583_v4 }
 0x7d6   : > { %4164 = vmatprep.subr.bf16.mxu0 %v4383_v54  ;;  %v1991_v38 = vrot.slane %v1799_v7, %v4713_v2 }
 0x7d8   : > { %3877 = vmatmul.mubr.msk.f32.vlgmr.msra.gmra.mrb[8].mxu1 %vm630_vm0, %v1470_v48 }
 0x7d9   : > { %4160 = vmatpush3.bf16.msra.mxu1 %v4159_v45  ;;  %3898 = vmatprep.mubr.msk.f32.mxu1 %vm4384_vm1, %v4385_v58  ;;  %v1830_v45 = vrot.slane %v1799_v7, %v4705_v0  ;;  %v3581_v7 = vld [vmem:[%s5528_s5 + $0x98] sm:$0xff] }
 0x7da   : > { %4161 = vmatprep.subr.bf16.mxu1 %v4383_v54 }
 0x7dc   : > { %3888 = vmatmul.mubr.msk.f32.vlgmr.msra.gmra.mrb[10].mxu0 %vm630_vm0, %v4762_v49 }
 0x7dd   : > { %4163 = vmatpush3.bf16.msra.mxu1 %v4162_v55  ;;  %4166 = vmatpush3.bf16.msra.mxu0 %v4165_v59 }
 0x7de   : > { %4167 = vmatprep.subr.bf16.mxu0 %v4383_v54  ;;  %3909 = vmatprep.mubr.msk.f32.mxu0 %vm4384_vm1, %v4385_v58 }
 0x7df   : > { %4170 = vmatprep.subr.bf16.mxu1 %v4383_v54 }
 0x7e1   : > { %4169 = vmatpush3.bf16.msra.mxu0 %v4168_v27 }
 0x7e2   : > { %4176 = vmatprep.subr.bf16.mxu0 %v4383_v54 }
 0x8ab   : > { %v1551_v49 = vpop.f32.mrb[8].mxu1 }
 0x8ac   : > { %v3878_v61 = vpop.f32.mrb[9].mxu1  ;;  %3899 = vmatmul.mubr.msk.f32.vlgmr.msra.gmra.mrb[10].mxu1 %vm630_vm0, %v1551_v49 }
 0x8ad   : > { %3920 = vmatprep.mubr.msk.f32.mxu1 %vm4384_vm1, %v4385_v58  ;;  %4172 = vmatpush3.bf16.msra.mxu1 %v4171_v21  ;;  %v2011_v21 = vrot.slane %v5122_v20, %v4705_v0 }
 0x8ae   : > { %4173 = vmatprep.subr.bf16.mxu1 %v4383_v54 }
 0x8af   : > { %v1635_v5 = vpop.f32.mrb[10].mxu0 }
 0x8b0   : > { %v3889_v6 = vpop.f32.mrb[11].mxu0  ;;  %3910 = vmatmul.mubr.msk.f32.vlgmr.msra.gmra.mrb[12].mxu0 %vm630_vm0, %v1635_v5 }
 0x8b1   : > { %3931 = vmatprep.mubr.msk.f32.mxu0 %vm4384_vm1, %v4385_v58  ;;  %4178 = vmatpush3.bf16.msra.mxu0 %v4177_v42 }
 0x8b2   : > { %4179 = vmatprep.subr.bf16.mxu0 %v4383_v54 }
 0x8b5   : > { %4181 = vmatpush3.bf16.msra.mxu0 %v4180_v10  ;;  %v3580_v10 = vld [vmem:[%s5528_s5 + $0x90] sm:$0xff] }
 0x8b6   : > { %4188 = vmatprep.subr.bf16.mxu0 %v4383_v54 }
 0x97f   : > { %v1712_v8 = vpop.f32.mrb[10].mxu1 }
 0x980   : > { %v3900_v11 = vpop.f32.mrb[11].mxu1  ;;  %v1795_v32 = vrot.slane %v1712_v8, 4 }
 0x983   : > { %v1790_v29 = vpop.f32.mrb[12].mxu0 }
 0x984   : > { %v1797_v12 = vsel %vm955_vm3, %v1790_v29, %v1795_v32  ;;  %v3911_v13 = vpop.f32.mrb[13].mxu0 }
 0x985   : > { %v1798_v14 = vadd.f32 %v1797_v12, %v4676_v44  ;;  %v1825_v44 = vld [vmem:[%s5530_s7 + $0x10] sm:$0xff]  ;;  %v3573_v13 = vld [vmem:[%s5528_s5 + $0x60] sm:$0xff] }
 0x986   : > { %v4174_v25 = vpack.c.bf16 %v1826_v23, %v1825_v44 }
 0x987   : > { %v1800_v16 = vsel %vm630_vm0, %v1798_v14, 0.0 }
 0x988   : > { %1801 = vadd.xlane.f32.xlu0 %v1800_v16  ;;  %4175 = vmatpush3.bf16.msra.mxu1 %v4174_v25  ;;  %v2016_v25 = vrot.slane %v5122_v20, %v4713_v2 }
 0x989   : > { %4182 = vmatprep.subr.bf16.mxu1 %v4383_v54 }
 0xa15   : > { %v1802_v17 = vpop.xlane.xlu0 %1801 }
 0xa16   : > { %v1803_v18 = vmul.f32 0.03125, %v1802_v17  ;;  %v3575_v17 = vld [vmem:[%s5528_s5 + $0x70] sm:$0xff] }
 0xa18   : > { %v1804_v46 = vsub.f32 %v1798_v14, %v1803_v18  ;;  %v3576_v18 = vld [vmem:[%s5528_s5 + $0x78] sm:$0xff] }
 0xa1a   : > { %v1805_v51 = vmul.f32 %v1804_v46, %v1804_v46 }
 0xa1c   : > { %v1806_v19 = vsel %vm630_vm0, %v1805_v51, 0.0 }
 0xa1d   : > { %1807 = vadd.xlane.f32.xlu1 %v1806_v19 }
 0xaaa   : > { %v1808_v22 = vpop.xlane.xlu1 %1807 }
 0xaab   : > { %v1809_v26 = vmul.f32 0.03125, %v1808_v22 }
 0xaad   : > { %v1810_v28 = vadd.f32 1e-06, %v1809_v26 }
 0xaaf   : > { %4309 = vrsqrt.f32 %v1810_v28 }
 0xab9   : > { %v4310_v35 = vpop.eup %4309 }
 0xaba   : > { %v1812_v36 = vmul.f32 %v4310_v35, %v1804_v46  ;;  %v4186_v46 = vpack.c.bf16 %v3576_v18, %v3575_v17 }
 0xabc   : > { %v1817_v40 = vmul.f32 %v1816_v31, %v1812_v36 }
 0xabe   : > { %v1822_v41 = vadd.f32 %v1821_v39, %v1817_v40 }
 0xac0   : > { %3921 = vmatmul.mubr.msk.f32.vlgmr.msra.gmra.mrb[12].mxu1 %vm630_vm0, %v1822_v41  ;;  %v3578_v41 = vld [vmem:[%s5528_s5 + $0x80] sm:$0xff] }
 0xac1   : > { %3942 = vmatprep.mubr.msk.f32.mxu1 %vm4384_vm1, %v4385_v58  ;;  %v4189_v42 = vpack.c.bf16 %v3579_v60, %v3578_v41 }
 0xb93   : > { %v1900_v47 = vpop.f32.mrb[12].mxu1 }
 0xb94   : > { %v1901_v48 = vadd.f32 %v1900_v47, %v1830_v45  ;;  %v3922_v50 = vpop.f32.mrb[13].mxu1  ;;  %v3585_v45 = vld [vmem:[%s5528_s5 + $0xb0] sm:$0xff]  ;;  %v4192_v47 = vpack.c.bf16 %v3581_v7, %v3580_v10 }
 0xb96   : > { %v1905_v52 = vmul.f32 0.70710677, %v1901_v48  ;;  %v1904_v55 = vmul.f32 0.5, %v1901_v48  ;;  %v3586_v48 = vld [vmem:[%s5528_s5 + $0xb8] sm:$0xff] }
 0xb97   : > { %v4198_v50 = vpack.c.bf16 %v3586_v48, %v3585_v45 }
 0xb98   : > { %4311 = verf.f32 %v1905_v52 }
 0xba2   : > { %v4312_v53 = vpop.eup %4311 }
 0xba3   : > { %v1907_v59 = vadd.f32 1.0, %v4312_v53 }
 0xba5   : > { %v1908_v37 = vmul.f32 %v1907_v59, %v1904_v55 }
 0xba7   : > { %3932 = vmatmul.mubr.msk.f32.vlgmr.msra.gmra.mrb[14].mxu0 %vm630_vm0, %v1908_v37 }
 0xba8   : > { %3953 = vmatprep.mubr.msk.f32.mxu0 %vm4384_vm1, %v4385_v58  ;;  %4190 = vmatpush3.bf16.msra.mxu0 %v4189_v42 }
 0xba9   : > { %4191 = vmatprep.subr.bf16.mxu0 %v4383_v54 }
 0xbac   : > { %4193 = vmatpush3.bf16.msra.mxu0 %v4192_v47 }
 0xc7a   : > { %v1983_v27 = vpop.f32.mrb[14].mxu0 }
 0xc7b   : > { %v1987_v49 = vadd.f32 %v1983_v27, %v1798_v14  ;;  %v3933_v61 = vpop.f32.mrb[15].mxu0  ;;  %v3574_v14 = vld [vmem:[%s5528_s5 + $0x68] sm:$0xff]  ;;  %v2034_v27 = vrot.slane %v5122_v20, %v670_v33 }
 0xc7c   : > { %v4183_v16 = vpack.c.bf16 %v3574_v14, %v3573_v13 }
 0xc7d   : > { %v5099_v5 = vadd.f32 %v1991_v38, %v1987_v49 }
 0xc7e   : > { %4184 = vmatpush3.bf16.msra.mxu1 %v4183_v16 }
 0xc7f   : > { %v1995_v6 = vsel %vm630_vm0, %v5099_v5, 0.0  ;;  %4185 = vmatprep.subr.bf16.mxu1 %v4383_v54 }
 0xc80   : > { %1996 = vadd.xlane.f32.xlu0 %v1995_v6  ;;  %v2039_v6 = vrot.slane %v5122_v20, %v675_v34 }
 0xc82   : > { %4187 = vmatpush3.bf16.msra.mxu1 %v4186_v46 }
 0xc83   : > { %4194 = vmatprep.subr.bf16.mxu1 %v4383_v54 }
 0xd0d   : > { %v1997_v8 = vpop.xlane.xlu0 %1996 }
 0xd0e   : > { %v1998_v11 = vmul.f32 0.03125, %v1997_v8 }
 0xd10   : > { %v1999_v32 = vsub.f32 %v5099_v5, %v1998_v11 }
 0xd12   : > { %v2000_v29 = vmul.f32 %v1999_v32, %v1999_v32 }
 0xd14   : > { %v2001_v12 = vsel %vm630_vm0, %v2000_v29, 0.0 }
 0xd15   : > { %2002 = vadd.xlane.f32.xlu1 %v2001_v12 }
 0xda2   : > { %v2003_v51 = vpop.xlane.xlu1 %2002 }
 0xda3   : > { %v2004_v19 = vmul.f32 0.03125, %v2003_v51 }
 0xda5   : > { %v2005_v15 = vadd.f32 1e-06, %v2004_v19 }
 0xda7   : > { %4313 = vrsqrt.f32 %v2005_v15 }
 0xdb1   : > { %v4314_v44 = vpop.eup %4313 }
 0xdb2   : > { %v2007_v23 = vmul.f32 %v4314_v44, %v1999_v32 }
 0xdb4   : > { %v2012_v22 = vmul.f32 %v2011_v21, %v2007_v23 }
 0xdb6   : > { %v2017_v26 = vadd.f32 %v2016_v25, %v2012_v22 }
 0xdb8   : > { %3943 = vmatmul.mubr.msk.f32.vlgmr.msra.gmra.mrb[14].mxu1 %vm630_vm0, %v2017_v26  ;;  %v2018_v28 = vsel %vm630_vm0, %v2017_v26, 0.0 }
 0xdb9   : > { %2019 = vadd.xlane.f32.xlu0 %v2018_v28  ;;  %3964 = vmatprep.mubr.msk.f32.mxu1 %vm4384_vm1, %v4385_v58 }
 0xdba   : > { %4196 = vmatpush3.bf16.msra.mxu1 %v4195_v43 }
 0xdbb   : > { %4197 = vmatprep.subr.bf16.mxu1 %v4383_v54 }
 0xdbe   : > { %4199 = vmatpush3.bf16.msra.mxu1 %v4198_v50 }
 0xe46   : > { %v2020_v31 = vpop.xlane.xlu0 %2019 }
 0xe47   : > { %v2021_v35 = vmul.f32 0.03125, %v2020_v31 }
 0xe49   : > { %v2022_v36 = vsub.f32 %v2017_v26, %v2021_v35 }
 0xe4b   : > { %v2023_v39 = vmul.f32 %v2022_v36, %v2022_v36 }
 0xe4d   : > { %v2024_v40 = vsel %vm630_vm0, %v2023_v39, 0.0 }
 0xe4e   : > { %2025 = vadd.xlane.f32.xlu1 %v2024_v40 }
 0xe8b   : > { %v2115_v52 = vpop.f32.mrb[14].mxu1 }
 0xe8c   : > { %v2410_v53 = vrot.slane %v2115_v52, 4  ;;  %v3944_v55 = vpop.f32.mrb[15].mxu1  ;;  %2272 = vxpose.xlu0.b32.start.end [1/1] (short) (narrow) %v2115_v52, 32 }
 0xe8e   : > { %2412 = vxpose.xlu1.b32.start.end [1/1] (short) (narrow) %v2410_v53, 32 }
 0xedb   : > { %v2026_v59 = vpop.xlane.xlu1 %2025 }
 0xedc   : > { %v2027_v37 = vmul.f32 0.03125, %v2026_v59 }
 0xede   : > { %v2028_v38 = vadd.f32 1e-06, %v2027_v37 }
 0xee0   : > { %4315 = vrsqrt.f32 %v2028_v38 }
 0xeea   : > { %v4316_v49 = vpop.eup %4315 }
 0xeeb   : > { %v2030_v61 = vmul.f32 %v4316_v49, %v2022_v36 }
 0xeed   : > { %v2035_v8 = vmul.f32 %v2034_v27, %v2030_v61 }
 0xeef   : > { %v2040_v11 = vadd.f32 %v2039_v6, %v2035_v8 }
 0xef1   : > { %3954 = vmatmul.mubr.msk.f32.vlgmr.msra.gmra.mrb[16].mxu0 %vm630_vm0, %v2040_v11  ;;  %3965 = vmatmul.mubr.msk.f32.vlgmr.msra.gmra.mrb[16].mxu1 %vm630_vm0, %v2040_v11 }
 0xf0c   : > { %v2288_v32 = vpop.trf.xlu0 }
 0xf0d   : > { %3969 = vmatprep.mubr.msk.f32.mxu0 %vm942_vm2, %v2288_v32 }
 0xf0e   : > { %v2428_v29 = vpop.trf.xlu1 }
 0xf0f   : > { %3977 = vmatprep.mubr.msk.f32.mxu1 %vm942_vm2, %v2428_v29 }
 0xf10   : > { %v2289_v33 = vpop.trf.xlu0 }
 0xf12   : > { %v2429_v12 = vpop.trf.xlu1 }
 0xf14   : > { %v2290_v14 = vpop.trf.xlu0 }
 0xf16   : > { %v2430_v13 = vpop.trf.xlu1 }
 0xf18   : > { %v2291_v19 = vpop.trf.xlu0 }
 0xf1a   : > { %v2431_v51 = vpop.trf.xlu1 }
 0xfc4   : > { %v5169_v16 = vpop.f32.mrb[16].mxu1  ;;  %v2193_v17 = vpop.f32.mrb[16].mxu0 }
 0xfc5   : > { %v2305_v34 = vrot.slane %v2193_v17, 4  ;;  %v3955_v18 = vpop.f32.mrb[17].mxu0  ;;  %v3966_v46 = vpop.f32.mrb[17].mxu1  ;;  %3975 = vmatprep.subr.msk.mxu1 %vm955_vm3, %v2193_v17 }
 0xfc6   : > { %3976 = vmatpush3.msk.msra.mxu1 %vm955_vm3, %v2193_v17 }
 0xfc7   : > { %3967 = vmatprep.subr.msk.mxu0 %vm955_vm3, %v2305_v34  ;;  %3978 = vmatmul.mubr.msk.f32.vlgmr.msra.gmra.mrb[18].mxu1 %vm942_vm2, %v2429_v12 }
 0xfc8   : > { %3968 = vmatpush3.msk.msra.mxu0 %vm955_vm3, %v2305_v34  ;;  %3980 = vmatprep.mubr.msk.f32.mxu1 %vm942_vm2, %v2430_v13 }
 0xfc9   : > { %3970 = vmatmul.mubr.msk.f32.vlgmr.msra.gmra.mrb[18].mxu0 %vm942_vm2, %v2289_v33  ;;  %4200 = vmatprep.subr.bf16.mxu0 %v4383_v54 }
 0xfca   : > { %3972 = vmatprep.mubr.msk.f32.mxu0 %vm942_vm2, %v2290_v14  ;;  %4208 = vmatprep.subr.bf16.mxu1 %v4383_v54 }
 0xfcb   : > { %3981 = vmatmul.mubr.msk.f32.gmra.mrb[20].mxu1 %vm942_vm2, %v2431_v51 }
 0xfcc   : > { %4002 = vmatprep.mubr.msk.f32.mxu1 %vm4384_vm1, %v4385_v58 }
 0xfcd   : > { %3973 = vmatmul.mubr.msk.f32.gmra.mrb[20].mxu0 %vm942_vm2, %v2291_v19 }
 0xfce   : > { %3991 = vmatprep.mubr.msk.f32.mxu0 %vm4384_vm1, %v4385_v58 }
0x109a   : > { %v3979_v15 = vpop.f32.mrb[18].mxu1 }
0x109b   : > { %v5187_v21 = vmul.f32 0.17677669, %v3979_v15  ;;  %v2524_v44 = vpop.f32.mrb[19].mxu1  ;;  %v5238_v15 = vld [vmem:[%s5526_s3 + $0x8] sm:$0xff] }
0x109c   : > { %v5189_v23 = vmul.f32 0.17677669, %v2524_v44  ;;  %v3971_v25 = vpop.f32.mrb[18].mxu0 }
0x109d   : > { %v2690_v22 = vsel %vm626_vm4, %v5187_v21, 0.0  ;;  %v5194_v26 = vmul.f32 0.17677669, %v3971_v25  ;;  %v2386_v28 = vpop.f32.mrb[19].mxu0  ;;  %v5244_v25 = vld [vmem:[%s5526_s3] sm:$0xff] }
0x109e   : > { %v2689_v31 = vsel %vm625_vm5, %v5189_v23, 0.0  ;;  %v5199_v35 = vmul.f32 0.17677669, %v2386_v28  ;;  %v3982_v36 = vpop.f32.mrb[20].mxu1  ;;  %v2694_v39 = vsel %vm630_vm0, %v2690_v22, 0.0 }
0x109f   : > { %v2693_v40 = vsel %vm630_vm0, %v2689_v31, 0.0  ;;  %v2548_v41 = vsel %vm626_vm4, %v5194_v26, 0.0  ;;  %v5206_v60 = vmul.f32 0.17677669, %v3982_v36  ;;  %v2534_v4 = vpop.f32.mrb[21].mxu1 }
0x10a0   : > { %v2547_v42 = vsel %vm625_vm5, %v5199_v35, 0.0  ;;  %v5211_v1 = vmul.f32 0.17677669, %v2534_v4  ;;  %v3974_v43 = vpop.f32.mrb[20].mxu0  ;;  %v2552_v10 = vsel %vm630_vm0, %v2548_v41, 0.0  ;;  %v2695_v48 = vadd.f32 %v2694_v39, %v2693_v40 }
0x10a1   : > { %v2551_v7 = vsel %vm630_vm0, %v2547_v42, 0.0  ;;  %v5215_v45 = vmul.f32 0.17677669, %v3974_v43  ;;  %v2396_v47 = vpop.f32.mrb[21].mxu0  ;;  %v2692_v50 = vsel %vm628_vm6, %v5206_v60, 0.0  ;;  %v5256_v42 = vld [vmem:[%s5526_s3 + $0x18] sm:$0xff] }
0x10a2   : > { %v2691_v52 = vsel %vm627_vm7, %v5211_v1, 0.0  ;;  %v5223_v53 = vmul.f32 0.17677669, %v2396_v47  ;;  %v2553_v37 = vadd.f32 %v2552_v10, %v2551_v7  ;;  %v2698_v49 = vsel %vm630_vm0, %v2692_v50, 0.0  ;;  %v5262_v10 = vld [vmem:[%s5526_s3 + $0x10] sm:$0xff] }
0x10a3   : > { %v2696_v55 = vsel %vm630_vm0, %v2691_v52, 0.0  ;;  %v2550_v59 = vsel %vm628_vm6, %v5215_v45, 0.0 }
0x10a4   : > { %v2697_v38 = vadd.f32 %v2696_v55, %v2695_v48  ;;  %v2549_v27 = vsel %vm627_vm7, %v5223_v53, 0.0  ;;  %v2556_v61 = vsel %vm630_vm0, %v2550_v59, 0.0 }
0x10a5   : > { %v2554_v6 = vsel %vm630_vm0, %v2549_v27, 0.0 }
0x10a6   : > { %v2699_v8 = vadd.f32 %v2698_v49, %v2697_v38  ;;  %v2555_v11 = vadd.f32 %v2554_v6, %v2553_v37 }
0x10a8   : > { %v2700_v32 = vrot.slane %v2699_v8, 4  ;;  %v2557_v29 = vadd.f32 %v2556_v61, %v2555_v11 }
0x10aa   : > { %v2701_v12 = vadd.f32 %v2700_v32, %v2699_v8  ;;  %v2558_v33 = vrot.slane %v2557_v29, 4 }
0x10ac   : > { %v2702_v13 = vrot.slane %v2701_v12, 2  ;;  %v2559_v14 = vadd.f32 %v2558_v33, %v2557_v29 }
0x10ae   : > { %v2703_v17 = vadd.f32 %v2702_v13, %v2701_v12  ;;  %v2560_v34 = vrot.slane %v2559_v14, 2 }
0x10b0   : > { %v2561_v18 = vadd.f32 %v2560_v34, %v2559_v14  ;;  %v2704_v46 = vrot.slane %v2703_v17, 1 }
0x10b2   : > { %v2705_v51 = vadd.f32 %v2704_v46, %v2703_v17  ;;  %v2562_v19 = vrot.slane %v2561_v18, 1 }
0x10b4   : > { %v2707_v44 = vmul.f32 %v5238_v15, %v2705_v51  ;;  %v2706_v22 = vmul.f32 %v5244_v25, %v2705_v51  ;;  %v2563_v28 = vadd.f32 %v2562_v19, %v2561_v18  ;;  %v2709_v50 = vmul.f32 %v5256_v42, %v2705_v51 }
0x10b5   : > { %v2708_v52 = vmul.f32 %v5262_v10, %v2705_v51 }
0x10b6   : > { %v2713_v31 = vsel %vm630_vm0, %v2707_v44, 0.0  ;;  %v2710_v36 = vsel %vm630_vm0, %v2706_v22, 0.0  ;;  %v2565_v39 = vmul.f32 %v5238_v15, %v2563_v28  ;;  %v2564_v40 = vmul.f32 %v5244_v25, %v2563_v28 }
0x10b7   : > { %2714 = vadd.xlane.f32.xlu0 %v2713_v31  ;;  %2711 = vadd.xlane.f32.xlu1 %v2710_v36  ;;  %v2567_v43 = vmul.f32 %v5256_v42, %v2563_v28  ;;  %v2566_v7 = vmul.f32 %v5262_v10, %v2563_v28  ;;  %v2719_v55 = vsel %vm630_vm0, %v2709_v50, 0.0  ;;  %v2716_v59 = vsel %vm630_vm0, %v2708_v52, 0.0 }
0x10b8   : > { %v2571_v41 = vsel %vm630_vm0, %v2565_v39, 0.0  ;;  %v2568_v4 = vsel %vm630_vm0, %v2564_v40, 0.0 }
0x10b9   : > { %v2577_v47 = vsel %vm630_vm0, %v2567_v43, 0.0  ;;  %v2574_v48 = vsel %vm630_vm0, %v2566_v7, 0.0 }
0x10bb   : > { %2572 = vadd.xlane.f32.xlu1 %v2571_v41  ;;  %2569 = vadd.xlane.f32.xlu0 %v2568_v4 }
0x10bf   : > { %2578 = vadd.xlane.f32.xlu1 %v2577_v47  ;;  %2575 = vadd.xlane.f32.xlu0 %v2574_v48 }
0x10c3   : > { %2720 = vadd.xlane.f32.xlu1 %v2719_v55  ;;  %2717 = vadd.xlane.f32.xlu0 %v2716_v59 }
0x1144   : > { %v2715_v37 = vpop.xlane.xlu0 %2714  ;;  %v2712_v38 = vpop.xlane.xlu1 %2711 }
0x1145   : > { %v2723_v27 = vmul.f32 0.015625, %v2715_v37  ;;  %v2722_v49 = vmul.f32 0.015625, %v2712_v38 }
0x1147   : > { %v5272_v61 = vsub.f32 %v5187_v21, %v2723_v27  ;;  %v5275_v6 = vsub.f32 %v5189_v23, %v2722_v49 }
0x1148   : > { %v2573_v8 = vpop.xlane.xlu1 %2572  ;;  %v2570_v11 = vpop.xlane.xlu0 %2569 }
0x1149   : > { %v2581_v32 = vmul.f32 0.015625, %v2573_v8  ;;  %v2580_v29 = vmul.f32 0.015625, %v2570_v11  ;;  %v2731_v13 = vmul.f32 %v5272_v61, %v5272_v61  ;;  %v2730_v21 = vmul.f32 %v5275_v6, %v5275_v6 }
0x114b   : > { %v5278_v12 = vsub.f32 %v5194_v26, %v2581_v32  ;;  %v5281_v33 = vsub.f32 %v5199_v35, %v2580_v29  ;;  %v2735_v19 = vsel %vm626_vm4, %v2731_v13, 0.0  ;;  %v2734_v44 = vsel %vm625_vm5, %v2730_v21, 0.0 }
0x114c   : > { %v2579_v14 = vpop.xlane.xlu1 %2578  ;;  %v2576_v17 = vpop.xlane.xlu0 %2575  ;;  %v2739_v43 = vsel %vm630_vm0, %v2735_v19, 0.0  ;;  %v2738_v47 = vsel %vm630_vm0, %v2734_v44, 0.0 }
0x114d   : > { %v2589_v23 = vmul.f32 %v5278_v12, %v5278_v12  ;;  %v2588_v34 = vmul.f32 %v5281_v33, %v5281_v33  ;;  %v2583_v18 = vmul.f32 0.015625, %v2579_v14  ;;  %v2582_v26 = vmul.f32 0.015625, %v2576_v17 }
0x114f   : > { %v2593_v35 = vsel %vm626_vm4, %v2589_v23, 0.0  ;;  %v2592_v46 = vsel %vm625_vm5, %v2588_v34, 0.0  ;;  %v5296_v51 = vsub.f32 %v5215_v45, %v2583_v18  ;;  %v5304_v28 = vsub.f32 %v5223_v53, %v2582_v26 }
0x1150   : > { %v2597_v22 = vsel %vm630_vm0, %v2593_v35, 0.0  ;;  %v2721_v31 = vpop.xlane.xlu1 %2720  ;;  %v2718_v36 = vpop.xlane.xlu0 %2717  ;;  %v2596_v39 = vsel %vm630_vm0, %v2592_v46, 0.0 }
0x1151   : > { %v2591_v40 = vmul.f32 %v5296_v51, %v5296_v51  ;;  %v2725_v45 = vmul.f32 0.015625, %v2721_v31  ;;  %v2724_v41 = vmul.f32 0.015625, %v2718_v36  ;;  %v2590_v4 = vmul.f32 %v5304_v28, %v5304_v28 }
0x1152   : > { %v2598_v48 = vadd.f32 %v2597_v22, %v2596_v39 }
0x1153   : > { %v5313_v7 = vsub.f32 %v5206_v60, %v2725_v45  ;;  %v5316_v53 = vsub.f32 %v5211_v1, %v2724_v41  ;;  %v2595_v50 = vsel %vm628_vm6, %v2591_v40, 0.0  ;;  %v2594_v52 = vsel %vm627_vm7, %v2590_v4, 0.0 }
0x1154   : > { %v2599_v55 = vsel %vm630_vm0, %v2594_v52, 0.0  ;;  %v2740_v1 = vadd.f32 %v2739_v43, %v2738_v47  ;;  %v2601_v38 = vsel %vm630_vm0, %v2595_v50, 0.0 }
0x1155   : > { %v2733_v59 = vmul.f32 %v5313_v7, %v5313_v7  ;;  %v2732_v60 = vmul.f32 %v5316_v53, %v5316_v53  ;;  %v2600_v37 = vadd.f32 %v2599_v55, %v2598_v48 }
0x1157   : > { %v2737_v27 = vsel %vm628_vm6, %v2733_v59, 0.0  ;;  %v2736_v49 = vsel %vm627_vm7, %v2732_v60, 0.0  ;;  %v2602_v8 = vadd.f32 %v2601_v38, %v2600_v37 }
0x1158   : > { %v2741_v11 = vsel %vm630_vm0, %v2736_v49, 0.0  ;;  %v2743_v13 = vsel %vm630_vm0, %v2737_v27, 0.0 }
0x1159   : > { %v2742_v32 = vadd.f32 %v2741_v11, %v2740_v1  ;;  %v2603_v29 = vrot.slane %v2602_v8, 4 }
0x115b   : > { %v2744_v21 = vadd.f32 %v2743_v13, %v2742_v32  ;;  %v2604_v14 = vadd.f32 %v2603_v29, %v2602_v8 }
0x115d   : > { %v2745_v17 = vrot.slane %v2744_v21, 4  ;;  %v2605_v23 = vrot.slane %v2604_v14, 2 }
0x115f   : > { %v2746_v34 = vadd.f32 %v2745_v17, %v2744_v21  ;;  %v2606_v18 = vadd.f32 %v2605_v23, %v2604_v14 }
0x1161   : > { %v2747_v26 = vrot.slane %v2746_v34, 2  ;;  %v2607_v35 = vrot.slane %v2606_v18, 1 }
0x1163   : > { %v2748_v46 = vadd.f32 %v2747_v26, %v2746_v34  ;;  %v2608_v19 = vadd.f32 %v2607_v35, %v2606_v18 }
0x1165   : > { %v2749_v44 = vrot.slane %v2748_v46, 1  ;;  %v2610_v22 = vmul.f32 %v5238_v15, %v2608_v19  ;;  %v2609_v31 = vmul.f32 %v5244_v25, %v2608_v19  ;;  %v2612_v47 = vmul.f32 %v5256_v42, %v2608_v19 }
0x1166   : > { %v2611_v48 = vmul.f32 %v5262_v10, %v2608_v19 }
0x1167   : > { %v2750_v36 = vadd.f32 %v2749_v44, %v2748_v46  ;;  %v2616_v39 = vsel %vm630_vm0, %v2610_v22, 0.0  ;;  %v2613_v40 = vsel %vm630_vm0, %v2609_v31, 0.0  ;;  %v2622_v50 = vsel %vm630_vm0, %v2612_v47, 0.0 }
0x1168   : > { %2617 = vadd.xlane.f32.xlu1 %v2616_v39  ;;  %2614 = vadd.xlane.f32.xlu0 %v2613_v40  ;;  %v2619_v52 = vsel %vm630_vm0, %v2611_v48, 0.0 }
0x1169   : > { %v2752_v45 = vmul.f32 %v5238_v15, %v2750_v36  ;;  %v2751_v41 = vmul.f32 %v5244_v25, %v2750_v36  ;;  %v2754_v55 = vmul.f32 %v5256_v42, %v2750_v36  ;;  %v2753_v15 = vmul.f32 %v5262_v10, %v2750_v36 }
0x116b   : > { %v2758_v4 = vsel %vm630_vm0, %v2752_v45, 0.0  ;;  %v2755_v43 = vsel %vm630_vm0, %v2751_v41, 0.0  ;;  %v2764_v25 = vsel %vm630_vm0, %v2754_v55, 0.0  ;;  %v2761_v59 = vsel %vm630_vm0, %v2753_v15, 0.0 }
0x116c   : > { %2759 = vadd.xlane.f32.xlu1 %v2758_v4  ;;  %2756 = vadd.xlane.f32.xlu0 %v2755_v43 }
0x1170   : > { %2623 = vadd.xlane.f32.xlu1 %v2622_v50  ;;  %2620 = vadd.xlane.f32.xlu0 %v2619_v52 }
0x1174   : > { %2765 = vadd.xlane.f32.xlu1 %v2764_v25  ;;  %2762 = vadd.xlane.f32.xlu0 %v2761_v59 }
0x11f5   : > { %v2618_v60 = vpop.xlane.xlu1 %2617  ;;  %v2615_v37 = vpop.xlane.xlu0 %2614 }
0x11f6   : > { %v2626_v1 = vmul.f32 0.015625, %v2618_v60  ;;  %v2625_v38 = vmul.f32 0.015625, %v2615_v37 }
0x11f8   : > { %v2630_v27 = vadd.f32 1e-05, %v2626_v1  ;;  %v2629_v49 = vadd.f32 1e-05, %v2625_v38 }
0x11f9   : > { %v2760_v8 = vpop.xlane.xlu1 %2759  ;;  %v2757_v11 = vpop.xlane.xlu0 %2756 }
0x11fa   : > { %4317 = vrsqrt.f32 %v2630_v27  ;;  %v2768_v42 = vmul.f32 0.015625, %v2760_v8  ;;  %v2767_v32 = vmul.f32 0.015625, %v2757_v11 }
0x11fb   : > { %4319 = vrsqrt.f32 %v2629_v49 }
0x11fc   : > { %v2772_v10 = vadd.f32 1e-05, %v2768_v42  ;;  %v2771_v29 = vadd.f32 1e-05, %v2767_v32 }
0x11fd   : > { %v2624_v13 = vpop.xlane.xlu1 %2623  ;;  %v2621_v21 = vpop.xlane.xlu0 %2620 }
0x11fe   : > { %4321 = vrsqrt.f32 %v2772_v10  ;;  %v2628_v14 = vmul.f32 0.015625, %v2624_v13  ;;  %v2627_v17 = vmul.f32 0.015625, %v2621_v21 }
0x11ff   : > { %4323 = vrsqrt.f32 %v2771_v29 }
0x1200   : > { %v2632_v23 = vadd.f32 1e-05, %v2628_v14  ;;  %v2631_v34 = vadd.f32 1e-05, %v2627_v17 }
0x1201   : > { %v2766_v18 = vpop.xlane.xlu1 %2765  ;;  %v2763_v26 = vpop.xlane.xlu0 %2762 }
0x1202   : > { %4325 = vrsqrt.f32 %v2632_v23  ;;  %v2770_v35 = vmul.f32 0.015625, %v2766_v18  ;;  %v2769_v46 = vmul.f32 0.015625, %v2763_v26 }
0x1203   : > { %4327 = vrsqrt.f32 %v2631_v34 }
0x1204   : > { %v4318_v19 = vpop.eup %4317  ;;  %v2774_v44 = vadd.f32 1e-05, %v2770_v35  ;;  %v2773_v22 = vadd.f32 1e-05, %v2769_v46 }
0x1205   : > { %v4320_v31 = vpop.eup %4319  ;;  %v2638_v36 = vmul.f32 %v4318_v19, %v5278_v12 }
0x1206   : > { %4329 = vrsqrt.f32 %v2774_v44  ;;  %v2637_v39 = vmul.f32 %v4320_v31, %v5281_v33 }
0x1207   : > { %4331 = vrsqrt.f32 %v2773_v22  ;;  %v2642_v40 = vsel %vm626_vm4, %v2638_v36, -inf }
0x1208   : > { %v4322_v45 = vpop.eup %4321  ;;  %v2648_v41 = vsel %vm630_vm0, %v2642_v40, -inf  ;;  %v2641_v4 = vsel %vm625_vm5, %v2637_v39, -inf }
0x1209   : > { %v4324_v43 = vpop.eup %4323  ;;  %2649 = vmax.xlane.f32.xlu1 %v2648_v41  ;;  %v2645_v47 = vsel %vm630_vm0, %v2641_v4, -inf  ;;  %v2780_v48 = vmul.f32 %v4322_v45, %v5272_v61 }
0x120a   : > { %2646 = vmax.xlane.f32.xlu0 %v2645_v47  ;;  %v2779_v12 = vmul.f32 %v4324_v43, %v5275_v6 }
0x120b   : > { %v2784_v33 = vsel %vm626_vm4, %v2780_v48, -inf }
0x120c   : > { %v4326_v50 = vpop.eup %4325  ;;  %v2790_v52 = vsel %vm630_vm0, %v2784_v33, -inf  ;;  %v2783_v55 = vsel %vm625_vm5, %v2779_v12, -inf }
0x120d   : > { %v4328_v15 = vpop.eup %4327  ;;  %2791 = vmax.xlane.f32.xlu1 %v2790_v52  ;;  %v2787_v25 = vsel %vm630_vm0, %v2783_v55, -inf  ;;  %v2640_v59 = vmul.f32 %v4326_v50, %v5296_v51 }
0x120e   : > { %2788 = vmax.xlane.f32.xlu0 %v2787_v25  ;;  %v2639_v61 = vmul.f32 %v4328_v15, %v5304_v28 }
0x120f   : > { %v2644_v6 = vsel %vm628_vm6, %v2640_v59, -inf }
0x1210   : > { %v4330_v56 = vpop.eup %4329  ;;  %v2654_v60 = vsel %vm630_vm0, %v2644_v6, -inf  ;;  %v2643_v37 = vsel %vm627_vm7, %v2639_v61, -inf }
0x1211   : > { %v4332_v57 = vpop.eup %4331  ;;  %2655 = vmax.xlane.f32.xlu1 %v2654_v60  ;;  %v2651_v1 = vsel %vm630_vm0, %v2643_v37, -inf  ;;  %v2782_v38 = vmul.f32 %v4330_v56, %v5313_v7 }
0x1212   : > { %2652 = vmax.xlane.f32.xlu0 %v2651_v1  ;;  %v2781_v51 = vmul.f32 %v4332_v57, %v5316_v53 }
0x1213   : > { %v2786_v28 = vsel %vm628_vm6, %v2782_v38, -inf }
0x1214   : > { %v2796_v27 = vsel %vm630_vm0, %v2786_v28, -inf  ;;  %v2785_v49 = vsel %vm627_vm7, %v2781_v51, -inf }
0x1215   : > { %2797 = vmax.xlane.f32.xlu1 %v2796_v27  ;;  %v2793_v8 = vsel %vm630_vm0, %v2785_v49, -inf }
0x1216   : > { %2794 = vmax.xlane.f32.xlu0 %v2793_v8 }
0x1296   : > { %v2650_v11 = vpop.xlane.xlu1 %2649 }
0x1297   : > { %v2658_v42 = vsub.f32 %v2642_v40, %v2650_v11  ;;  %v2647_v32 = vpop.xlane.xlu0 %2646 }
0x1298   : > { %v2657_v10 = vsub.f32 %v2641_v4, %v2647_v32 }
0x1299   : > { %v2663_v7 = vmul.f32 1.442695, %v2658_v42 }
0x129a   : > { %v2661_v29 = vmul.f32 1.442695, %v2657_v10  ;;  %v2792_v13 = vpop.xlane.xlu1 %2791 }
0x129b   : > { %4333 = vpow2.f32 %v2663_v7  ;;  %v2800_v53 = vsub.f32 %v2784_v33, %v2792_v13  ;;  %v2789_v62 = vpop.xlane.xlu0 %2788 }
0x129c   : > { %4335 = vpow2.f32 %v2661_v29  ;;  %v2799_v21 = vsub.f32 %v2783_v55, %v2789_v62 }
0x129d   : > { %v2805_v14 = vmul.f32 1.442695, %v2800_v53 }
0x129e   : > { %v2803_v17 = vmul.f32 1.442695, %v2799_v21  ;;  %v2656_v3 = vpop.xlane.xlu1 %2655 }
0x129f   : > { %4337 = vpow2.f32 %v2805_v14  ;;  %v2660_v23 = vsub.f32 %v2644_v6, %v2656_v3  ;;  %v2653_v34 = vpop.xlane.xlu0 %2652 }
0x12a0   : > { %4339 = vpow2.f32 %v2803_v17  ;;  %v2659_v18 = vsub.f32 %v2643_v37, %v2653_v34  ;;  %v3608_v34 = vld [vmem:[%s5529_s6 + $0x40] sm:$0xff] }
0x12a1   : > { %v2667_v26 = vmul.f32 1.442695, %v2660_v23 }
0x12a2   : > { %v2665_v35 = vmul.f32 1.442695, %v2659_v18  ;;  %v2798_v46 = vpop.xlane.xlu1 %2797  ;;  %v3609_v18 = vld [vmem:[%s5529_s6 + $0x48] sm:$0xff] }
0x12a3   : > { %4341 = vpow2.f32 %v2667_v26  ;;  %v2802_v19 = vsub.f32 %v2786_v28, %v2798_v46  ;;  %v2795_v44 = vpop.xlane.xlu0 %2794  ;;  %v3610_v46 = vld [vmem:[%s5529_s6 + $0x50] sm:$0xff] }
0x12a4   : > { %4343 = vpow2.f32 %v2665_v35  ;;  %v2801_v22 = vsub.f32 %v2785_v49, %v2795_v44  ;;  %v4217_v35 = vpack.c.bf16 %v3609_v18, %v3608_v34  ;;  %v3611_v44 = vld [vmem:[%s5529_s6 + $0x58] sm:$0xff] }
0x12a5   : > { %v4334_v31 = vpop.eup %4333  ;;  %v2809_v36 = vmul.f32 1.442695, %v2802_v19  ;;  %v2832_v19 = vrot.slane %v5169_v16, 4 }
0x12a6   : > { %v4336_v39 = vpop.eup %4335  ;;  %v2807_v40 = vmul.f32 1.442695, %v2801_v22  ;;  %v2672_v45 = vsel %vm630_vm0, %v4334_v31, 0.0  ;;  %v3613_v22 = vld [vmem:[%s5529_s6 + $0x60] sm:$0xff] }
0x12a7   : > { %4345 = vpow2.f32 %v2809_v36  ;;  %2673 = vadd.xlane.f32.xlu1 %v2672_v45  ;;  %v2669_v41 = vsel %vm630_vm0, %v4336_v39, 0.0  ;;  %v4223_v36 = vpack.c.bf16 %v3614_v24, %v3613_v22 }
0x12a8   : > { %4347 = vpow2.f32 %v2807_v40  ;;  %2670 = vadd.xlane.f32.xlu0 %v2669_v41  ;;  %v3616_v40 = vld [vmem:[%s5529_s6 + $0x78] sm:$0xff] }
0x12a9   : > { %v4338_v4 = vpop.eup %4337 }
0x12aa   : > { %v4340_v43 = vpop.eup %4339  ;;  %v2814_v47 = vsel %vm630_vm0, %v4338_v4, 0.0 }
0x12ab   : > { %2815 = vadd.xlane.f32.xlu1 %v2814_v47  ;;  %v2811_v48 = vsel %vm630_vm0, %v4340_v43, 0.0 }
0x12ac   : > { %2812 = vadd.xlane.f32.xlu0 %v2811_v48 }
0x12ad   : > { %v4342_v12 = vpop.eup %4341 }
0x12ae   : > { %v4344_v33 = vpop.eup %4343  ;;  %v2678_v50 = vsel %vm630_vm0, %v4342_v12, 0.0 }
0x12af   : > { %2679 = vadd.xlane.f32.xlu1 %v2678_v50  ;;  %v2675_v52 = vsel %vm630_vm0, %v4344_v33, 0.0 }
0x12b0   : > { %2676 = vadd.xlane.f32.xlu0 %v2675_v52 }
0x12b1   : > { %v4346_v55 = vpop.eup %4345 }
0x12b2   : > { %v4348_v15 = vpop.eup %4347  ;;  %v2820_v25 = vsel %vm630_vm0, %v4346_v55, 0.0 }
0x12b3   : > { %2821 = vadd.xlane.f32.xlu1 %v2820_v25  ;;  %v2817_v59 = vsel %vm630_vm0, %v4348_v15, 0.0 }
0x12b4   : > { %2818 = vadd.xlane.f32.xlu0 %v2817_v59 }
0x1334   : > { %v2674_v61 = vpop.xlane.xlu1 %2673 }
0x1335   : > { %4349 = vrcp.f32 %v2674_v61  ;;  %v2671_v6 = vpop.xlane.xlu0 %2670 }
0x1336   : > { %4351 = vrcp.f32 %v2671_v6 }
0x1338   : > { %v2816_v56 = vpop.xlane.xlu1 %2815 }
0x1339   : > { %4353 = vrcp.f32 %v2816_v56  ;;  %v2813_v60 = vpop.xlane.xlu0 %2812 }
0x133a   : > { %4355 = vrcp.f32 %v2813_v60  ;;  %v3619_v60 = vld [vmem:[%s5530_s7 + $0x40] sm:$0xff] }
0x133c   : > { %v2680_v37 = vpop.xlane.xlu1 %2679 }
0x133d   : > { %4357 = vrcp.f32 %v2680_v37  ;;  %v2677_v57 = vpop.xlane.xlu0 %2676  ;;  %v3620_v37 = vld [vmem:[%s5530_s7 + $0x48] sm:$0xff] }
0x133e   : > { %4359 = vrcp.f32 %v2677_v57  ;;  %v4229_v57 = vpack.c.bf16 %v3620_v37, %v3619_v60 }
0x133f   : > { %v4350_v1 = vpop.eup %4349 }
0x1340   : > { %v4352_v38 = vpop.eup %4351  ;;  %v2686_v51 = vmul.f32 %v4350_v1, %v4334_v31  ;;  %v2822_v28 = vpop.xlane.xlu1 %2821  ;;  %v4220_v31 = vpack.c.bf16 %v3611_v44, %v3610_v46  ;;  %v3622_v1 = vld [vmem:[%s5530_s7 + $0x58] sm:$0xff] }
0x1341   : > { %v2685_v27 = vmul.f32 %v4352_v38, %v4336_v39  ;;  %4361 = vrcp.f32 %v2822_v28  ;;  %v2819_v49 = vpop.xlane.xlu0 %2818  ;;  %v3615_v39 = vld [vmem:[%s5529_s6 + $0x70] sm:$0xff] }
0x1342   : > { %4363 = vrcp.f32 %v2819_v49  ;;  %v4226_v45 = vpack.c.bf16 %v3616_v40, %v3615_v39  ;;  %v3180_v49 = vrot.slane %v5122_v20, %v1815_v9  ;;  %v3625_v9 = vld [vmem:[%s5530_s7 + $0x68] sm:$0xff]  ;;  %v3382_v40 = vld [vmem:[%s5533_s10] sm:$0xff] }
0x1343   : > { %v4354_v8 = vpop.eup %4353  ;;  %v4201_v11 = vpack.c.bf16 %v2686_v51, %v2685_v27 }
0x1344   : > { %v4356_v42 = vpop.eup %4355  ;;  %v2828_v32 = vmul.f32 %v4354_v8, %v4338_v4 }
0x1345   : > { %v2827_v10 = vmul.f32 %v4356_v42, %v4340_v43  ;;  %4203 = vmatpush3.bf16.xpose.msk.msra.mxu0 %vm4990_vm8, %v4201_v11  ;;  %v3185_v42 = vrot.slane %v5122_v20, %v1820_v30  ;;  %v3618_v20 = vld [vmem:[%s5531_s8 + $0x2] sm:$0x3] }
0x1346   : > { %4204 = vmatprep.subr.bf16.mxu0 %v4383_v54  ;;  %v3356_v18 = vrot.slane %v3618_v20, %v4713_v2 }
0x1347   : > { %v4358_v7 = vpop.eup %4357  ;;  %v4209_v29 = vpack.c.bf16 %v2828_v32, %v2827_v10 }
0x1348   : > { %v4360_v13 = vpop.eup %4359  ;;  %v2688_v53 = vmul.f32 %v4358_v7, %v4342_v12  ;;  %v3624_v7 = vld [vmem:[%s5530_s7 + $0x60] sm:$0xff] }
0x1349   : > { %v2687_v62 = vmul.f32 %v4360_v13, %v4344_v33  ;;  %4211 = vmatpush3.bf16.xpose.msk.msra.mxu1 %vm4990_vm8, %v4209_v29  ;;  %v4235_v29 = vpack.c.bf16 %v3625_v9, %v3624_v7  ;;  %v3195_v13 = vrot.slane %v3618_v20, %v4705_v0 }
0x134a   : > { %4212 = vmatprep.subr.bf16.mxu1 %v4383_v54 }
0x134b   : > { %v4362_v21 = vpop.eup %4361  ;;  %v4205_v14 = vpack.c.bf16 %v2688_v53, %v2687_v62 }
0x134c   : > { %v4364_v17 = vpop.eup %4363  ;;  %v2830_v3 = vmul.f32 %v4362_v21, %v4346_v55 }
0x134d   : > { %v2829_v23 = vmul.f32 %v4364_v17, %v4348_v15  ;;  %4207 = vmatpush3.bf16.xpose.msk.msra.mxu0 %vm4990_vm8, %v4205_v14 }
0x134e   : > { %4216 = vmatprep.subr.bf16.mxu0 %v4383_v54 }
0x134f   : > { %v4213_v26 = vpack.c.bf16 %v2830_v3, %v2829_v23 }
0x1351   : > { %4215 = vmatpush3.bf16.xpose.msk.msra.mxu1 %vm4990_vm8, %v4213_v26 }
0x1352   : > { %4222 = vmatprep.subr.bf16.mxu1 %v4383_v54 }
0x1354   : > { %3992 = vmatmul.mubr.msk.f32.vlgmr.msra.gmra.mrb[22].mxu0 %vm630_vm0, %v2832_v19 }
0x1355   : > { %4218 = vmatpush3.bf16.msra.mxu0 %v4217_v35  ;;  %4013 = vmatprep.mubr.msk.f32.mxu0 %vm4384_vm1, %v4385_v58 }
0x1356   : > { %4219 = vmatprep.subr.bf16.mxu0 %v4383_v54 }
0x1358   : > { %4003 = vmatmul.mubr.msk.f32.vlgmr.msra.gmra.mrb[22].mxu1 %vm630_vm0, %v5169_v16 }
0x1359   : > { %4221 = vmatpush3.bf16.msra.mxu0 %v4220_v31  ;;  %4224 = vmatpush3.bf16.msra.mxu1 %v4223_v36 }
0x135a   : > { %4225 = vmatprep.subr.bf16.mxu1 %v4383_v54  ;;  %4024 = vmatprep.mubr.msk.f32.mxu1 %vm4384_vm1, %v4385_v58 }
0x135b   : > { %4228 = vmatprep.subr.bf16.mxu0 %v4383_v54 }
0x135d   : > { %4227 = vmatpush3.bf16.msra.mxu1 %v4226_v45  ;;  %v3383_v45 = vld [vmem:[%s5533_s10 + $0x8] sm:$0xff] }
0x135e   : > { %4234 = vmatprep.subr.bf16.mxu1 %v4383_v54 }
0x1427   : > { %v2913_v16 = vpop.f32.mrb[22].mxu0 }
0x1428   : > { %v3993_v41 = vpop.f32.mrb[23].mxu0  ;;  %4014 = vmatmul.mubr.msk.f32.vlgmr.msra.gmra.mrb[24].mxu0 %vm630_vm0, %v2913_v16  ;;  %v4241_v16 = vpack.c.bf16 %v3383_v45, %v3382_v40 }
0x1429   : > { %4035 = vmatprep.mubr.msk.f32.mxu0 %vm4384_vm1, %v4385_v58  ;;  %4230 = vmatpush3.bf16.msra.mxu0 %v4229_v57  ;;  %v3384_v41 = vld [vmem:[%s5533_s10 + $0x10] sm:$0xff] }
0x142a   : > { %4231 = vmatprep.subr.bf16.mxu0 %v4383_v54 }
0x142b   : > { %v2997_v4 = vpop.f32.mrb[22].mxu1 }
0x142c   : > { %v4004_v43 = vpop.f32.mrb[23].mxu1  ;;  %4025 = vmatmul.mubr.msk.f32.vlgmr.msra.gmra.mrb[24].mxu1 %vm630_vm0, %v2997_v4  ;;  %v3385_v4 = vld [vmem:[%s5533_s10 + $0x18] sm:$0xff] }
0x142d   : > { %4046 = vmatprep.mubr.msk.f32.mxu1 %vm4384_vm1, %v4385_v58  ;;  %4236 = vmatpush3.bf16.msra.mxu1 %v4235_v29  ;;  %v4244_v43 = vpack.c.bf16 %v3385_v4, %v3384_v41 }
0x142e   : > { %4237 = vmatprep.subr.bf16.mxu1 %v4383_v54 }
0x14fb   : > { %v3075_v47 = vpop.f32.mrb[24].mxu0 }
0x14fc   : > { %v4015_v48 = vpop.f32.mrb[25].mxu0  ;;  %v3158_v12 = vrot.slane %v3075_v47, 4 }
0x14ff   : > { %v3153_v33 = vpop.f32.mrb[24].mxu1 }
0x1500   : > { %v3160_v50 = vsel %vm955_vm3, %v3153_v33, %v3158_v12  ;;  %v4026_v52 = vpop.f32.mrb[25].mxu1  ;;  %v3358_v33 = vld [vmem:[%s5532_s9] sm:$0x3] }
0x1501   : > { %v3161_v55 = vadd.f32 %v3160_v50, %v5099_v5  ;;  %v3621_v5 = vld [vmem:[%s5530_s7 + $0x50] sm:$0xff] }
0x1502   : > { %v4232_v38 = vpack.c.bf16 %v3622_v1, %v3621_v5 }
0x1503   : > { %v3164_v15 = vsel %vm630_vm0, %v3161_v55, 0.0 }
0x1504   : > { %3165 = vadd.xlane.f32.xlu0 %v3164_v15  ;;  %4233 = vmatpush3.bf16.msra.mxu0 %v4232_v38 }
0x1505   : > { %4240 = vmatprep.subr.bf16.mxu0 %v4383_v54 }
0x1591   : > { %v3166_v25 = vpop.xlane.xlu0 %3165 }
0x1592   : > { %v3167_v59 = vmul.f32 0.03125, %v3166_v25 }
0x1594   : > { %v3168_v61 = vsub.f32 %v3161_v55, %v3167_v59  ;;  %v3629_v59 = vld [vmem:[%s5534_s11] ss:$0 sm:$0xff] }
0x1596   : > { %v3169_v6 = vmul.f32 %v3168_v61, %v3168_v61 }
0x1598   : > { %v3170_v56 = vsel %vm630_vm0, %v3169_v6, 0.0 }
0x1599   : > { %3171 = vadd.xlane.f32.xlu1 %v3170_v56 }
0x1626   : > { %v3172_v51 = vpop.xlane.xlu1 %3171 }
0x1627   : > { %v3173_v28 = vmul.f32 0.03125, %v3172_v51 }
0x1629   : > { %v3174_v27 = vadd.f32 1e-06, %v3173_v28 }
0x162b   : > { %4365 = vrsqrt.f32 %v3174_v27 }
0x1635   : > { %v4366_v8 = vpop.eup %4365 }
0x1636   : > { %v3176_v11 = vmul.f32 %v4366_v8, %v3168_v61 }
0x1638   : > { %v3181_v32 = vmul.f32 %v3180_v49, %v3176_v11 }
0x163a   : > { %v3186_v10 = vadd.f32 %v3185_v42, %v3181_v32 }
0x163c   : > { %4036 = vmatmul.mubr.msk.f32.vlgmr.msra.gmra.mrb[26].mxu0 %vm630_vm0, %v3186_v10 }
0x163d   : > { %4057 = vmatprep.mubr.msk.f32.mxu0 %vm4384_vm1, %v4385_v58  ;;  %v3627_v58 = vld [vmem:[%s5530_s7 + $0x78] sm:$0xff]  ;;  %4242 = vmatpush3.bf16.msra.mxu0 %v4241_v16 }
0x163e   : > { %v4238_v30 = vpack.c.bf16 %v3627_v58, %v3626_v63  ;;  %4243 = vmatprep.subr.bf16.mxu0 %v4383_v54  ;;  %v3375_v54 = vrot.slane %v3358_v33, %v4705_v0 }
0x1640   : > { %4239 = vmatpush3.bf16.msra.mxu1 %v4238_v30 }
0x1641   : > { %4245 = vmatpush3.bf16.msra.mxu0 %v4244_v43 }
0x170f   : > { %v3265_v53 = vpop.f32.mrb[26].mxu0 }
0x1710   : > { %v3266_v62 = vadd.f32 %v3265_v53, %v3195_v13  ;;  %v4037_v21 = vpop.f32.mrb[27].mxu0 }
0x1712   : > { %v3270_v14 = vmul.f32 0.70710677, %v3266_v62  ;;  %v3269_v3 = vmul.f32 0.5, %v3266_v62 }
0x1714   : > { %4367 = verf.f32 %v3270_v14 }
0x171e   : > { %v4368_v17 = vpop.eup %4367 }
0x171f   : > { %v3272_v23 = vadd.f32 1.0, %v4368_v17 }
0x1721   : > { %v3273_v34 = vmul.f32 %v3272_v23, %v3269_v3 }
0x1723   : > { %4047 = vmatmul.mubr.msk.f32.vlgmr.msra.gmra.mrb[26].mxu1 %vm630_vm0, %v3273_v34 }
0x17f6   : > { %v3348_v26 = vpop.f32.mrb[26].mxu1 }
0x17f7   : > { %v3352_v35 = vadd.f32 %v3348_v26, %v3161_v55  ;;  %v4048_v46 = vpop.f32.mrb[27].mxu1  ;;  %v3380_v55 = vrot.slane %v3358_v33, %v4713_v2 }
0x17f9   : > { %v3357_v19 = vadd.f32 %v3356_v18, %v3352_v35 }
0x17fb   : > { %v3359_v44 = vsel %vm630_vm0, %v3357_v19, 0.0 }
0x17fc   : > { %3360 = vadd.xlane.f32.xlu0 %v3359_v44 }
0x1889   : > { %v3361_v22 = vpop.xlane.xlu0 %3360 }
0x188a   : > { %v3362_v24 = vmul.f32 0.03125, %v3361_v22 }
0x188c   : > { %v3363_v31 = vsub.f32 %v3357_v19, %v3362_v24 }
0x188e   : > { %v3364_v36 = vmul.f32 %v3363_v31, %v3363_v31 }
0x1890   : > { %v3365_v39 = vsel %vm630_vm0, %v3364_v36, 0.0 }
0x1891   : > { %3366 = vadd.xlane.f32.xlu1 %v3365_v39 }
0x191e   : > { %v3367_v47 = vpop.xlane.xlu1 %3366 }
0x191f   : > { %v3368_v48 = vmul.f32 0.03125, %v3367_v47 }
0x1921   : > { %v3369_v12 = vadd.f32 1e-06, %v3368_v48 }
0x1923   : > { %4369 = vrsqrt.f32 %v3369_v12 }
0x192d   : > { %v4370_v50 = vpop.eup %4369 }
0x192e   : > { %v3371_v52 = vmul.f32 %v4370_v50, %v3363_v31 }
0x1930   : > { %v3376_v15 = vmul.f32 %v3375_v54, %v3371_v52 }
0x1932   : > { %v3381_v25 = vadd.f32 %v3380_v55, %v3376_v15 }
0x1934   : > { %4058 = vmatmul.mubr.msk.f32.vlgmr.msra.gmra.mrb[28].mxu0 %vm630_vm0, %v3381_v25 }
0x1a07   : > { %v3462_v61 = vpop.f32.mrb[28].mxu0 }
0x1a08   : > { %v3463_v6 = vadd.f32 %v3629_v59, %v3462_v61  ;;  %v4059_v56 = vpop.f32.mrb[29].mxu0 }
0x1a0a   : > { %v3466_v0 = vmax.f32 %v3463_v6, 0.0 }
0x1a0c   : > { %3467 = vst.msk [vmem:[%s411_s24] sm:$0xff] %vm630_vm0, %v3466_v0 }
0x1a0d PF: > { %s22_s21 = sadd.s32 1, %s4381_s21  }
0x1a0e   : > { %p19_p4 = scmp.ge.s32.totalorder %s22_s21, 4  }
0x1a10   :  { %21 = sbr.rel (!%p19_p4) target bundleno = 1 (0x1), region = 111 }

</bundles_post_ra>
